<compile_context>
chip_gen: v6e
topology: v6e:2x2x1
jax: 0.10.0
libtpu: 0.0.40
codegen_flags: <defaults>
</compile_context>

<pallas_src>
import functools

import jax
import jax.numpy as jnp
from jax.experimental import pallas as pl
from jax.experimental.pallas import tpu as pltpu

EPS = 1e-5
DEFAULT_TM = 512          # row tile for the early-conv matmuls, in ORIGINAL output rows


def _round_up(x, m):
    return (x + m - 1) // m * m


@functools.lru_cache(maxsize=None)
def _vmem_limit_bytes():
    """Per-generation scoped-VMEM budget (v5e/v6e: 128 MiB phys, v7x: 64 MiB/TC)."""
    try:
        cap = int(getattr(pltpu.get_tpu_info(), "vmem_capacity_bytes", 0))
    except Exception:
        cap = 0
    if cap <= 0:
        return 32 * 1024 * 1024
    return int(max(32 * 1024 * 1024, min(96 * 1024 * 1024, cap // 2)))


# --------------------------------------------------------------------------
# Pallas kernels
# --------------------------------------------------------------------------
def _matmul_bn_relu_kernel(a_ref, w_ref, s_ref, b_ref, o_ref):
    """One row tile: A(bf16) @ W(bf16) -> f32 acc, * scale + bias, ReLU, bf16 store."""
    acc = jnp.dot(a_ref[...], w_ref[...], preferred_element_type=jnp.float32)
    o_ref[...] = jnp.maximum(acc * s_ref[...] + b_ref[...], 0.0).astype(o_ref.dtype)


def _make_deep_fused_kernel(spatial_hw, n_fused):
    """Fused conv(n_tiled+1)..conv5 + GAP + MLP head, specialized to the (static)
    input spatial extent.  Each layer assembles its im2col matrix in a VMEM scratch
    (zero rows = zero-padding taps) and runs ONE stacked MXU matmul."""
    H0, W0 = spatial_hw

    def kernel(x_ref, *refs):
        conv_refs = refs[:3 * n_fused]
        w1_ref, b1_ref, w2_ref, b2_ref = refs[3 * n_fused:3 * n_fused + 4]
        o_ref = refs[3 * n_fused + 4]
        scr_refs = refs[3 * n_fused + 5:]

        bt = x_ref.shape[1]
        h, w = H0, W0
        # Per-position (bt, C) bf16 blocks (positions are static / trace-time).
        act = {(i, j): x_ref[0, :, i * W0 + j, :].astype(jnp.bfloat16)
               for i in range(h) for j in range(w)}

        for li in range(n_fused):
            w_ref = conv_refs[3 * li]               # (9*cin, cout) bf16
            scale = conv_refs[3 * li + 1][...]      # (1, cout) f32
            bias = conv_refs[3 * li + 2][...]       # (1, cout) f32
            scr = scr_refs[li]                      # (bt*oh*ow, 9*cin) bf16
            cin = w_ref.shape[0] // 9
            oh, ow = (h + 1) // 2, (w + 1) // 2

            # Build the layer im2col in VMEM scratch; OOB (padding) taps stay zero.
            scr[...] = jnp.zeros_like(scr)
            for i in range(oh):
                for j in range(ow):
                    r0 = (i * ow + j) * bt
                    for kh in range(3):
                        ih = 2 * i + kh - 1
                        if ih < 0 or ih >= h:
                            continue
                        for kw in range(3):
                            iw = 2 * j + kw - 1
                            if iw < 0 or iw >= w:
                                continue
                            t = 3 * kh + kw
                            scr[r0:r0 + bt, t * cin:(t + 1) * cin] = act[(ih, iw)]

            # One stacked matmul per layer (f32 epilogue: v5e-safe).
            y = jnp.dot(scr[...], w_ref[...], preferred_element_type=jnp.float32)
            y = jnp.maximum(y * scale + bias, 0.0)
            act = {(i, j): y[(i * ow + j) * bt:(i * ow + j + 1) * bt, :].astype(jnp.bfloat16)
                   for i in range(oh) for j in range(ow)}
            h, w = oh, ow

        # Global average pool (f32) + regression head; Dropout(0.2) = identity (eval).
        pooled = sum(v.astype(jnp.float32) for v in act.values()) * (1.0 / float(h * w))
        hv = jnp.dot(pooled.astype(jnp.bfloat16), w1_ref[...],
                     preferred_element_type=jnp.float32) + b1_ref[...]
        hv = jnp.maximum(hv, 0.0)
        out = jnp.dot(hv.astype(jnp.bfloat16), w2_ref[...],
                      preferred_element_type=jnp.float32) + b2_ref[...]
        o_ref[0] = out.astype(o_ref.dtype)

    return kernel


# --------------------------------------------------------------------------
# One-time parameter preparation (hoisted out of the per-forward path)
# --------------------------------------------------------------------------
def prepare_params(params, n_tiled=2):
    """Fold Conv-bias + BatchNorm(eval) into per-channel scale/bias, re-lay weights.

    Tiled (early) layers additionally get a block-diagonal `w_pack` so that
    `pack = 128 // Cout` consecutive output rows share one 128-lane output slab
    (lane-dense, unmasked stores).  For input_size=128 consider n_tiled=3.
    """
    tiled, fused = [], []
    for idx, layer in enumerate(params["convs"]):
        w = layer["w"]                                   # (Cout, Cin, 3, 3)
        cout, cin = w.shape[0], w.shape[1]
        inv_std = 1.0 / jnp.sqrt(layer["bn_var"] + EPS)
        scale = (layer["bn_gamma"] * inv_std).reshape(1, cout).astype(jnp.float32)
        bias = (layer["bn_beta"]
                + (layer["b"] - layer["bn_mean"]) * layer["bn_gamma"] * inv_std
                ).reshape(1, cout).astype(jnp.float32)
        w_mat = jnp.transpose(w, (2, 3, 1, 0)).reshape(9 * cin, cout)   # (K, Cout) f32

        if idx < n_tiled:
            kpad = _round_up(9 * cin, 32)                # 27 -> 32 for conv1
            w_t = jnp.pad(w_mat, ((0, kpad - 9 * cin), (0, 0))) if kpad > 9 * cin else w_mat
            entry = dict(w_mat=w_t.astype(jnp.bfloat16), scale=scale, bias=bias)
            pack = max(1, 128 // cout)
            if pack > 1:
                entry["w_pack"] = jnp.kron(jnp.eye(pack, dtype=jnp.float32),
                                           w_t).astype(jnp.bfloat16)
                entry["scale_pack"] = jnp.tile(scale, (1, pack))
                entry["bias_pack"] = jnp.tile(bias, (1, pack))
            tiled.append(entry)
        else:
            fused.append(dict(w_mat=w_mat.astype(jnp.bfloat16), scale=scale, bias=bias))

    head = dict(w1=params["w1"].astype(jnp.bfloat16),
                b1=params["b1"].reshape(1, -1).astype(jnp.float32),
                w2=params["w2"].astype(jnp.bfloat16),
                b2=params["b2"].reshape(1, -1).astype(jnp.float32))
    return dict(tiled_convs=tiled, fused_convs=fused, head=head)


# --------------------------------------------------------------------------
# Layer wrappers (glue in plain JAX, compute in Pallas)
# --------------------------------------------------------------------------
def conv_bn_relu_tiled(x_nhwc, layer_p, *, tm=DEFAULT_TM, vmem_limit=None):
    """Conv2d(k=3, s=2, p=1) + BN(eval) + ReLU as an M-tiled, lane-dense Pallas matmul."""
    B, H, W, Cin = x_nhwc.shape
    OH, OW = (H + 1) // 2, (W + 1) // 2
    K = 9 * Cin
    cout = layer_p["scale"].shape[1]
    kpad = layer_p["w_mat"].shape[0]                     # K padded to a multiple of 32
    M = B * OH * OW

    # im2col in bf16 (wrapper glue; single materialization).
    # TODO(synk): replace with in-kernel 9-tap accumulation over a halo-DMA'd row band.
    xp = jnp.pad(x_nhwc, ((0, 0), (1, 1), (1, 1), (0, 0)))
    patches = [xp[:, kh:kh + 2 * OH:2, kw:kw + 2 * OW:2, :]
               for kh in range(3) for kw in range(3)]
    a = jnp.concatenate(patches, axis=-1).astype(jnp.bfloat16)   # (B, OH, OW, K)
    if kpad > K:
        a = jnp.pad(a, ((0, 0), (0, 0), (0, 0), (0, kpad - K)))

    # Lane-dense packing: `pack` consecutive output rows share one 128-lane slab.
    pack = 1
    if "w_pack" in layer_p and M % (128 // cout) == 0:
        pack = 128 // cout
    if pack > 1:
        wgt, s, b = layer_p["w_pack"], layer_p["scale_pack"], layer_p["bias_pack"]
    else:
        wgt, s, b = layer_p["w_mat"], layer_p["scale"], layer_p["bias"]

    rows, kp, np_ = M // pack, pack * kpad, pack * cout
    a = a.reshape(rows, kp)                              # free row-major reshape

    if rows >= 16:
        tm_p = min(max(16, (tm // pack // 16) * 16), (rows // 16) * 16)
    else:
        tm_p = rows
    grid_m = pl.cdiv(rows, tm_p)

    out = pl.pallas_call(
        _matmul_bn_relu_kernel,
        out_shape=jax.ShapeDtypeStruct((rows, np_), jnp.bfloat16),
        grid=(grid_m,),
        in_specs=[pl.BlockSpec((tm_p, kp), lambda i: (i, 0)),
                  pl.BlockSpec((kp, np_), lambda i: (0, 0)),
                  pl.BlockSpec((1, np_), lambda i: (0, 0)),
                  pl.BlockSpec((1, np_), lambda i: (0, 0))],
        out_specs=pl.BlockSpec((tm_p, np_), lambda i: (i, 0)),
        compiler_params=pltpu.CompilerParams(
            dimension_semantics=("parallel",),
            vmem_limit_bytes=vmem_limit),
    )(a, wgt, s, b)
    # Packed (rows, pack*cout) -> (M, cout) -> NHWC are pure row-major reshapes (free).
    return out.reshape(M, cout).reshape(B, OH, OW, cout)


def deep_fused_forward(x_bhwc, prep, *, vmem_limit=None):
    """conv(n_tiled+1)..conv5 + GAP + regression head in one VMEM-resident Pallas call,
    batch split over a leading "parallel" grid axis (v7x: one half per TensorCore)."""
    B, H, W, C = x_bhwc.shape
    fused, head = prep["fused_convs"], prep["head"]
    n_fused = len(fused)
    S = H * W

    nb = 2 if (B >= 2 and B % 2 == 0) else 1
    bt = B // nb
    x = x_bhwc.astype(jnp.bfloat16).reshape(nb, bt, S, C)        # free reshapes

    operands = [x]
    in_specs = [pl.BlockSpec((1, bt, S, C), lambda bi: (bi, 0, 0, 0))]
    for layer in fused:
        for name in ("w_mat", "scale", "bias"):
            op = layer[name]
            operands.append(op)
            in_specs.append(pl.BlockSpec(op.shape, lambda bi, _nd=op.ndim: (0,) * _nd))
    for name in ("w1", "b1", "w2", "b2"):
        op = head[name]
        operands.append(op)
        in_specs.append(pl.BlockSpec(op.shape, lambda bi, _nd=op.ndim: (0,) * _nd))

    # Per-layer VMEM im2col scratch: (bt*oh*ow, 9*cin) bf16.
    scratch = []
    h, w, cin = H, W, C
    for layer in fused:
        oh, ow = (h + 1) // 2, (w + 1) // 2
        scratch.append(pltpu.VMEM((bt * oh * ow, 9 * cin), jnp.bfloat16))
        cin = layer["w_mat"].shape[1]
        h, w = oh, ow

    out = pl.pallas_call(
        _make_deep_fused_kernel((H, W), n_fused),
        out_shape=jax.ShapeDtypeStruct((nb, bt, 4), jnp.float32),
        grid=(nb,),
        in_specs=in_specs,
        out_specs=pl.BlockSpec((1, bt, 4), lambda bi: (bi, 0, 0)),
        scratch_shapes=scratch,
        compiler_params=pltpu.CompilerParams(
            dimension_semantics=("parallel",),
            vmem_limit_bytes=vmem_limit),
    )(*operands)
    return out.reshape(B, 4)


def scale_offset_detector_forward(x_nchw, prep):
    """Input: (B, 3, H, W) NCHW (PyTorch convention).  Output: (B, 4)."""
    vmem = _vmem_limit_bytes()
    x = jnp.transpose(x_nchw, (0, 2, 3, 1))                      # NCHW -> NHWC
    for layer in prep["tiled_convs"]:
        x = conv_bn_relu_tiled(x, layer, vmem_limit=vmem)
    return deep_fused_forward(x, prep, vmem_limit=vmem)


# --------------------------------------------------------------------------
# Deterministic parameter init (mirrors ScaleOffsetDetector._initialize_weights)
# --------------------------------------------------------------------------
def init_params(key):
    channels = [3, 32, 64, 128, 256, 512]
    convs = []
    for i in range(5):
        cin, cout = channels[i], channels[i + 1]
        key, sub = jax.random.split(key)
        std = (2.0 / (cout * 3 * 3)) ** 0.5               # kaiming_normal_, fan_out, relu
        w = std * jax.random.normal(sub, (cout, cin, 3, 3), jnp.float32)
        convs.append(dict(
            w=w,
            b=jnp.zeros((cout,), jnp.float32),
            bn_gamma=jnp.ones((cout,), jnp.float32),
            bn_beta=jnp.zeros((cout,), jnp.float32),
            bn_mean=jnp.zeros((cout,), jnp.float32),
            bn_var=jnp.ones((cout,), jnp.float32),
        ))
    key, k1, k2 = jax.random.split(key, 3)
    w1 = 0.01 * jax.random.normal(k1, (512, 128), jnp.float32)
    b1 = jnp.zeros((128,), jnp.float32)
    w2 = 0.01 * jax.random.normal(k2, (128, 4), jnp.float32)
    b2 = jnp.zeros((4,), jnp.float32)
    return dict(convs=convs, w1=w1, b1=b1, w2=w2, b2=b2)


# --------------------------------------------------------------------------
# Pure-JAX reference.  `cast` mirrors the kernel's bf16 matmul inputs (f32 accum).
# --------------------------------------------------------------------------
def reference_forward(x_nchw, params, cast=None):
    cast = (lambda v: v) if cast is None else cast
    x = jnp.transpose(x_nchw, (0, 2, 3, 1))
    for layer in params["convs"]:
        w_hwio = jnp.transpose(layer["w"], (2, 3, 1, 0))
        y = jax.lax.conv_general_dilated(
            cast(x), cast(w_hwio), window_strides=(2, 2), padding=((1, 1), (1, 1)),
            dimension_numbers=("NHWC", "HWIO", "NHWC"),
            preferred_element_type=jnp.float32)
        inv = 1.0 / jnp.sqrt(layer["bn_var"] + EPS)
        y = (y + layer["b"] - layer["bn_mean"]) * (layer["bn_gamma"] * inv) + layer["bn_beta"]
        x = jnp.maximum(y, 0.0)
    pooled = jnp.mean(x, axis=(1, 2))
    h = jnp.maximum(jnp.dot(cast(pooled), cast(params["w1"]),
                            preferred_element_type=jnp.float32) + params["b1"], 0.0)
    return jnp.dot(cast(h), cast(params["w2"]),
                   preferred_element_type=jnp.float32) + params["b2"]


# --------------------------------------------------------------------------
if __name__ == "__main__":
    key = jax.random.PRNGKey(0)
    k_x, k_p = jax.random.split(key)

    # Small shapes consistent with the module: (batch=2, channels=3, 16x16).
    x = jax.random.normal(k_x, (2, 3, 16, 16), jnp.float32)
    params = init_params(k_p)
    prep = prepare_params(params)                         # one-time weight prep

    fwd = jax.jit(scale_offset_detector_forward)
    out = jax.block_until_ready(fwd(x, prep))
    assert out.shape == (2, 4), out.shape

    # Tight check vs. a reference that mirrors the bf16 matmul inputs.
    ref_bf16 = jax.block_until_ready(
        reference_forward(x, params, cast=lambda v: v.astype(jnp.bfloat16)))
    assert jnp.allclose(out, ref_bf16, rtol=2e-2, atol=1e-3), (out, ref_bf16)

    # Sanity check vs. the pure-f32 reference (loose: bf16 rounding drift).
    ref_f32 = jax.block_until_ready(reference_forward(x, params))
    assert jnp.allclose(out, ref_f32, rtol=5e-2, atol=5e-3), (out, ref_f32)

    print("KERNEL_OK")
</pallas_src>

<mosaic_0001>
module attributes {stable_mosaic.version = 11 : i64} {
  func.func @_matmul_bn_relu_kernel(%arg0: i32, %arg1: memref<32x128xbf16, #tpu.memory_space<vmem>>, %arg2: memref<128x128xbf16, #tpu.memory_space<vmem>>, %arg3: memref<1x128xf32, #tpu.memory_space<vmem>>, %arg4: memref<1x128xf32, #tpu.memory_space<vmem>>, %arg5: memref<32x128xbf16, #tpu.memory_space<vmem>>) attributes {dimension_semantics = [#tpu.dimension_semantics<parallel>], iteration_bounds = array<i64: 1>, scalar_prefetch = 0 : i64, scratch_operands = 0 : i64, tpu.core_type = #tpu.core_type<tc>, window_params = [{transform_indices = @transform_0, window_bounds = array<i64: 32, 128>}, {pipeline_mode = #tpu.pipeline_mode<synchronous>, transform_indices = @transform_1, window_bounds = array<i64: 128, 128>}, {pipeline_mode = #tpu.pipeline_mode<synchronous>, transform_indices = @transform_2, window_bounds = array<i64: 1, 128>}, {pipeline_mode = #tpu.pipeline_mode<synchronous>, transform_indices = @transform_3, window_bounds = array<i64: 1, 128>}, {transform_indices = @transform_4, window_bounds = array<i64: 32, 128>}]} {
    %c0 = arith.constant 0 : index
    %c0_0 = arith.constant 0 : index
    %0 = vector.load %arg1[%c0, %c0_0] : memref<32x128xbf16, #tpu.memory_space<vmem>>, vector<32x128xbf16>
    %c0_1 = arith.constant 0 : index
    %c0_2 = arith.constant 0 : index
    %1 = vector.load %arg2[%c0_1, %c0_2] : memref<128x128xbf16, #tpu.memory_space<vmem>>, vector<128x128xbf16>
    %cst = arith.constant dense<0.000000e+00> : vector<32x128xf32>
    %2 = tpu.matmul %0, %1, %cst {dimension_numbers = #tpu.dot_dimension_numbers<[1], [0], [0], [1], [0, 0, 1, 1], [], []>} : vector<32x128xbf16>, vector<128x128xbf16>, vector<32x128xf32> -> vector<32x128xf32>
    %c0_3 = arith.constant 0 : index
    %c0_4 = arith.constant 0 : index
    %3 = vector.load %arg3[%c0_3, %c0_4] : memref<1x128xf32, #tpu.memory_space<vmem>>, vector<1x128xf32>
    %4 = vector.broadcast %3 : vector<1x128xf32> to vector<32x128xf32>
    %5 = arith.mulf %2, %4 : vector<32x128xf32>
    %c0_5 = arith.constant 0 : index
    %c0_6 = arith.constant 0 : index
    %6 = vector.load %arg4[%c0_5, %c0_6] : memref<1x128xf32, #tpu.memory_space<vmem>>, vector<1x128xf32>
    %7 = vector.broadcast %6 : vector<1x128xf32> to vector<32x128xf32>
    %8 = arith.addf %5, %7 : vector<32x128xf32>
    %cst_7 = arith.constant 0.000000e+00 : f32
    %9 = vector.broadcast %cst_7 : f32 to vector<32x128xf32>
    %10 = arith.maximumf %8, %9 : vector<32x128xf32>
    %11 = arith.truncf %10 : vector<32x128xf32> to vector<32x128xbf16>
    %c0_8 = arith.constant 0 : index
    %c0_9 = arith.constant 0 : index
    %12 = vector.load %arg5[%c0_8, %c0_9] : memref<32x128xbf16, #tpu.memory_space<vmem>>, vector<32x128xbf16>
    tpu.vector_store %arg5[%c0_8, %c0_9], %11 {strides = array<i32>} : memref<32x128xbf16, #tpu.memory_space<vmem>>, vector<32x128xbf16>,
    return
  }
  func.func @transform_0(%arg0: i32) -> (i32, i32) {
    %c0_i32 = arith.constant 0 : i32
    %c0_i32_0 = arith.constant 0 : i32
    return %arg0, %c0_i32 : i32, i32
  }
  func.func @transform_1(%arg0: i32) -> (i32, i32) {
    %c0_i32 = arith.constant 0 : i32
    %c0_i32_0 = arith.constant 0 : i32
    %c0_i32_1 = arith.constant 0 : i32
    return %c0_i32, %c0_i32_0 : i32, i32
  }
  func.func @transform_2(%arg0: i32) -> (i32, i32) {
    %c0_i32 = arith.constant 0 : i32
    %c0_i32_0 = arith.constant 0 : i32
    %c0_i32_1 = arith.constant 0 : i32
    return %c0_i32, %c0_i32_0 : i32, i32
  }
  func.func @transform_3(%arg0: i32) -> (i32, i32) {
    %c0_i32 = arith.constant 0 : i32
    %c0_i32_0 = arith.constant 0 : i32
    %c0_i32_1 = arith.constant 0 : i32
    return %c0_i32, %c0_i32_0 : i32, i32
  }
  func.func @transform_4(%arg0: i32) -> (i32, i32) {
    %c0_i32 = arith.constant 0 : i32
    %c0_i32_0 = arith.constant 0 : i32
    return %arg0, %c0_i32 : i32, i32
  }
}

module attributes {stable_mosaic.version = 11 : i64} {
  func.func @_matmul_bn_relu_kernel(%arg0: i32, %arg1: memref<16x576xbf16, #tpu.memory_space<vmem>>, %arg2: memref<576x128xbf16, #tpu.memory_space<vmem>>, %arg3: memref<1x128xf32, #tpu.memory_space<vmem>>, %arg4: memref<1x128xf32, #tpu.memory_space<vmem>>, %arg5: memref<16x128xbf16, #tpu.memory_space<vmem>>) attributes {dimension_semantics = [#tpu.dimension_semantics<parallel>], iteration_bounds = array<i64: 1>, scalar_prefetch = 0 : i64, scratch_operands = 0 : i64, tpu.core_type = #tpu.core_type<tc>, window_params = [{transform_indices = @transform_0, window_bounds = array<i64: 16, 576>}, {pipeline_mode = #tpu.pipeline_mode<synchronous>, transform_indices = @transform_1, window_bounds = array<i64: 576, 128>}, {pipeline_mode = #tpu.pipeline_mode<synchronous>, transform_indices = @transform_2, window_bounds = array<i64: 1, 128>}, {pipeline_mode = #tpu.pipeline_mode<synchronous>, transform_indices = @transform_3, window_bounds = array<i64: 1, 128>}, {transform_indices = @transform_4, window_bounds = array<i64: 16, 128>}]} {
    %c0 = arith.constant 0 : index
    %c0_0 = arith.constant 0 : index
    %0 = vector.load %arg1[%c0, %c0_0] : memref<16x576xbf16, #tpu.memory_space<vmem>>, vector<16x576xbf16>
    %c0_1 = arith.constant 0 : index
    %c0_2 = arith.constant 0 : index
    %1 = vector.load %arg2[%c0_1, %c0_2] : memref<576x128xbf16, #tpu.memory_space<vmem>>, vector<576x128xbf16>
    %cst = arith.constant dense<0.000000e+00> : vector<16x128xf32>
    %2 = tpu.matmul %0, %1, %cst {dimension_numbers = #tpu.dot_dimension_numbers<[1], [0], [0], [1], [0, 0, 1, 1], [], []>} : vector<16x576xbf16>, vector<576x128xbf16>, vector<16x128xf32> -> vector<16x128xf32>
    %c0_3 = arith.constant 0 : index
    %c0_4 = arith.constant 0 : index
    %3 = vector.load %arg3[%c0_3, %c0_4] : memref<1x128xf32, #tpu.memory_space<vmem>>, vector<1x128xf32>
    %4 = vector.broadcast %3 : vector<1x128xf32> to vector<16x128xf32>
    %5 = arith.mulf %2, %4 : vector<16x128xf32>
    %c0_5 = arith.constant 0 : index
    %c0_6 = arith.constant 0 : index
    %6 = vector.load %arg4[%c0_5, %c0_6] : memref<1x128xf32, #tpu.memory_space<vmem>>, vector<1x128xf32>
    %7 = vector.broadcast %6 : vector<1x128xf32> to vector<16x128xf32>
    %8 = arith.addf %5, %7 : vector<16x128xf32>
    %cst_7 = arith.constant 0.000000e+00 : f32
    %9 = vector.broadcast %cst_7 : f32 to vector<16x128xf32>
    %10 = arith.maximumf %8, %9 : vector<16x128xf32>
    %11 = arith.truncf %10 : vector<16x128xf32> to vector<16x128xbf16>
    %c0_8 = arith.constant 0 : index
    %c0_9 = arith.constant 0 : index
    %12 = vector.load %arg5[%c0_8, %c0_9] : memref<16x128xbf16, #tpu.memory_space<vmem>>, vector<16x128xbf16>
    tpu.vector_store %arg5[%c0_8, %c0_9], %11 {strides = array<i32>} : memref<16x128xbf16, #tpu.memory_space<vmem>>, vector<16x128xbf16>,
    return
  }
  func.func @transform_0(%arg0: i32) -> (i32, i32) {
    %c0_i32 = arith.constant 0 : i32
    %c0_i32_0 = arith.constant 0 : i32
    return %arg0, %c0_i32 : i32, i32
  }
  func.func @transform_1(%arg0: i32) -> (i32, i32) {
    %c0_i32 = arith.constant 0 : i32
    %c0_i32_0 = arith.constant 0 : i32
    %c0_i32_1 = arith.constant 0 : i32
    return %c0_i32, %c0_i32_0 : i32, i32
  }
  func.func @transform_2(%arg0: i32) -> (i32, i32) {
    %c0_i32 = arith.constant 0 : i32
    %c0_i32_0 = arith.constant 0 : i32
    %c0_i32_1 = arith.constant 0 : i32
    return %c0_i32, %c0_i32_0 : i32, i32
  }
  func.func @transform_3(%arg0: i32) -> (i32, i32) {
    %c0_i32 = arith.constant 0 : i32
    %c0_i32_0 = arith.constant 0 : i32
    %c0_i32_1 = arith.constant 0 : i32
    return %c0_i32, %c0_i32_0 : i32, i32
  }
  func.func @transform_4(%arg0: i32) -> (i32, i32) {
    %c0_i32 = arith.constant 0 : i32
    %c0_i32_0 = arith.constant 0 : i32
    return %arg0, %c0_i32 : i32, i32
  }
}

module attributes {stable_mosaic.version = 11 : i64} {
  func.func @kernel(%arg0: i32, %arg1: memref<1x1x16x64xbf16, #tpu.memory_space<vmem>>, %arg2: memref<576x128xbf16, #tpu.memory_space<vmem>>, %arg3: memref<1x128xf32, #tpu.memory_space<vmem>>, %arg4: memref<1x128xf32, #tpu.memory_space<vmem>>, %arg5: memref<1152x256xbf16, #tpu.memory_space<vmem>>, %arg6: memref<1x256xf32, #tpu.memory_space<vmem>>, %arg7: memref<1x256xf32, #tpu.memory_space<vmem>>, %arg8: memref<2304x512xbf16, #tpu.memory_space<vmem>>, %arg9: memref<1x512xf32, #tpu.memory_space<vmem>>, %arg10: memref<1x512xf32, #tpu.memory_space<vmem>>, %arg11: memref<512x128xbf16, #tpu.memory_space<vmem>>, %arg12: memref<1x128xf32, #tpu.memory_space<vmem>>, %arg13: memref<128x4xbf16, #tpu.memory_space<vmem>>, %arg14: memref<1x4xf32, #tpu.memory_space<vmem>>, %arg15: memref<1x1x4xf32, #tpu.memory_space<vmem>>, %arg16: memref<4x576xbf16, #tpu.memory_space<vmem>>, %arg17: memref<1x1152xbf16, #tpu.memory_space<vmem>>, %arg18: memref<1x2304xbf16, #tpu.memory_space<vmem>>) attributes {dimension_semantics = [#tpu.dimension_semantics<parallel>], iteration_bounds = array<i64: 2>, scalar_prefetch = 0 : i64, scratch_operands = 3 : i64, tpu.core_type = #tpu.core_type<tc>, window_params = [{transform_indices = @transform_0, window_bounds = array<i64: 1, 1, 16, 64>}, {pipeline_mode = #tpu.pipeline_mode<synchronous>, transform_indices = @transform_1, window_bounds = array<i64: 576, 128>}, {pipeline_mode = #tpu.pipeline_mode<synchronous>, transform_indices = @transform_2, window_bounds = array<i64: 1, 128>}, {pipeline_mode = #tpu.pipeline_mode<synchronous>, transform_indices = @transform_3, window_bounds = array<i64: 1, 128>}, {pipeline_mode = #tpu.pipeline_mode<synchronous>, transform_indices = @transform_4, window_bounds = array<i64: 1152, 256>}, {pipeline_mode = #tpu.pipeline_mode<synchronous>, transform_indices = @transform_5, window_bounds = array<i64: 1, 256>}, {pipeline_mode = #tpu.pipeline_mode<synchronous>, transform_indices = @transform_6, window_bounds = array<i64: 1, 256>}, {pipeline_mode = #tpu.pipeline_mode<synchronous>, transform_indices = @transform_7, window_bounds = array<i64: 2304, 512>}, {pipeline_mode = #tpu.pipeline_mode<synchronous>, transform_indices = @transform_8, window_bounds = array<i64: 1, 512>}, {pipeline_mode = #tpu.pipeline_mode<synchronous>, transform_indices = @transform_9, window_bounds = array<i64: 1, 512>}, {pipeline_mode = #tpu.pipeline_mode<synchronous>, transform_indices = @transform_10, window_bounds = array<i64: 512, 128>}, {pipeline_mode = #tpu.pipeline_mode<synchronous>, transform_indices = @transform_11, window_bounds = array<i64: 1, 128>}, {pipeline_mode = #tpu.pipeline_mode<synchronous>, transform_indices = @transform_12, window_bounds = array<i64: 128, 4>}, {pipeline_mode = #tpu.pipeline_mode<synchronous>, transform_indices = @transform_13, window_bounds = array<i64: 1, 4>}, {transform_indices = @transform_14, window_bounds = array<i64: 1, 1, 4>}]} {
    %c0 = arith.constant 0 : index
    %c0_0 = arith.constant 0 : index
    %c0_1 = arith.constant 0 : index
    %c0_2 = arith.constant 0 : index
    %0 = vector.load %arg1[%c0, %c0_0, %c0_1, %c0_2] : memref<1x1x16x64xbf16, #tpu.memory_space<vmem>>, vector<1x1x1x64xbf16>
    %1 = vector.shape_cast %0 : vector<1x1x1x64xbf16> to vector<1x64xbf16>
    %c0_3 = arith.constant 0 : index
    %c0_4 = arith.constant 0 : index
    %c1 = arith.constant 1 : index
    %c0_5 = arith.constant 0 : index
    %2 = vector.load %arg1[%c0_3, %c0_4, %c1, %c0_5] : memref<1x1x16x64xbf16, #tpu.memory_space<vmem>>, vector<1x1x1x64xbf16>
    %3 = vector.shape_cast %2 : vector<1x1x1x64xbf16> to vector<1x64xbf16>
    %c0_6 = arith.constant 0 : index
    %c0_7 = arith.constant 0 : index
    %c2 = arith.constant 2 : index
    %c0_8 = arith.constant 0 : index
    %4 = vector.load %arg1[%c0_6, %c0_7, %c2, %c0_8] : memref<1x1x16x64xbf16, #tpu.memory_space<vmem>>, vector<1x1x1x64xbf16>
    %5 = vector.shape_cast %4 : vector<1x1x1x64xbf16> to vector<1x64xbf16>
    %c0_9 = arith.constant 0 : index
    %c0_10 = arith.constant 0 : index
    %c3 = arith.constant 3 : index
    %c0_11 = arith.constant 0 : index
    %6 = vector.load %arg1[%c0_9, %c0_10, %c3, %c0_11] : memref<1x1x16x64xbf16, #tpu.memory_space<vmem>>, vector<1x1x1x64xbf16>
    %7 = vector.shape_cast %6 : vector<1x1x1x64xbf16> to vector<1x64xbf16>
    %c0_12 = arith.constant 0 : index
    %c0_13 = arith.constant 0 : index
    %c4 = arith.constant 4 : index
    %c0_14 = arith.constant 0 : index
    %8 = vector.load %arg1[%c0_12, %c0_13, %c4, %c0_14] : memref<1x1x16x64xbf16, #tpu.memory_space<vmem>>, vector<1x1x1x64xbf16>
    %9 = vector.shape_cast %8 : vector<1x1x1x64xbf16> to vector<1x64xbf16>
    %c0_15 = arith.constant 0 : index
    %c0_16 = arith.constant 0 : index
    %c5 = arith.constant 5 : index
    %c0_17 = arith.constant 0 : index
    %10 = vector.load %arg1[%c0_15, %c0_16, %c5, %c0_17] : memref<1x1x16x64xbf16, #tpu.memory_space<vmem>>, vector<1x1x1x64xbf16>
    %11 = vector.shape_cast %10 : vector<1x1x1x64xbf16> to vector<1x64xbf16>
    %c0_18 = arith.constant 0 : index
    %c0_19 = arith.constant 0 : index
    %c6 = arith.constant 6 : index
    %c0_20 = arith.constant 0 : index
    %12 = vector.load %arg1[%c0_18, %c0_19, %c6, %c0_20] : memref<1x1x16x64xbf16, #tpu.memory_space<vmem>>, vector<1x1x1x64xbf16>
    %13 = vector.shape_cast %12 : vector<1x1x1x64xbf16> to vector<1x64xbf16>
    %c0_21 = arith.constant 0 : index
    %c0_22 = arith.constant 0 : index
    %c7 = arith.constant 7 : index
    %c0_23 = arith.constant 0 : index
    %14 = vector.load %arg1[%c0_21, %c0_22, %c7, %c0_23] : memref<1x1x16x64xbf16, #tpu.memory_space<vmem>>, vector<1x1x1x64xbf16>
    %15 = vector.shape_cast %14 : vector<1x1x1x64xbf16> to vector<1x64xbf16>
    %c0_24 = arith.constant 0 : index
    %c0_25 = arith.constant 0 : index
    %c8 = arith.constant 8 : index
    %c0_26 = arith.constant 0 : index
    %16 = vector.load %arg1[%c0_24, %c0_25, %c8, %c0_26] : memref<1x1x16x64xbf16, #tpu.memory_space<vmem>>, vector<1x1x1x64xbf16>
    %17 = vector.shape_cast %16 : vector<1x1x1x64xbf16> to vector<1x64xbf16>
    %c0_27 = arith.constant 0 : index
    %c0_28 = arith.constant 0 : index
    %c9 = arith.constant 9 : index
    %c0_29 = arith.constant 0 : index
    %18 = vector.load %arg1[%c0_27, %c0_28, %c9, %c0_29] : memref<1x1x16x64xbf16, #tpu.memory_space<vmem>>, vector<1x1x1x64xbf16>
    %19 = vector.shape_cast %18 : vector<1x1x1x64xbf16> to vector<1x64xbf16>
    %c0_30 = arith.constant 0 : index
    %c0_31 = arith.constant 0 : index
    %c10 = arith.constant 10 : index
    %c0_32 = arith.constant 0 : index
    %20 = vector.load %arg1[%c0_30, %c0_31, %c10, %c0_32] : memref<1x1x16x64xbf16, #tpu.memory_space<vmem>>, vector<1x1x1x64xbf16>
    %21 = vector.shape_cast %20 : vector<1x1x1x64xbf16> to vector<1x64xbf16>
    %c0_33 = arith.constant 0 : index
    %c0_34 = arith.constant 0 : index
    %c11 = arith.constant 11 : index
    %c0_35 = arith.constant 0 : index
    %22 = vector.load %arg1[%c0_33, %c0_34, %c11, %c0_35] : memref<1x1x16x64xbf16, #tpu.memory_space<vmem>>, vector<1x1x1x64xbf16>
    %23 = vector.shape_cast %22 : vector<1x1x1x64xbf16> to vector<1x64xbf16>
    %c0_36 = arith.constant 0 : index
    %c0_37 = arith.constant 0 : index
    %c12 = arith.constant 12 : index
    %c0_38 = arith.constant 0 : index
    %24 = vector.load %arg1[%c0_36, %c0_37, %c12, %c0_38] : memref<1x1x16x64xbf16, #tpu.memory_space<vmem>>, vector<1x1x1x64xbf16>
    %25 = vector.shape_cast %24 : vector<1x1x1x64xbf16> to vector<1x64xbf16>
    %c0_39 = arith.constant 0 : index
    %c0_40 = arith.constant 0 : index
    %c13 = arith.constant 13 : index
    %c0_41 = arith.constant 0 : index
    %26 = vector.load %arg1[%c0_39, %c0_40, %c13, %c0_41] : memref<1x1x16x64xbf16, #tpu.memory_space<vmem>>, vector<1x1x1x64xbf16>
    %27 = vector.shape_cast %26 : vector<1x1x1x64xbf16> to vector<1x64xbf16>
    %c0_42 = arith.constant 0 : index
    %c0_43 = arith.constant 0 : index
    %c14 = arith.constant 14 : index
    %c0_44 = arith.constant 0 : index
    %28 = vector.load %arg1[%c0_42, %c0_43, %c14, %c0_44] : memref<1x1x16x64xbf16, #tpu.memory_space<vmem>>, vector<1x1x1x64xbf16>
    %29 = vector.shape_cast %28 : vector<1x1x1x64xbf16> to vector<1x64xbf16>
    %c0_45 = arith.constant 0 : index
    %c0_46 = arith.constant 0 : index
    %c15 = arith.constant 15 : index
    %c0_47 = arith.constant 0 : index
    %30 = vector.load %arg1[%c0_45, %c0_46, %c15, %c0_47] : memref<1x1x16x64xbf16, #tpu.memory_space<vmem>>, vector<1x1x1x64xbf16>
    %31 = vector.shape_cast %30 : vector<1x1x1x64xbf16> to vector<1x64xbf16>
    %c0_48 = arith.constant 0 : index
    %c0_49 = arith.constant 0 : index
    %32 = vector.load %arg3[%c0_48, %c0_49] : memref<1x128xf32, #tpu.memory_space<vmem>>, vector<1x128xf32>
    %c0_50 = arith.constant 0 : index
    %c0_51 = arith.constant 0 : index
    %33 = vector.load %arg4[%c0_50, %c0_51] : memref<1x128xf32, #tpu.memory_space<vmem>>, vector<1x128xf32>
    %cst = arith.constant 0.000000e+00 : bf16
    %34 = vector.broadcast %cst : bf16 to vector<4x576xbf16>
    %c0_52 = arith.constant 0 : index
    %c0_53 = arith.constant 0 : index
    %35 = vector.load %arg16[%c0_52, %c0_53] : memref<4x576xbf16, #tpu.memory_space<vmem>>, vector<4x576xbf16>
    tpu.vector_store %arg16[%c0_52, %c0_53], %34 {strides = array<i32>} : memref<4x576xbf16, #tpu.memory_space<vmem>>, vector<4x576xbf16>,
    %c0_54 = arith.constant 0 : index
    %c256 = arith.constant 256 : index
    %36 = vector.load %arg16[%c0_54, %c256] : memref<4x576xbf16, #tpu.memory_space<vmem>>, vector<1x64xbf16>
    tpu.vector_store %arg16[%c0_54, %c256], %1 {strides = array<i32>} : memref<4x576xbf16, #tpu.memory_space<vmem>>, vector<1x64xbf16>,
    %c0_55 = arith.constant 0 : index
    %c320 = arith.constant 320 : index
    %37 = vector.load %arg16[%c0_55, %c320] : memref<4x576xbf16, #tpu.memory_space<vmem>>, vector<1x64xbf16>
    tpu.vector_store %arg16[%c0_55, %c320], %3 {strides = array<i32>} : memref<4x576xbf16, #tpu.memory_space<vmem>>, vector<1x64xbf16>,
    %c0_56 = arith.constant 0 : index
    %c448 = arith.constant 448 : index
    %38 = vector.load %arg16[%c0_56, %c448] : memref<4x576xbf16, #tpu.memory_space<vmem>>, vector<1x64xbf16>
    tpu.vector_store %arg16[%c0_56, %c448], %9 {strides = array<i32>} : memref<4x576xbf16, #tpu.memory_space<vmem>>, vector<1x64xbf16>,
    %c0_57 = arith.constant 0 : index
    %c512 = arith.constant 512 : index
    %39 = vector.load %arg16[%c0_57, %c512] : memref<4x576xbf16, #tpu.memory_space<vmem>>, vector<1x64xbf16>
    tpu.vector_store %arg16[%c0_57, %c512], %11 {strides = array<i32>} : memref<4x576xbf16, #tpu.memory_space<vmem>>, vector<1x64xbf16>,
    %c1_58 = arith.constant 1 : index
    %c192 = arith.constant 192 : index
    %40 = vector.load %arg16[%c1_58, %c192] : memref<4x576xbf16, #tpu.memory_space<vmem>>, vector<1x64xbf16>
    tpu.vector_store %arg16[%c1_58, %c192], %3 {strides = array<i32>} : memref<4x576xbf16, #tpu.memory_space<vmem>>, vector<1x64xbf16>,
    %c1_59 = arith.constant 1 : index
    %c256_60 = arith.constant 256 : index
    %41 = vector.load %arg16[%c1_59, %c256_60] : memref<4x576xbf16, #tpu.memory_space<vmem>>, vector<1x64xbf16>
    tpu.vector_store %arg16[%c1_59, %c256_60], %5 {strides = array<i32>} : memref<4x576xbf16, #tpu.memory_space<vmem>>, vector<1x64xbf16>,
    %c1_61 = arith.constant 1 : index
    %c320_62 = arith.constant 320 : index
    %42 = vector.load %arg16[%c1_61, %c320_62] : memref<4x576xbf16, #tpu.memory_space<vmem>>, vector<1x64xbf16>
    tpu.vector_store %arg16[%c1_61, %c320_62], %7 {strides = array<i32>} : memref<4x576xbf16, #tpu.memory_space<vmem>>, vector<1x64xbf16>,
    %c1_63 = arith.constant 1 : index
    %c384 = arith.constant 384 : index
    %43 = vector.load %arg16[%c1_63, %c384] : memref<4x576xbf16, #tpu.memory_space<vmem>>, vector<1x64xbf16>
    tpu.vector_store %arg16[%c1_63, %c384], %11 {strides = array<i32>} : memref<4x576xbf16, #tpu.memory_space<vmem>>, vector<1x64xbf16>,
    %c1_64 = arith.constant 1 : index
    %c448_65 = arith.constant 448 : index
    %44 = vector.load %arg16[%c1_64, %c448_65] : memref<4x576xbf16, #tpu.memory_space<vmem>>, vector<1x64xbf16>
    tpu.vector_store %arg16[%c1_64, %c448_65], %13 {strides = array<i32>} : memref<4x576xbf16, #tpu.memory_space<vmem>>, vector<1x64xbf16>,
    %c1_66 = arith.constant 1 : index
    %c512_67 = arith.constant 512 : index
    %45 = vector.load %arg16[%c1_66, %c512_67] : memref<4x576xbf16, #tpu.memory_space<vmem>>, vector<1x64xbf16>
    tpu.vector_store %arg16[%c1_66, %c512_67], %15 {strides = array<i32>} : memref<4x576xbf16, #tpu.memory_space<vmem>>, vector<1x64xbf16>,
    %c2_68 = arith.constant 2 : index
    %c64 = arith.constant 64 : index
    %46 = vector.load %arg16[%c2_68, %c64] : memref<4x576xbf16, #tpu.memory_space<vmem>>, vector<1x64xbf16>
    tpu.vector_store %arg16[%c2_68, %c64], %9 {strides = array<i32>} : memref<4x576xbf16, #tpu.memory_space<vmem>>, vector<1x64xbf16>,
    %c2_69 = arith.constant 2 : index
    %c128 = arith.constant 128 : index
    %47 = vector.load %arg16[%c2_69, %c128] : memref<4x576xbf16, #tpu.memory_space<vmem>>, vector<1x64xbf16>
    tpu.vector_store %arg16[%c2_69, %c128], %11 {strides = array<i32>} : memref<4x576xbf16, #tpu.memory_space<vmem>>, vector<1x64xbf16>,
    %c2_70 = arith.constant 2 : index
    %c256_71 = arith.constant 256 : index
    %48 = vector.load %arg16[%c2_70, %c256_71] : memref<4x576xbf16, #tpu.memory_space<vmem>>, vector<1x64xbf16>
    tpu.vector_store %arg16[%c2_70, %c256_71], %17 {strides = array<i32>} : memref<4x576xbf16, #tpu.memory_space<vmem>>, vector<1x64xbf16>,
    %c2_72 = arith.constant 2 : index
    %c320_73 = arith.constant 320 : index
    %49 = vector.load %arg16[%c2_72, %c320_73] : memref<4x576xbf16, #tpu.memory_space<vmem>>, vector<1x64xbf16>
    tpu.vector_store %arg16[%c2_72, %c320_73], %19 {strides = array<i32>} : memref<4x576xbf16, #tpu.memory_space<vmem>>, vector<1x64xbf16>,
    %c2_74 = arith.constant 2 : index
    %c448_75 = arith.constant 448 : index
    %50 = vector.load %arg16[%c2_74, %c448_75] : memref<4x576xbf16, #tpu.memory_space<vmem>>, vector<1x64xbf16>
    tpu.vector_store %arg16[%c2_74, %c448_75], %25 {strides = array<i32>} : memref<4x576xbf16, #tpu.memory_space<vmem>>, vector<1x64xbf16>,
    %c2_76 = arith.constant 2 : index
    %c512_77 = arith.constant 512 : index
    %51 = vector.load %arg16[%c2_76, %c512_77] : memref<4x576xbf16, #tpu.memory_space<vmem>>, vector<1x64xbf16>
    tpu.vector_store %arg16[%c2_76, %c512_77], %27 {strides = array<i32>} : memref<4x576xbf16, #tpu.memory_space<vmem>>, vector<1x64xbf16>,
    %c3_78 = arith.constant 3 : index
    %c0_79 = arith.constant 0 : index
    %52 = vector.load %arg16[%c3_78, %c0_79] : memref<4x576xbf16, #tpu.memory_space<vmem>>, vector<1x64xbf16>
    tpu.vector_store %arg16[%c3_78, %c0_79], %11 {strides = array<i32>} : memref<4x576xbf16, #tpu.memory_space<vmem>>, vector<1x64xbf16>,
    %c3_80 = arith.constant 3 : index
    %c64_81 = arith.constant 64 : index
    %53 = vector.load %arg16[%c3_80, %c64_81] : memref<4x576xbf16, #tpu.memory_space<vmem>>, vector<1x64xbf16>
    tpu.vector_store %arg16[%c3_80, %c64_81], %13 {strides = array<i32>} : memref<4x576xbf16, #tpu.memory_space<vmem>>, vector<1x64xbf16>,
    %c3_82 = arith.constant 3 : index
    %c128_83 = arith.constant 128 : index
    %54 = vector.load %arg16[%c3_82, %c128_83] : memref<4x576xbf16, #tpu.memory_space<vmem>>, vector<1x64xbf16>
    tpu.vector_store %arg16[%c3_82, %c128_83], %15 {strides = array<i32>} : memref<4x576xbf16, #tpu.memory_space<vmem>>, vector<1x64xbf16>,
    %c3_84 = arith.constant 3 : index
    %c192_85 = arith.constant 192 : index
    %55 = vector.load %arg16[%c3_84, %c192_85] : memref<4x576xbf16, #tpu.memory_space<vmem>>, vector<1x64xbf16>
    tpu.vector_store %arg16[%c3_84, %c192_85], %19 {strides = array<i32>} : memref<4x576xbf16, #tpu.memory_space<vmem>>, vector<1x64xbf16>,
    %c3_86 = arith.constant 3 : index
    %c256_87 = arith.constant 256 : index
    %56 = vector.load %arg16[%c3_86, %c256_87] : memref<4x576xbf16, #tpu.memory_space<vmem>>, vector<1x64xbf16>
    tpu.vector_store %arg16[%c3_86, %c256_87], %21 {strides = array<i32>} : memref<4x576xbf16, #tpu.memory_space<vmem>>, vector<1x64xbf16>,
    %c3_88 = arith.constant 3 : index
    %c320_89 = arith.constant 320 : index
    %57 = vector.load %arg16[%c3_88, %c320_89] : memref<4x576xbf16, #tpu.memory_space<vmem>>, vector<1x64xbf16>
    tpu.vector_store %arg16[%c3_88, %c320_89], %23 {strides = array<i32>} : memref<4x576xbf16, #tpu.memory_space<vmem>>, vector<1x64xbf16>,
    %c3_90 = arith.constant 3 : index
    %c384_91 = arith.constant 384 : index
    %58 = vector.load %arg16[%c3_90, %c384_91] : memref<4x576xbf16, #tpu.memory_space<vmem>>, vector<1x64xbf16>
    tpu.vector_store %arg16[%c3_90, %c384_91], %27 {strides = array<i32>} : memref<4x576xbf16, #tpu.memory_space<vmem>>, vector<1x64xbf16>,
    %c3_92 = arith.constant 3 : index
    %c448_93 = arith.constant 448 : index
    %59 = vector.load %arg16[%c3_92, %c448_93] : memref<4x576xbf16, #tpu.memory_space<vmem>>, vector<1x64xbf16>
    tpu.vector_store %arg16[%c3_92, %c448_93], %29 {strides = array<i32>} : memref<4x576xbf16, #tpu.memory_space<vmem>>, vector<1x64xbf16>,
    %c3_94 = arith.constant 3 : index
    %c512_95 = arith.constant 512 : index
    %60 = vector.load %arg16[%c3_94, %c512_95] : memref<4x576xbf16, #tpu.memory_space<vmem>>, vector<1x64xbf16>
    tpu.vector_store %arg16[%c3_94, %c512_95], %31 {strides = array<i32>} : memref<4x576xbf16, #tpu.memory_space<vmem>>, vector<1x64xbf16>,
    %c0_96 = arith.constant 0 : index
    %c0_97 = arith.constant 0 : index
    %61 = vector.load %arg16[%c0_96, %c0_97] : memref<4x576xbf16, #tpu.memory_space<vmem>>, vector<4x576xbf16>
    %c0_98 = arith.constant 0 : index
    %c0_99 = arith.constant 0 : index
    %62 = vector.load %arg2[%c0_98, %c0_99] : memref<576x128xbf16, #tpu.memory_space<vmem>>, vector<576x128xbf16>
    %cst_100 = arith.constant dense<0.000000e+00> : vector<4x128xf32>
    %63 = tpu.matmul %61, %62, %cst_100 {dimension_numbers = #tpu.dot_dimension_numbers<[1], [0], [0], [1], [0, 0, 1, 1], [], []>} : vector<4x576xbf16>, vector<576x128xbf16>, vector<4x128xf32> -> vector<4x128xf32>
    %64 = vector.broadcast %32 : vector<1x128xf32> to vector<4x128xf32>
    %65 = arith.mulf %63, %64 : vector<4x128xf32>
    %66 = vector.broadcast %33 : vector<1x128xf32> to vector<4x128xf32>
    %67 = arith.addf %65, %66 : vector<4x128xf32>
    %cst_101 = arith.constant 0.000000e+00 : f32
    %68 = vector.broadcast %cst_101 : f32 to vector<4x128xf32>
    %69 = arith.maximumf %67, %68 : vector<4x128xf32>
    %70 = vector.extract_strided_slice %69 {offsets = [0, 0], sizes = [1, 128], strides = [1, 1]} : vector<4x128xf32> to vector<1x128xf32>
    %71 = arith.truncf %70 : vector<1x128xf32> to vector<1x128xbf16>
    %72 = vector.extract_strided_slice %69 {offsets = [1, 0], sizes = [1, 128], strides = [1, 1]} : vector<4x128xf32> to vector<1x128xf32>
    %73 = arith.truncf %72 : vector<1x128xf32> to vector<1x128xbf16>
    %74 = vector.extract_strided_slice %69 {offsets = [2, 0], sizes = [1, 128], strides = [1, 1]} : vector<4x128xf32> to vector<1x128xf32>
    %75 = arith.truncf %74 : vector<1x128xf32> to vector<1x128xbf16>
    %76 = vector.extract_strided_slice %69 {offsets = [3, 0], sizes = [1, 128], strides = [1, 1]} : vector<4x128xf32> to vector<1x128xf32>
    %77 = arith.truncf %76 : vector<1x128xf32> to vector<1x128xbf16>
    %c0_102 = arith.constant 0 : index
    %c0_103 = arith.constant 0 : index
    %78 = vector.load %arg6[%c0_102, %c0_103] : memref<1x256xf32, #tpu.memory_space<vmem>>, vector<1x256xf32>
    %c0_104 = arith.constant 0 : index
    %c0_105 = arith.constant 0 : index
    %79 = vector.load %arg7[%c0_104, %c0_105] : memref<1x256xf32, #tpu.memory_space<vmem>>, vector<1x256xf32>
    %cst_106 = arith.constant 0.000000e+00 : bf16
    %80 = vector.broadcast %cst_106 : bf16 to vector<1x1152xbf16>
    %c0_107 = arith.constant 0 : index
    %c0_108 = arith.constant 0 : index
    %81 = vector.load %arg17[%c0_107, %c0_108] : memref<1x1152xbf16, #tpu.memory_space<vmem>>, vector<1x1152xbf16>
    tpu.vector_store %arg17[%c0_107, %c0_108], %80 {strides = array<i32>} : memref<1x1152xbf16, #tpu.memory_space<vmem>>, vector<1x1152xbf16>,
    %c0_109 = arith.constant 0 : index
    %c512_110 = arith.constant 512 : index
    %82 = vector.load %arg17[%c0_109, %c512_110] : memref<1x1152xbf16, #tpu.memory_space<vmem>>, vector<1x128xbf16>
    tpu.vector_store %arg17[%c0_109, %c512_110], %71 {strides = array<i32>} : memref<1x1152xbf16, #tpu.memory_space<vmem>>, vector<1x128xbf16>,
    %c0_111 = arith.constant 0 : index
    %c640 = arith.constant 640 : index
    %83 = vector.load %arg17[%c0_111, %c640] : memref<1x1152xbf16, #tpu.memory_space<vmem>>, vector<1x128xbf16>
    tpu.vector_store %arg17[%c0_111, %c640], %73 {strides = array<i32>} : memref<1x1152xbf16, #tpu.memory_space<vmem>>, vector<1x128xbf16>,
    %c0_112 = arith.constant 0 : index
    %c896 = arith.constant 896 : index
    %84 = vector.load %arg17[%c0_112, %c896] : memref<1x1152xbf16, #tpu.memory_space<vmem>>, vector<1x128xbf16>
    tpu.vector_store %arg17[%c0_112, %c896], %75 {strides = array<i32>} : memref<1x1152xbf16, #tpu.memory_space<vmem>>, vector<1x128xbf16>,
    %c0_113 = arith.constant 0 : index
    %c1024 = arith.constant 1024 : index
    %85 = vector.load %arg17[%c0_113, %c1024] : memref<1x1152xbf16, #tpu.memory_space<vmem>>, vector<1x128xbf16>
    tpu.vector_store %arg17[%c0_113, %c1024], %77 {strides = array<i32>} : memref<1x1152xbf16, #tpu.memory_space<vmem>>, vector<1x128xbf16>,
    %c0_114 = arith.constant 0 : index
    %c0_115 = arith.constant 0 : index
    %86 = vector.load %arg17[%c0_114, %c0_115] : memref<1x1152xbf16, #tpu.memory_space<vmem>>, vector<1x1152xbf16>
    %c0_116 = arith.constant 0 : index
    %c0_117 = arith.constant 0 : index
    %87 = vector.load %arg5[%c0_116, %c0_117] : memref<1152x256xbf16, #tpu.memory_space<vmem>>, vector<1152x256xbf16>
    %cst_118 = arith.constant dense<0.000000e+00> : vector<1x256xf32>
    %88 = tpu.matmul %86, %87, %cst_118 {dimension_numbers = #tpu.dot_dimension_numbers<[1], [0], [0], [1], [0, 0, 1, 1], [], []>} : vector<1x1152xbf16>, vector<1152x256xbf16>, vector<1x256xf32> -> vector<1x256xf32>
    %89 = arith.mulf %88, %78 : vector<1x256xf32>
    %90 = arith.addf %89, %79 : vector<1x256xf32>
    %cst_119 = arith.constant 0.000000e+00 : f32
    %91 = vector.broadcast %cst_119 : f32 to vector<1x256xf32>
    %92 = arith.maximumf %90, %91 : vector<1x256xf32>
    %93 = arith.truncf %92 : vector<1x256xf32> to vector<1x256xbf16>
    %c0_120 = arith.constant 0 : index
    %c0_121 = arith.constant 0 : index
    %94 = vector.load %arg9[%c0_120, %c0_121] : memref<1x512xf32, #tpu.memory_space<vmem>>, vector<1x512xf32>
    %c0_122 = arith.constant 0 : index
    %c0_123 = arith.constant 0 : index
    %95 = vector.load %arg10[%c0_122, %c0_123] : memref<1x512xf32, #tpu.memory_space<vmem>>, vector<1x512xf32>
    %cst_124 = arith.constant 0.000000e+00 : bf16
    %96 = vector.broadcast %cst_124 : bf16 to vector<1x2304xbf16>
    %c0_125 = arith.constant 0 : index
    %c0_126 = arith.constant 0 : index
    %97 = vector.load %arg18[%c0_125, %c0_126] : memref<1x2304xbf16, #tpu.memory_space<vmem>>, vector<1x2304xbf16>
    tpu.vector_store %arg18[%c0_125, %c0_126], %96 {strides = array<i32>} : memref<1x2304xbf16, #tpu.memory_space<vmem>>, vector<1x2304xbf16>,
    %c0_127 = arith.constant 0 : index
    %c1024_128 = arith.constant 1024 : index
    %98 = vector.load %arg18[%c0_127, %c1024_128] : memref<1x2304xbf16, #tpu.memory_space<vmem>>, vector<1x256xbf16>
    tpu.vector_store %arg18[%c0_127, %c1024_128], %93 {strides = array<i32>} : memref<1x2304xbf16, #tpu.memory_space<vmem>>, vector<1x256xbf16>,
    %c0_129 = arith.constant 0 : index
    %c0_130 = arith.constant 0 : index
    %99 = vector.load %arg18[%c0_129, %c0_130] : memref<1x2304xbf16, #tpu.memory_space<vmem>>, vector<1x2304xbf16>
    %c0_131 = arith.constant 0 : index
    %c0_132 = arith.constant 0 : index
    %100 = vector.load %arg8[%c0_131, %c0_132] : memref<2304x512xbf16, #tpu.memory_space<vmem>>, vector<2304x512xbf16>
    %cst_133 = arith.constant dense<0.000000e+00> : vector<1x512xf32>
    %101 = tpu.matmul %99, %100, %cst_133 {dimension_numbers = #tpu.dot_dimension_numbers<[1], [0], [0], [1], [0, 0, 1, 1], [], []>} : vector<1x2304xbf16>, vector<2304x512xbf16>, vector<1x512xf32> -> vector<1x512xf32>
    %102 = arith.mulf %101, %94 : vector<1x512xf32>
    %103 = arith.addf %102, %95 : vector<1x512xf32>
    %cst_134 = arith.constant 0.000000e+00 : f32
    %104 = vector.broadcast %cst_134 : f32 to vector<1x512xf32>
    %105 = arith.maximumf %103, %104 : vector<1x512xf32>
    %106 = arith.truncf %105 : vector<1x512xf32> to vector<1x512xbf16>
    %107 = arith.extf %106 : vector<1x512xbf16> to vector<1x512xf32>
    %cst_135 = arith.constant 0.000000e+00 : f32
    %108 = vector.broadcast %cst_135 : f32 to vector<1x512xf32>
    %109 = arith.addf %108, %107 : vector<1x512xf32>
    %cst_136 = arith.constant 1.000000e+00 : f32
    %110 = vector.broadcast %cst_136 : f32 to vector<1x512xf32>
    %111 = arith.mulf %109, %110 : vector<1x512xf32>
    %112 = arith.truncf %111 : vector<1x512xf32> to vector<1x512xbf16>
    %c0_137 = arith.constant 0 : index
    %c0_138 = arith.constant 0 : index
    %113 = vector.load %arg11[%c0_137, %c0_138] : memref<512x128xbf16, #tpu.memory_space<vmem>>, vector<512x128xbf16>
    %cst_139 = arith.constant dense<0.000000e+00> : vector<1x128xf32>
    %114 = tpu.matmul %112, %113, %cst_139 {dimension_numbers = #tpu.dot_dimension_numbers<[1], [0], [0], [1], [0, 0, 1, 1], [], []>} : vector<1x512xbf16>, vector<512x128xbf16>, vector<1x128xf32> -> vector<1x128xf32>
    %c0_140 = arith.constant 0 : index
    %c0_141 = arith.constant 0 : index
    %115 = vector.load %arg12[%c0_140, %c0_141] : memref<1x128xf32, #tpu.memory_space<vmem>>, vector<1x128xf32>
    %116 = arith.addf %114, %115 : vector<1x128xf32>
    %cst_142 = arith.constant 0.000000e+00 : f32
    %117 = vector.broadcast %cst_142 : f32 to vector<1x128xf32>
    %118 = arith.maximumf %116, %117 : vector<1x128xf32>
    %119 = arith.truncf %118 : vector<1x128xf32> to vector<1x128xbf16>
    %c0_143 = arith.constant 0 : index
    %c0_144 = arith.constant 0 : index
    %120 = vector.load %arg13[%c0_143, %c0_144] : memref<128x4xbf16, #tpu.memory_space<vmem>>, vector<128x4xbf16>
    %cst_145 = arith.constant dense<0.000000e+00> : vector<1x4xf32>
    %121 = tpu.matmul %119, %120, %cst_145 {dimension_numbers = #tpu.dot_dimension_numbers<[1], [0], [0], [1], [0, 0, 1, 1], [], []>} : vector<1x128xbf16>, vector<128x4xbf16>, vector<1x4xf32> -> vector<1x4xf32>
    %c0_146 = arith.constant 0 : index
    %c0_147 = arith.constant 0 : index
    %122 = vector.load %arg14[%c0_146, %c0_147] : memref<1x4xf32, #tpu.memory_space<vmem>>, vector<1x4xf32>
    %123 = arith.addf %121, %122 : vector<1x4xf32>
    %c0_148 = arith.constant 0 : index
    %c0_149 = arith.constant 0 : index
    %c0_150 = arith.constant 0 : index
    %124 = vector.load %arg15[%c0_148, %c0_149, %c0_150] : memref<1x1x4xf32, #tpu.memory_space<vmem>>, vector<1x1x4xf32>
    %125 = vector.shape_cast %124 : vector<1x1x4xf32> to vector<1x4xf32>
    %126 = vector.shape_cast %123 : vector<1x4xf32> to vector<1x1x4xf32>
    tpu.vector_store %arg15[%c0_148, %c0_149, %c0_150], %126 {strides = array<i32>} : memref<1x1x4xf32, #tpu.memory_space<vmem>>, vector<1x1x4xf32>,
    return
  }
  func.func @transform_0(%arg0: i32) -> (i32, i32, i32, i32) {
    %c0_i32 = arith.constant 0 : i32
    %c0_i32_0 = arith.constant 0 : i32
    %c0_i32_1 = arith.constant 0 : i32
    %c0_i32_2 = arith.constant 0 : i32
    return %arg0, %c0_i32, %c0_i32_0, %c0_i32_1 : i32, i32, i32, i32
  }
  func.func @transform_1(%arg0: i32) -> (i32, i32) {
    %c0_i32 = arith.constant 0 : i32
    %c0_i32_0 = arith.constant 0 : i32
    %c0_i32_1 = arith.constant 0 : i32
    return %c0_i32, %c0_i32_0 : i32, i32
  }
  func.func @transform_2(%arg0: i32) -> (i32, i32) {
    %c0_i32 = arith.constant 0 : i32
    %c0_i32_0 = arith.constant 0 : i32
    %c0_i32_1 = arith.constant 0 : i32
    return %c0_i32, %c0_i32_0 : i32, i32
  }
  func.func @transform_3(%arg0: i32) -> (i32, i32) {
    %c0_i32 = arith.constant 0 : i32
    %c0_i32_0 = arith.constant 0 : i32
    %c0_i32_1 = arith.constant 0 : i32
    return %c0_i32, %c0_i32_0 : i32, i32
  }
  func.func @transform_4(%arg0: i32) -> (i32, i32) {
    %c0_i32 = arith.constant 0 : i32
    %c0_i32_0 = arith.constant 0 : i32
    %c0_i32_1 = arith.constant 0 : i32
    return %c0_i32, %c0_i32_0 : i32, i32
  }
  func.func @transform_5(%arg0: i32) -> (i32, i32) {
    %c0_i32 = arith.constant 0 : i32
    %c0_i32_0 = arith.constant 0 : i32
    %c0_i32_1 = arith.constant 0 : i32
    return %c0_i32, %c0_i32_0 : i32, i32
  }
  func.func @transform_6(%arg0: i32) -> (i32, i32) {
    %c0_i32 = arith.constant 0 : i32
    %c0_i32_0 = arith.constant 0 : i32
    %c0_i32_1 = arith.constant 0 : i32
    return %c0_i32, %c0_i32_0 : i32, i32
  }
  func.func @transform_7(%arg0: i32) -> (i32, i32) {
    %c0_i32 = arith.constant 0 : i32
    %c0_i32_0 = arith.constant 0 : i32
    %c0_i32_1 = arith.constant 0 : i32
    return %c0_i32, %c0_i32_0 : i32, i32
  }
  func.func @transform_8(%arg0: i32) -> (i32, i32) {
    %c0_i32 = arith.constant 0 : i32
    %c0_i32_0 = arith.constant 0 : i32
    %c0_i32_1 = arith.constant 0 : i32
    return %c0_i32, %c0_i32_0 : i32, i32
  }
  func.func @transform_9(%arg0: i32) -> (i32, i32) {
    %c0_i32 = arith.constant 0 : i32
    %c0_i32_0 = arith.constant 0 : i32
    %c0_i32_1 = arith.constant 0 : i32
    return %c0_i32, %c0_i32_0 : i32, i32
  }
  func.func @transform_10(%arg0: i32) -> (i32, i32) {
    %c0_i32 = arith.constant 0 : i32
    %c0_i32_0 = arith.constant 0 : i32
    %c0_i32_1 = arith.constant 0 : i32
    return %c0_i32, %c0_i32_0 : i32, i32
  }
  func.func @transform_11(%arg0: i32) -> (i32, i32) {
    %c0_i32 = arith.constant 0 : i32
    %c0_i32_0 = arith.constant 0 : i32
    %c0_i32_1 = arith.constant 0 : i32
    return %c0_i32, %c0_i32_0 : i32, i32
  }
  func.func @transform_12(%arg0: i32) -> (i32, i32) {
    %c0_i32 = arith.constant 0 : i32
    %c0_i32_0 = arith.constant 0 : i32
    %c0_i32_1 = arith.constant 0 : i32
    return %c0_i32, %c0_i32_0 : i32, i32
  }
  func.func @transform_13(%arg0: i32) -> (i32, i32) {
    %c0_i32 = arith.constant 0 : i32
    %c0_i32_0 = arith.constant 0 : i32
    %c0_i32_1 = arith.constant 0 : i32
    return %c0_i32, %c0_i32_0 : i32, i32
  }
  func.func @transform_14(%arg0: i32) -> (i32, i32, i32) {
    %c0_i32 = arith.constant 0 : i32
    %c0_i32_0 = arith.constant 0 : i32
    %c0_i32_1 = arith.constant 0 : i32
    return %arg0, %c0_i32, %c0_i32_0 : i32, i32, i32
  }
}

</mosaic_0001>

<bundles_post_ra>
// kernel: scale_offset_detector_forward.3
= control target key start
LH: loop header
LB: loop body
LE: loop exit
PB: predicated region body
PF: predicated region fallthrough
CT: control target
= control target key end

     0   :  { %9 = vsyncpa [#allocation3], 0  ;;  %s427_s0 = inlined_call_operand.vmem [shape: bf16[32,128], index: 0, kind: input, shape index: {}]   ;;  %s428_s1 = inlined_call_operand.hbm [shape: bf16[128,128], index: 1, kind: input, shape index: {}]   ;;  %s429_s2 = inlined_call_operand.hbm [shape: f32[1,128], index: 2, kind: input, shape index: {}]   ;;  %s430_s3 = inlined_call_operand.hbm [shape: f32[1,128], index: 3, kind: input, shape index: {}]   ;;  %s431_s4 = inlined_call_operand.vmem [shape: bf16[32,128], index: 4, kind: output, shape index: {}]  }
   0x1   :  { %10 = vsyncpa [#allocation5], 0  ;;  %s376_s15 = smov [#allocation4]   ;;  %s377_s17 = smov [#allocation2]  }
   0x2   :  { %s31_s16 = sshll.u32 %s376_s15, 4  ;;  %s18_s18 = sshll.u32 %s377_s17, 4  ;;  %s32_s16 = int_to_ptr.vmem [resolvable:$true] %s31_s16  ;;  %s19_s18 = int_to_ptr.vmem [resolvable:$true] %s18_s18 }
   0x3   :  { %s320_s19 = scalar_lea.vmem %s32_s16, 16  ;;  %s324_s20 = scalar_lea.vmem %s32_s16, 32 }
   0x4   :  { %p321_p0 = scmp.ne.s32.totalorder %s32_s16, %s320_s19  ;;  %p325_p1 = scmp.lt.s32.totalorder %s32_s16, %s32_s16 }
   0x5   :  { %p326_p2 = scmp.lt.s32.totalorder %s324_s20, %s320_s19 }
   0x7   :  { %p327_p3 = por %p326_p2, %p325_p1 }
   0x9   :  { %p328_p4 = pnand %p327_p3, %p321_p0 }
   0xb   :  { %331 = shalt.err (!%p328_p4)
}
   0xc   :  { %34 = dma.hbm_to_vmem [thread:$0]  %s429_s2, 16, %s32_s16, [#allocation5]  }
   0xd   :  { %s340_s23 = scalar_lea.vmem %s19_s18, 1024  ;;  %p345_p6 = scmp.lt.s32.totalorder %s19_s18, %s19_s18 }
   0xe   :  { %p341_p5 = scmp.ne.s32.totalorder %s19_s18, %s340_s23  ;;  %p346_p7 = scmp.lt.s32.totalorder %s340_s23, %s340_s23 }
  0x10   :  { %p347_p8 = por %p346_p7, %p345_p6 }
  0x12   :  { %p348_p9 = pnand %p347_p8, %p341_p5 }
  0x14   :  { %351 = shalt.err (!%p348_p9)
}
  0x15   :  { %s378_s24 = smov 64   ;;  %s379_s25 = smov 4  }
  0x16   :  { %24 = dma.hbm_to_vmem [thread:$0]  %s428_s1, 1024, %s19_s18, [#allocation3], %s378_s24, %s378_s24, %s379_s25  }
  0x17   :  { %s380_s28 = smov [#allocation6]  }
  0x18   :  { %s41_s29 = sshll.u32 %s380_s28, 4  ;;  %s42_s29 = int_to_ptr.vmem [resolvable:$true] %s41_s29 }
  0x19   :  { %s360_s30 = scalar_lea.vmem %s42_s29, 16  ;;  %s364_s5 = scalar_lea.vmem %s42_s29, 32 }
  0x1a   :  { %p361_p10 = scmp.ne.s32.totalorder %s42_s29, %s360_s30  ;;  %p365_p11 = scmp.lt.s32.totalorder %s42_s29, %s42_s29 }
  0x1b   :  { %p366_p12 = scmp.lt.s32.totalorder %s364_s5, %s360_s30 }
  0x1d   :  { %p367_p13 = por %p366_p12, %p365_p11 }
  0x1f   :  { %p368_p0 = pnand %p367_p13, %p361_p10 }
  0x21   :  { %371 = shalt.err (!%p368_p0)
}
  0x22   :  { %44 = dma.hbm_to_vmem [thread:$0]  %s430_s3, 16, %s42_s29, [#allocation5]  }
  0x23   :  { %372 = dma.done.wait [#allocation3], 1024  }
  0x24   :  { %373 = vsyncadd [#allocation3], 4294966272 }
  0x25   :  { %374 = dma.done.wait [#allocation5], 32  }
  0x26   :  { %375 = vsyncadd [#allocation5], 4294967264  ;;  %v302_v0 = vld [vmem:[#allocation2 + $0x38] sm:$0xff]   ;;  %v303_v1 = vld [vmem:[#allocation2 + $0x30] sm:$0xff]  }
  0x27   :  { %277 = vmatprep.subr.bf16.mxu0 %v302_v0  ;;  %v304_v2 = vld [vmem:[#allocation2 + $0x28] sm:$0xff]   ;;  %v305_v3 = vld [vmem:[#allocation2 + $0x20] sm:$0xff]   ;;  %v306_v5 = vld [vmem:[#allocation2 + $0x18] sm:$0xff]  }
  0x28   :  { %278 = vmatpush3.bf16.msra.mxu0 %v302_v0  ;;  %v310_v4 = vld [vmem:[%s427_s0] sm:$0xff]   ;;  %v307_v6 = vld [vmem:[#allocation2 + $0x10] sm:$0xff]   ;;  %v308_v7 = vld [vmem:[#allocation2 + $0x8] sm:$0xff]  }
  0x29   :  { %279 = vmatprep.subr.bf16.mxu0 %v303_v1  ;;  %293 = vmatprep.mubr.bf16.mxu0 %v310_v4  ;;  %v309_v8 = vld [vmem:[#allocation2] sm:$0xff]   ;;  %v311_v9 = vld [vmem:[%s427_s0 + $0x8] sm:$0xff]  }
  0x2a   :  { %v246_v10 = vld [vmem:[#allocation4] ss:$0 sm:$0xff]  ;;  %v247_v13 = vld [vmem:[#allocation6] ss:$0 sm:$0xff] }
  0x2c   :  { %280 = vmatpush3.bf16.msra.mxu0 %v303_v1 }
  0x2d   :  { %281 = vmatprep.subr.bf16.mxu0 %v304_v2 }
  0x30   :  { %282 = vmatpush3.bf16.msra.mxu0 %v304_v2 }
  0x31   :  { %283 = vmatprep.subr.bf16.mxu0 %v305_v3 }
  0x34   :  { %284 = vmatpush3.bf16.msra.mxu0 %v305_v3 }
  0x35   :  { %285 = vmatprep.subr.bf16.mxu0 %v306_v5 }
  0x38   :  { %286 = vmatpush3.bf16.msra.mxu0 %v306_v5 }
  0x39   :  { %287 = vmatprep.subr.bf16.mxu0 %v307_v6 }
  0x3c   :  { %288 = vmatpush3.bf16.msra.mxu0 %v307_v6 }
  0x3d   :  { %289 = vmatprep.subr.bf16.mxu0 %v308_v7 }
  0x40   :  { %290 = vmatpush3.bf16.msra.mxu0 %v308_v7 }
  0x41   :  { %291 = vmatprep.subr.bf16.mxu0 %v309_v8 }
  0x44   :  { %292 = vmatpush3.bf16.msra.mxu0 %v309_v8 }
  0x47   :  { %294 = vmatmul.mubr.bf16.vlgmr.msra.gmra.mxu0 %v311_v9 }
 0x107   :  { %v295_v11 = vpop.f32.mrf.mxu0 }
 0x108   :  { %v193_v12 = vmul.f32 %v295_v11, %v246_v10 }
 0x109   :  { %v169_v14 = vpop.f32.mrf.mxu0 }
 0x10a   :  { %v191_v15 = vmul.f32 %v246_v10, %v169_v14  ;;  %v204_v17 = vadd.f32 %v247_v13, %v193_v12 }
 0x10b   :  { %v296_v16 = vpop.f32.mrf.mxu0 }
 0x10c   :  { %v194_v18 = vmul.f32 %v296_v16, %v246_v10  ;;  %v202_v20 = vadd.f32 %v247_v13, %v191_v15  ;;  %v208_v23 = vmax.f32 %v204_v17, 0.0 }
 0x10d   :  { %v172_v19 = vpop.f32.mrf.mxu0 }
 0x10e   :  { %v205_v21 = vadd.f32 %v247_v13, %v194_v18  ;;  %v192_v22 = vmul.f32 %v246_v10, %v172_v19  ;;  %v206_v26 = vmax.f32 %v202_v20, 0.0 }
 0x110   :  { %v209_v24 = vmax.f32 %v205_v21, 0.0  ;;  %v203_v25 = vadd.f32 %v247_v13, %v192_v22 }
 0x112   :  { %v264_v27 = vpack.c.bf16 %v209_v24, %v208_v23  ;;  %v207_v28 = vmax.f32 %v203_v25, 0.0 }
 0x114   :  { %266 = vst [vmem:[%s431_s4 + $0x8] sm:$0xff] %v264_v27   ;;  %v259_v29 = vpack.c.bf16 %v207_v28, %v206_v26 }
 0x116   :  { %260 = vst [vmem:[%s431_s4] sm:$0xff] %v259_v29  }
 0x117   :  { %234 = vsyncpa [#allocation3], 1 }
 0x118   :  { %235 = vsyncpa [#allocation5], 1 }

// kernel: scale_offset_detector_forward.4
= control target key start
LH: loop header
LB: loop body
LE: loop exit
PB: predicated region body
PF: predicated region fallthrough
CT: control target
= control target key end

     0   :  { %9 = vsyncpa [#allocation3], 0  ;;  %s824_s0 = inlined_call_operand.vmem [shape: bf16[16,576], index: 0, kind: input, shape index: {}]   ;;  %s825_s1 = inlined_call_operand.hbm [shape: bf16[576,128], index: 1, kind: input, shape index: {}]   ;;  %s826_s2 = inlined_call_operand.hbm [shape: f32[1,128], index: 2, kind: input, shape index: {}]   ;;  %s827_s3 = inlined_call_operand.hbm [shape: f32[1,128], index: 3, kind: input, shape index: {}]   ;;  %s828_s4 = inlined_call_operand.vmem [shape: bf16[16,128], index: 4, kind: output, shape index: {}]  }
   0x1   :  { %10 = vsyncpa [#allocation5], 0  ;;  %s765_s15 = smov [#allocation4]   ;;  %s766_s17 = smov [#allocation2]  }
   0x2   :  { %s31_s16 = sshll.u32 %s765_s15, 4  ;;  %s18_s18 = sshll.u32 %s766_s17, 4  ;;  %s32_s16 = int_to_ptr.vmem [resolvable:$true] %s31_s16  ;;  %s19_s18 = int_to_ptr.vmem [resolvable:$true] %s18_s18 }
   0x3   :  { %s709_s19 = scalar_lea.vmem %s32_s16, 16  ;;  %s713_s20 = scalar_lea.vmem %s32_s16, 32 }
   0x4   :  { %p710_p0 = scmp.ne.s32.totalorder %s32_s16, %s709_s19  ;;  %p714_p1 = scmp.lt.s32.totalorder %s32_s16, %s32_s16 }
   0x5   :  { %p715_p2 = scmp.lt.s32.totalorder %s713_s20, %s709_s19 }
   0x7   :  { %p716_p3 = por %p715_p2, %p714_p1 }
   0x9   :  { %p717_p4 = pnand %p716_p3, %p710_p0 }
   0xb   :  { %720 = shalt.err (!%p717_p4)
}
   0xc   :  { %34 = dma.hbm_to_vmem [thread:$0]  %s826_s2, 16, %s32_s16, [#allocation5]  }
   0xd   :  { %s729_s23 = scalar_lea.vmem %s19_s18, 4608  ;;  %p734_p6 = scmp.lt.s32.totalorder %s19_s18, %s19_s18 }
   0xe   :  { %p730_p5 = scmp.ne.s32.totalorder %s19_s18, %s729_s23  ;;  %p735_p7 = scmp.lt.s32.totalorder %s729_s23, %s729_s23 }
  0x10   :  { %p736_p8 = por %p735_p7, %p734_p6 }
  0x12   :  { %p737_p9 = pnand %p736_p8, %p730_p5 }
  0x14   :  { %740 = shalt.err (!%p737_p9)
}
  0x15   :  { %s767_s24 = smov 64   ;;  %s768_s25 = smov 4  }
  0x16   :  { %24 = dma.hbm_to_vmem [thread:$0]  %s825_s1, 4608, %s19_s18, [#allocation3], %s767_s24, %s767_s24, %s768_s25  }
  0x17   :  { %s769_s28 = smov [#allocation6]  }
  0x18   :  { %s41_s29 = sshll.u32 %s769_s28, 4  ;;  %s42_s29 = int_to_ptr.vmem [resolvable:$true] %s41_s29 }
  0x19   :  { %s749_s30 = scalar_lea.vmem %s42_s29, 16  ;;  %s753_s5 = scalar_lea.vmem %s42_s29, 32 }
  0x1a   :  { %p750_p10 = scmp.ne.s32.totalorder %s42_s29, %s749_s30  ;;  %p754_p11 = scmp.lt.s32.totalorder %s42_s29, %s42_s29 }
  0x1b   :  { %p755_p12 = scmp.lt.s32.totalorder %s753_s5, %s749_s30 }
  0x1d   :  { %p756_p13 = por %p755_p12, %p754_p11 }
  0x1f   :  { %p757_p0 = pnand %p756_p13, %p750_p10 }
  0x21   :  { %760 = shalt.err (!%p757_p0)
}
  0x22   :  { %44 = dma.hbm_to_vmem [thread:$0]  %s827_s3, 16, %s42_s29, [#allocation5]  }
  0x23   :  { %761 = dma.done.wait [#allocation3], 4608  }
  0x24   :  { %762 = vsyncadd [#allocation3], 4294962688 }
  0x25   :  { %763 = dma.done.wait [#allocation5], 32  }
  0x26   :  { %764 = vsyncadd [#allocation5], 4294967264  ;;  %v658_v0 = vld [vmem:[#allocation2 + $0x78] sm:$0xff]   ;;  %v662_v4 = vld [vmem:[#allocation2 + $0x70] sm:$0xff]   ;;  %v770_v34 = vmov 0.0   ;;  %vm771_vm0 = vmmov 0  }
  0x27   :  { %v659_v1 = vld [vmem:[#allocation2 + $0xf8] sm:$0xff]   ;;  %590 = vmatprep.subr.bf16.mxu0 %v658_v0  ;;  %v663_v5 = vld [vmem:[#allocation2 + $0xf0] sm:$0xff]   ;;  %v666_v8 = vld [vmem:[#allocation2 + $0x68] sm:$0xff]   ;;  %vm374_vm1 = vcmask 523264  }
  0x28   :  { %v660_v2 = vld [vmem:[#allocation2 + $0x38] sm:$0xff]   ;;  %612 = vmatprep.subr.bf16.mxu1 %v659_v1  ;;  %v664_v6 = vld [vmem:[#allocation2 + $0x30] sm:$0xff]   ;;  %v667_v9 = vld [vmem:[#allocation2 + $0xe8] sm:$0xff]  }
  0x29   :  { %v661_v3 = vld [vmem:[#allocation2 + $0xb8] sm:$0xff]   ;;  %591 = vmatpush3.bf16.msra.mxu0 %v660_v2  ;;  %v665_v7 = vld [vmem:[#allocation2 + $0xb0] sm:$0xff]   ;;  %v668_v10 = vld [vmem:[#allocation2 + $0x28] sm:$0xff]  }
  0x2a   :  { %613 = vmatpush3.bf16.msra.mxu1 %v661_v3  ;;  %592 = vmatprep.subr.bf16.mxu0 %v662_v4  ;;  %v669_v11 = vld [vmem:[#allocation2 + $0xa8] sm:$0xff]   ;;  %v670_v12 = vld [vmem:[#allocation2 + $0x60] sm:$0xff]   ;;  %v674_v16 = vld [vmem:[#allocation2 + $0x58] sm:$0xff]  }
  0x2b   :  { %614 = vmatprep.subr.bf16.mxu1 %v663_v5  ;;  %v671_v13 = vld [vmem:[#allocation2 + $0xe0] sm:$0xff]   ;;  %v675_v17 = vld [vmem:[#allocation2 + $0xd8] sm:$0xff]   ;;  %v678_v20 = vld [vmem:[#allocation2 + $0x50] sm:$0xff]  }
  0x2c   :  { %v672_v14 = vld [vmem:[#allocation2 + $0x20] sm:$0xff]   ;;  %v676_v18 = vld [vmem:[#allocation2 + $0x18] sm:$0xff]   ;;  %v679_v21 = vld [vmem:[#allocation2 + $0xd0] sm:$0xff]  }
  0x2d   :  { %593 = vmatpush3.bf16.msra.mxu0 %v664_v6  ;;  %v673_v15 = vld [vmem:[#allocation2 + $0xa0] sm:$0xff]   ;;  %v677_v19 = vld [vmem:[#allocation2 + $0x98] sm:$0xff]   ;;  %v680_v22 = vld [vmem:[#allocation2 + $0x10] sm:$0xff]  }
  0x2e   :  { %615 = vmatpush3.bf16.msra.mxu1 %v665_v7  ;;  %594 = vmatprep.subr.bf16.mxu0 %v666_v8  ;;  %v681_v23 = vld [vmem:[#allocation2 + $0x90] sm:$0xff]   ;;  %v682_v24 = vld [vmem:[#allocation2 + $0x48] sm:$0xff]   ;;  %v686_v28 = vld [vmem:[#allocation2 + $0x40] sm:$0xff]  }
  0x2f   :  { %616 = vmatprep.subr.bf16.mxu1 %v667_v9  ;;  %v683_v25 = vld [vmem:[#allocation2 + $0xc8] sm:$0xff]   ;;  %v687_v29 = vld [vmem:[#allocation2 + $0xc0] sm:$0xff]   ;;  %v696_v37 = vld [vmem:[#allocation2 + $0x118] sm:$0xff]  }
  0x30   :  { %v684_v26 = vld [vmem:[#allocation2 + $0x8] sm:$0xff]   ;;  %v688_v30 = vld [vmem:[#allocation2] sm:$0xff]   ;;  %v697_v38 = vld [vmem:[#allocation2 + $0x110] sm:$0xff]  }
  0x31   :  { %595 = vmatpush3.bf16.msra.mxu0 %v668_v10  ;;  %v685_v27 = vld [vmem:[#allocation2 + $0x88] sm:$0xff]   ;;  %v689_v31 = vld [vmem:[#allocation2 + $0x80] sm:$0xff]  }
  0x32   :  { %617 = vmatpush3.bf16.msra.mxu1 %v669_v11  ;;  %596 = vmatprep.subr.bf16.mxu0 %v670_v12  ;;  %v690_v32 = vld [vmem:[%s824_s0] ss:$20 sps:$4 sm:$0xff]   ;;  %v692_v33 = vld [vmem:[%s824_s0 + $0x4] ss:$20 sps:$4 sm:$0xff]   ;;  %v693_v35 = vld [vmem:[%s824_s0 + $0x8] ss:$20 sps:$4 sm:$0xff]  }
  0x33   :  { %618 = vmatprep.subr.bf16.mxu1 %v671_v13  ;;  %v695_v36 = vld [vmem:[%s824_s0 + $0xc] ss:$20 sps:$4 sm:$0xff]   ;;  %410 = vmatprep.mubr.bf16.mxu0 %v692_v33  ;;  %v700_v41 = vld [vmem:[%s824_s0 + $0x10] ss:$20 sps:$4 sm:$0xff]  }
  0x34   :  { %451 = vmatprep.mubr.bf16.mxu1 %v695_v36  ;;  %v698_v39 = vld [vmem:[#allocation2 + $0x108] sm:$0xff]   ;;  %v699_v40 = vld [vmem:[#allocation2 + $0x100] sm:$0xff]  }
  0x35   :  { %597 = vmatpush3.bf16.msra.mxu0 %v672_v14  ;;  %v579_v56 = vld [vmem:[#allocation4] ss:$0 sm:$0xff]  ;;  %v580_v61 = vld [vmem:[#allocation6] ss:$0 sm:$0xff] }
  0x36   :  { %619 = vmatpush3.bf16.msra.mxu1 %v673_v15  ;;  %598 = vmatprep.subr.bf16.mxu0 %v674_v16 }
  0x37   :  { %620 = vmatprep.subr.bf16.mxu1 %v675_v17 }
  0x39   :  { %599 = vmatpush3.bf16.msra.mxu0 %v676_v18 }
  0x3a   :  { %621 = vmatpush3.bf16.msra.mxu1 %v677_v19  ;;  %600 = vmatprep.subr.bf16.mxu0 %v678_v20 }
  0x3b   :  { %622 = vmatprep.subr.bf16.mxu1 %v679_v21 }
  0x3d   :  { %601 = vmatpush3.bf16.msra.mxu0 %v680_v22 }
  0x3e   :  { %623 = vmatpush3.bf16.msra.mxu1 %v681_v23  ;;  %602 = vmatprep.subr.bf16.mxu0 %v682_v24 }
  0x3f   :  { %624 = vmatprep.subr.bf16.mxu1 %v683_v25 }
  0x41   :  { %603 = vmatpush3.bf16.msra.mxu0 %v684_v26 }
  0x42   :  { %625 = vmatpush3.bf16.msra.mxu1 %v685_v27  ;;  %604 = vmatprep.subr.bf16.mxu0 %v686_v28 }
  0x43   :  { %626 = vmatprep.subr.bf16.mxu1 %v687_v29 }
  0x45   :  { %605 = vmatpush3.bf16.msra.mxu0 %v688_v30 }
  0x46   :  { %627 = vmatpush3.bf16.msra.mxu1 %v689_v31  ;;  %639 = vmatprep.subr.bf16.mxu0 %v770_v34 }
  0x48   :  { %411 = vmatmul.mubr.bf16.vlgmr.msra.gmra.mxu0 %v690_v32 }
  0x49   :  { %452 = vmatmul.mubr.bf16.vlgmr.msra.gmra.mxu1 %v693_v35  ;;  %640 = vmatpush3.bf16.msra.mxu0 %v696_v37 }
  0x4a   :  { %641 = vmatprep.subr.bf16.mxu0 %v770_v34  ;;  %647 = vmatprep.mubr.msk.bf16.mxu0 %vm771_vm0, %v770_v34 }
  0x4d   :  { %642 = vmatpush3.bf16.msra.mxu0 %v697_v38 }
  0x4e   :  { %643 = vmatprep.subr.bf16.mxu0 %v770_v34 }
  0x51   :  { %644 = vmatpush3.bf16.msra.mxu0 %v698_v39 }
  0x52   :  { %645 = vmatprep.subr.bf16.mxu0 %v770_v34 }
  0x55   :  { %646 = vmatpush3.bf16.msra.mxu0 %v699_v40 }
  0x58   :  { %648 = vmatmul.mubr.msk.bf16.vlgmr.msra.gmra.mxu0 %vm374_vm1, %v700_v41 }
 0x108   :  { %v606_v42 = vpop.f32.mrf.mxu0 }
 0x109   :  { %v628_v43 = vpop.f32.mrf.mxu1 }
 0x10a   :  { %v607_v44 = vpop.f32.mrf.mxu0 }
 0x10b   :  { %v629_v45 = vpop.f32.mrf.mxu1  ;;  %v608_v48 = vadd.f32 %v607_v44, %v606_v42 }
 0x10c   :  { %v609_v46 = vpop.f32.mrf.mxu0  ;;  %v630_v49 = vadd.f32 %v629_v45, %v628_v43 }
 0x10d   :  { %v631_v47 = vpop.f32.mrf.mxu1 }
 0x10e   :  { %v610_v50 = vpop.f32.mrf.mxu0  ;;  %v454_v54 = vadd.f32 %v630_v49, %v608_v48 }
 0x10f   :  { %v632_v51 = vpop.f32.mrf.mxu1  ;;  %v611_v52 = vadd.f32 %v610_v50, %v609_v46 }
 0x110   :  { %v633_v53 = vadd.f32 %v632_v51, %v631_v47 }
 0x112   :  { %v457_v60 = vadd.f32 %v633_v53, %v611_v52 }
 0x118   :  { %v494_v55 = vpop.f32.mrf.mxu0 }
 0x119   :  { %v495_v57 = vadd.f32 %v494_v55, %v454_v54 }
 0x11a   :  { %v649_v58 = vpop.f32.mrf.mxu0 }
 0x11b   :  { %v508_v59 = vmul.f32 %v579_v56, %v495_v57 }
 0x11c   :  { %v497_v62 = vpop.f32.mrf.mxu0 }
 0x11d   :  { %v498_v63 = vadd.f32 %v497_v62, %v457_v60  ;;  %v517_v1 = vadd.f32 %v580_v61, %v508_v59 }
 0x11e   :  { %v650_v0 = vpop.f32.mrf.mxu0 }
 0x11f   :  { %v509_v2 = vmul.f32 %v579_v56, %v498_v63  ;;  %v519_v4 = vmax.f32 %v517_v1, 0.0 }
 0x121   :  { %v518_v3 = vadd.f32 %v580_v61, %v509_v2 }
 0x123   :  { %v520_v5 = vmax.f32 %v518_v3, 0.0 }
 0x125   :  { %v588_v6 = vpack.c.bf16 %v520_v5, %v519_v4 }
 0x127   :  { %589 = vst [vmem:[%s828_s4] sm:$0xff] %v588_v6  }
 0x128   :  { %535 = vsyncpa [#allocation3], 1 }
 0x129   :  { %536 = vsyncpa [#allocation5], 1 }

// kernel: scale_offset_detector_forward.5
= control target key start
LH: loop header
LB: loop body
LE: loop exit
PB: predicated region body
PF: predicated region fallthrough
CT: control target
= control target key end

     0   :  { %s11646_s0 = inlined_call_operand.vmem [shape: bf16[2,1,16,64], index: 0, kind: input, shape index: {}]   ;;  %s11647_s1 = inlined_call_operand.vmem [shape: bf16[576,128], index: 1, kind: input, shape index: {}]   ;;  %s11648_s2 = inlined_call_operand.hbm [shape: f32[1,128], index: 2, kind: input, shape index: {}]   ;;  %s11649_s3 = inlined_call_operand.hbm [shape: f32[1,128], index: 3, kind: input, shape index: {}]   ;;  %s11650_s4 = inlined_call_operand.vmem [shape: bf16[1152,256], index: 4, kind: input, shape index: {}]   ;;  %s11651_s5 = inlined_call_operand.hbm [shape: f32[1,256], index: 5, kind: input, shape index: {}]   ;;  %s11652_s6 = inlined_call_operand.hbm [shape: f32[1,256], index: 6, kind: input, shape index: {}]   ;;  %s11653_s7 = inlined_call_operand.hbm [shape: bf16[2304,512], index: 7, kind: input, shape index: {}]   ;;  %s11654_s8 = inlined_call_operand.hbm [shape: f32[1,512], index: 8, kind: input, shape index: {}]   ;;  %s11655_s9 = inlined_call_operand.hbm [shape: f32[1,512], index: 9, kind: input, shape index: {}]   ;;  %s11656_s10 = inlined_call_operand.vmem [shape: bf16[512,128], index: 10, kind: input, shape index: {}]   ;;  %s11657_s11 = inlined_call_operand.hbm [shape: f32[1,128], index: 11, kind: input, shape index: {}]   ;;  %s11658_s12 = inlined_call_operand.vmem [shape: bf16[128,4], index: 12, kind: input, shape index: {}]   ;;  %s11659_s13 = inlined_call_operand.hbm [shape: f32[1,4], index: 13, kind: input, shape index: {}]   ;;  %s11660_s14 = inlined_call_operand.hbm [shape: f32[2,1,4], index: 14, kind: output, shape index: {}]  }
   0x1   :  { %11670 = sst [smem:[#allocation31_spill]] %s11648_s2 }
   0x2   :  { %11671 = sst [smem:[#allocation32_spill]] %s11649_s3 }
   0x3   :  { %11672 = sst [smem:[#allocation33_spill]] %s11652_s6 }
   0x4   :  { %19 = vsyncpa [#allocation6], 0 }
   0x5   :  { %20 = vsyncpa [#allocation9], 0 }
   0x6   :  { %21 = vsyncpa [#allocation12], 0 }
   0x7   :  { %22 = vsyncpa [#allocation15], 0 }
   0x8   :  { %23 = vsyncpa [#allocation18], 0 }
   0x9   :  { %24 = vsyncpa [#allocation7], 0 }
   0xa   :  { %26 = vsyncpa [#allocation7 + $0x1], 0  ;;  %s10297_s29 = smov 0   ;;  %s10299_s30 = smov 0  }
   0xb   :  { %s10301_s15 = smov 0   ;;  %s10303_s16 = smov 0  }
   0xc LB: > { %11673 = sst [smem:[#allocation27_spill]] %s10198_s15  ;;  %s10318_s17 = sadd.s32 4294967295, %s10202_s16   ;;  %s10202_s16 = sphi %s10303_s16, %s11729_s16   ;;  %s10198_s15 = sphi %s10301_s15, %s11731_s15   ;;  %s10194_s30 = sphi %s10299_s30, %s11733_s30   ;;  %s10190_s29 = sphi %s10297_s29, %s11732_s29  }
   0xd   : > { %s7605_s18 = sadd.s32 4294967294, %s10202_s16   ;;  %s10322_s19 = sadd.s32 1, %s10202_s16  }
   0xe   : > { %11674 = sst [smem:[#allocation28_spill]] %s10322_s19  ;;  %s338_s20 = sadd.s32 1, %s10198_s15 }
   0xf   : > { %s335_s21 = ssub.s32 %s10202_s16, %s10322_s19  ;;  %p348_p0 = scmp.ne.s32.totalorder %s10198_s15, %s10194_s30 }
  0x10   : > { %p336_p1 = scmp.eq.s32.totalorder %s335_s21, 0  ;;  %p349_p2 = scmp.eq.s32.totalorder %s10318_s17, 1 }
  0x11   : > { %p354_p3 = scmp.ne.s32.totalorder %s10194_s30, %s10190_s29  ;;  %p355_p4 = scmp.eq.s32.totalorder %s7605_s18, 1 }
  0x12   : > { %s10333_s22 = scalar_select %p336_p1, %s10198_s15, %s338_s20  }
  0x13   : > { %p10335_p5 = por %p349_p2, %p348_p0  ;;  %p10339_p6 = por %p355_p4, %p354_p3 }
  0x14   : > { %11675 = sst [smem:[#allocation29_spill]] %s10333_s22  ;;  %p7606_p7 = scmp.ge.s32.totalorder %s10202_s16, 1 }
  0x15   : > { %s11676_s23 = scalar_select %p10335_p5, 1, 0 }
  0x16   : > { %s11677_s24 = scalar_select %p10339_p6, 1, 0 }
  0x17   : > { %p362_p8 = scmp.lt.s32.totalorder %s10202_s16, 3  ;;  %p11665_p9 = scmp.eq.s32.totalorder %s10318_s17, 0 }
  0x18   : > { %11678 = sst [smem:[#allocation30_spill]] %s11677_s24  ;;  %s10204_s26 = smov [#allocation8]  }
  0x19   : > { %p10346_p10 = pnand %p7606_p7, %p362_p8  ;;  %s389_s27 = sshll.u32 %s10204_s26, 4  ;;  %s390_s27 = int_to_ptr.vmem [resolvable:$true] %s389_s27 }
  0x1a   : > { %s10205_s28 = smov [#allocation11]   ;;  %s10206_s21 = smov [#allocation14]  }
  0x1b   : > { %s11679_s25 = scalar_select %p10346_p10, 1, 0 }
  0x1c   : > { %p8623_p11 = pneg %p10346_p10  ;;  %s414_s18 = sshll.u32 %s10205_s28, 4  ;;  %s415_s18 = int_to_ptr.vmem [resolvable:$true] %s414_s18 }
  0x1d   : > { %s438_s22 = sshll.u32 %s10206_s21, 4  ;;  %s9899_s26 = scalar_lea.vmem %s390_s27, 16  ;;  %s10358_s22 = int_to_ptr.vmem [resolvable:$true] %s438_s22 }
  0x1e   : > { %p10354_p12 = pnand %p11665_p9, %p8623_p11  ;;  %p9900_p0 = scmp.ne.s32.totalorder %s390_s27, %s9899_s26 }
  0x1f   : > { %s9906_s28 = scalar_lea.vmem %s390_s27, 32  ;;  %p9907_p3 = scmp.lt.s32.totalorder %s390_s27, %s390_s27 }
  0x20   : > { %p10362_p13 = pneg %p10354_p12  ;;  %p9908_p4 = scmp.lt.s32.totalorder %s9906_s28, %s9899_s26 }
  0x22   : > { %p9902_p1 = pnand %p9900_p0, %p10362_p13  ;;  %p9909_p7 = por %p9908_p4, %p9907_p3 }
  0x24   : > { %p9903_p2 = pneg %p9902_p1 }
  0x26   : > { %p9910_p8 = pnand %p9909_p7, %p9903_p2 }
  0x28   : > { %9913 = shalt.err (!%p9910_p8)
}
  0x29   : > { %s11682_s3 = sld [smem:[#allocation32_spill]]  ;;  %s9925_s24 = scalar_lea.vmem %s415_s18, 32 }
  0x2a   : > { %p9926_p11 = scmp.ne.s32.totalorder %s415_s18, %s9925_s24  ;;  %p9933_p0 = scmp.lt.s32.totalorder %s415_s18, %s415_s18 }
  0x2b   : > { %p9934_p1 = scmp.lt.s32.totalorder %s9925_s24, %s9925_s24 }
  0x2c   : > { %p9928_p9 = pnand %p9926_p11, %p10362_p13 }
  0x2d   : > { %p9935_p5 = por %p9934_p1, %p9933_p0 }
  0x2e   : > { %p9929_p6 = pneg %p9928_p9 }
  0x2f   : > { %8629 = dma.hbm_to_vmem [thread:$0]  (!%p10354_p12), %s11682_s3, 16, %s390_s27, [#allocation9]  }
  0x30   : > { %p9936_p10 = pnand %p9935_p5, %p9929_p6 }
  0x32   : > { %9939 = shalt.err (!%p9936_p10)
}
  0x33   : > { %s11683_s6 = sld [smem:[#allocation33_spill]]  ;;  %s9951_s19 = scalar_lea.vmem %s10358_s22, 64 }
  0x34   : > { %p9952_p2 = scmp.ne.s32.totalorder %s10358_s22, %s9951_s19  ;;  %p9959_p4 = scmp.lt.s32.totalorder %s10358_s22, %s10358_s22 }
  0x35   : > { %p9960_p7 = scmp.lt.s32.totalorder %s9951_s19, %s9951_s19 }
  0x36   : > { %p9954_p3 = pnand %p9952_p2, %p10362_p13 }
  0x37   : > { %p9961_p5 = por %p9960_p7, %p9959_p4 }
  0x38   : > { %p9955_p9 = pneg %p9954_p3 }
  0x39   : > { %8635 = dma.hbm_to_vmem [thread:$0]  (!%p10354_p12), %s11683_s6, 32, %s415_s18, [#allocation12]  }
  0x3a   : > { %p9962_p6 = pnand %p9961_p5, %p9955_p9 }
  0x3c   : > { %9965 = shalt.err (!%p9962_p6)
}
  0x3d   : > { %8641 = dma.hbm_to_vmem [thread:$0]  (!%p10354_p12), %s11654_s8, 64, %s10358_s22, [#allocation15]  }
  0x3e   : > { %s10207_s18 = smov [#allocation17]   ;;  %s10208_s26 = smov [#allocation5]  }
  0x3f   : > { %s463_s21 = sshll.u32 %s10207_s18, 4  ;;  %s378_s28 = sshll.u32 %s10208_s26, 4  ;;  %s464_s21 = int_to_ptr.vmem [resolvable:$true] %s463_s21  ;;  %s379_s28 = int_to_ptr.vmem [resolvable:$true] %s378_s28 }
  0x40   : > { %s9977_s3 = scalar_lea.vmem %s464_s21, 16  ;;  %s9984_s19 = scalar_lea.vmem %s464_s21, 32 }
  0x41   : > { %p9978_p10 = scmp.ne.s32.totalorder %s464_s21, %s9977_s3  ;;  %p9985_p0 = scmp.lt.s32.totalorder %s464_s21, %s464_s21 }
  0x42   : > { %p9986_p1 = scmp.lt.s32.totalorder %s9984_s19, %s9977_s3 }
  0x43   : > { %p9980_p8 = pnand %p9978_p10, %p10362_p13 }
  0x44   : > { %p9987_p2 = por %p9986_p1, %p9985_p0 }
  0x45   : > { %p9981_p11 = pneg %p9980_p8 }
  0x47   : > { %p9988_p3 = pnand %p9987_p2, %p9981_p11 }
  0x49   : > { %9991 = shalt.err (!%p9988_p3)
}
  0x4a   : > { %8647 = dma.hbm_to_vmem [thread:$0]  (!%p10354_p12), %s11657_s11, 16, %s464_s21, [#allocation18]  }
  0x4b   : > { %s10003_s27 = scalar_lea.vmem %s379_s28, 16  ;;  %s10010_s18 = scalar_lea.vmem %s379_s28, 32 }
  0x4c   : > { %p10004_p9 = scmp.ne.s32.totalorder %s379_s28, %s10003_s27  ;;  %p10011_p5 = scmp.lt.s32.totalorder %s379_s28, %s379_s28 }
  0x4d   : > { %p10012_p6 = scmp.lt.s32.totalorder %s10010_s18, %s10003_s27 }
  0x4e   : > { %p10006_p4 = pnand %p10004_p9, %p10362_p13 }
  0x4f   : > { %p10013_p10 = por %p10012_p6, %p10011_p5 }
  0x50   : > { %p10007_p7 = pneg %p10006_p4 }
  0x52   : > { %p10014_p8 = pnand %p10013_p10, %p10007_p7 }
  0x54   : > { %10017 = shalt.err (!%p10014_p8)
}
  0x55   : > { %s11684_s2 = sld [smem:[#allocation31_spill]]  ;;  %s10209_s21 = smov [#allocation10]  }
  0x56   : > { %s403_s19 = sshll.u32 %s10209_s21, 4  ;;  %s10210_s24 = smov [#allocation13]   ;;  %s404_s19 = int_to_ptr.vmem [resolvable:$true] %s403_s19 }
  0x57   : > { %s424_s22 = sshll.u32 %s10210_s24, 4  ;;  %s10029_s6 = scalar_lea.vmem %s404_s19, 32  ;;  %s425_s22 = int_to_ptr.vmem [resolvable:$true] %s424_s22 }
  0x58   : > { %p10030_p11 = scmp.ne.s32.totalorder %s404_s19, %s10029_s6  ;;  %p10037_p2 = scmp.lt.s32.totalorder %s404_s19, %s404_s19 }
  0x59   : > { %p10038_p3 = scmp.lt.s32.totalorder %s10029_s6, %s10029_s6 }
  0x5a   : > { %p10032_p0 = pnand %p10030_p11, %p10362_p13 }
  0x5b   : > { %8626 = dma.hbm_to_vmem [thread:$0]  (!%p10354_p12), %s11684_s2, 16, %s379_s28, [#allocation6]  }
  0x5c   : > { %p10033_p1 = pneg %p10032_p0  ;;  %p10039_p9 = por %p10038_p3, %p10037_p2 }
  0x5e   : > { %p10040_p4 = pnand %p10039_p9, %p10033_p1 }
  0x60   : > { %10043 = shalt.err (!%p10040_p4)
}
  0x61   : > { %8632 = dma.hbm_to_vmem [thread:$0]  (!%p10354_p12), %s11651_s5, 32, %s404_s19, [#allocation9]  }
  0x62   : > { %s10055_s28 = scalar_lea.vmem %s425_s22, 73728  ;;  %p10063_p10 = scmp.lt.s32.totalorder %s425_s22, %s425_s22 }
  0x63   : > { %p10056_p7 = scmp.ne.s32.totalorder %s425_s22, %s10055_s28  ;;  %p10064_p8 = scmp.lt.s32.totalorder %s10055_s28, %s10055_s28 }
  0x65   : > { %p10058_p5 = pnand %p10056_p7, %p10362_p13  ;;  %p10065_p11 = por %p10064_p8, %p10063_p10 }
  0x67   : > { %p10059_p6 = pneg %p10058_p5 }
  0x69   : > { %p10066_p0 = pnand %p10065_p11, %p10059_p6 }
  0x6b   : > { %10069 = shalt.err (!%p10066_p0)
}
  0x6c   : > { %s10211_s6 = smov 256   ;;  %s10212_s3 = smov 16  }
  0x6d   : > { %8638 = dma.hbm_to_vmem [thread:$0]  (!%p10354_p12), %s11653_s7, 73728, %s425_s22, [#allocation12], %s10211_s6, %s10211_s6, %s10212_s3  }
  0x6e   : > { %s10213_s19 = smov [#allocation16]   ;;  %s10214_s27 = smov [#allocation19]  }
  0x6f   : > { %s449_s24 = sshll.u32 %s10213_s19, 4  ;;  %s477_s18 = sshll.u32 %s10214_s27, 4  ;;  %s450_s24 = int_to_ptr.vmem [resolvable:$true] %s449_s24  ;;  %s478_s18 = int_to_ptr.vmem [resolvable:$true] %s477_s18 }
  0x70   : > { %s10081_s2 = scalar_lea.vmem %s450_s24, 64  ;;  %p10089_p9 = scmp.lt.s32.totalorder %s450_s24, %s450_s24 }
  0x71   : > { %p10082_p1 = scmp.ne.s32.totalorder %s450_s24, %s10081_s2  ;;  %p10090_p4 = scmp.lt.s32.totalorder %s10081_s2, %s10081_s2 }
  0x73   : > { %p10084_p2 = pnand %p10082_p1, %p10362_p13  ;;  %p10091_p7 = por %p10090_p4, %p10089_p9 }
  0x75   : > { %p10085_p3 = pneg %p10084_p2 }
  0x77   : > { %p10092_p5 = pnand %p10091_p7, %p10085_p3 }
  0x79   : > { %10095 = shalt.err (!%p10092_p5)
}
  0x7a   : > { %8644 = dma.hbm_to_vmem [thread:$0]  (!%p10354_p12), %s11655_s9, 64, %s450_s24, [#allocation15]  }
  0x7b   : > { %s10107_s22 = scalar_lea.vmem %s478_s18, 16  ;;  %s10114_s6 = scalar_lea.vmem %s478_s18, 32 }
  0x7c   : > { %p10108_p6 = scmp.ne.s32.totalorder %s478_s18, %s10107_s22  ;;  %p10115_p11 = scmp.lt.s32.totalorder %s478_s18, %s478_s18 }
  0x7d   : > { %p10116_p0 = scmp.lt.s32.totalorder %s10114_s6, %s10107_s22 }
  0x7e   : > { %p10110_p10 = pnand %p10108_p6, %p10362_p13 }
  0x7f   : > { %p10117_p1 = por %p10116_p0, %p10115_p11 }
  0x80   : > { %p10111_p8 = pneg %p10110_p10 }
  0x82   : > { %p10118_p2 = pnand %p10117_p1, %p10111_p8 }
  0x84   : > { %10121 = shalt.err (!%p10118_p2)
}
  0x85   : > { %8650 = dma.hbm_to_vmem [thread:$0]  (!%p10354_p12), %s11659_s13, 16, %s478_s18, [#allocation18]  }
  0x86   : > { %p11685_p3 = scmp.ne.s32.totalorder %s11679_s25, 0 }
  0x87   : > { %p11686_p9 = scmp.eq.s32.totalorder (!%p11685_p3), %s10318_s17, 0 }
  0x88   : > { %498 = sbr.rel (%p11685_p3) target bundleno = 1884 (0x75c), region = 76 }
  0x8d   : > { %10165 = dma.done.wait (%p11686_p9), [#allocation6], 16   ;;  %p11687_p13 = pmov %p11686_p9 }
  0x8e   : > { %p11688_p4 = pmov %p11686_p9 }
  0x8f   : > { %10167 = vsyncadd (%p11687_p13), [#allocation6], 4294967280 }
  0x90   : > { %10169 = dma.done.wait (%p11688_p4), [#allocation9], 48   ;;  %p11689_p7 = pmov %p11688_p4 }
  0x91   : > { %p11690_p5 = pmov %p11688_p4 }
  0x92   : > { %10171 = vsyncadd (%p11689_p7), [#allocation9], 4294967248 }
  0x93   : > { %10173 = dma.done.wait (%p11690_p5), [#allocation12], 73760   ;;  %p11691_p12 = pmov %p11688_p4 }
  0x94   : > { %p11692_p6 = pmov %p11688_p4 }
  0x95   : > { %10175 = vsyncadd (%p11691_p12), [#allocation12], 4294893536 }
  0x96   : > { %10177 = dma.done.wait (%p11692_p6), [#allocation15], 128   ;;  %p11693_p10 = pmov %p11688_p4 }
  0x97   : > { %p11694_p8 = pmov %p11688_p4 }
  0x98   : > { %10179 = vsyncadd (%p11693_p10), [#allocation15], 4294967168 }
  0x99   : > { %10181 = dma.done.wait (%p11694_p8), [#allocation18], 32   ;;  %p11695_p11 = pmov %p11688_p4 }
  0x9a   : > { %p575_p0 = scmp.lt.s32.totalorder %s10318_s17, 1  ;;  %v604_v0 = vlaneseq  ;;  %v10215_v1 = vmov 1983009808   ;;  %vm592_vm0 = vcmask 517120   ;;  %v10216_v4 = vmov 0   ;;  %s10217_s24 = smov 64  }
  0x9b   : > { %10183 = vsyncadd (%p11695_p11), [#allocation18], 4294967264  ;;  %v602_v2 = vunpack.c.l.s4 %v10215_v1  ;;  %591 = vst [vmem:[#allocation2] sm:$0xff] %v10216_v4  ;;  %vm1305_vm1 = vcmask 1040384   ;;  %vm594_vm2 = vcmask 516096   ;;  %vm1307_vm5 = vcmask 1041409  }
  0x9c   : > { %s576_s15 = scalar_select %p575_p0, %s10318_s17, 1  ;;  %v10458_v3 = vshrl.u32 %v604_v0, 7  ;;  %593 = vst.msk [vmem:[#allocation2 + $0x8] sm:$0x3] %vm592_vm0, %v10216_v4  ;;  %vm11669_vm3 = vsmask.f32 256 }
  0x9d   : > { %v603_v5 = vunpack.c.0.s8 %v602_v2  ;;  %vm11668_vm4 = vsmask.f32 1280  ;;  %vm10471_vm6 = vmand %vm1305_vm1, %vm11669_vm3  ;;  %vm1310_vm7 = vcmask 1042434   ;;  %vm1311_vm8 = vsmask.f32 2304  ;;  %v1334_v49 = vld [vmem:[#allocation3] sm:$0xff] }
  0x9e   : > { %s8450_s25 = sshll.u32 %s576_s15, 3  ;;  %vm1315_vm9 = vsmask.f32 3328  ;;  %vm10479_vm10 = vmand %vm594_vm2, %vm11669_vm3  ;;  %v1337_v14 = vld [vmem:[#allocation3 + $0x8] sm:$0x1]  ;;  %vm1314_vm13 = vcmask 1043459  }
  0x9f   : > { %s10465_s19 = scalar_lea.vmem %s11646_s0, %s8450_s25  ;;  %v10468_v6 = vsub.s32 %v603_v5, %v10458_v3  ;;  %vm1308_vm11 = vmand %vm1307_vm5, %vm11668_vm4  ;;  %v1338_v24 = vsel %vm10471_vm6, 0, %v1337_v14  ;;  %vm1318_vm0 = vcmask 1044484   ;;  %vm1319_vm1 = vsmask.f32 4352  ;;  %v2565_v50 = vld [vmem:[#allocation4] sm:$0xff]  ;;  %v2568_v55 = vld [vmem:[#allocation4 + $0x8] sm:$0xff] }
  0xa0   : > { %v7630_v8 = vld.sshfl [vmem:[%s10465_s19] sm:$0x10 pattern:$0x76325410]  ;;  %v581_v9 = vld [vmem:[%s10465_s19] sm:$0x1]  ;;  %vm10496_vm12 = vmor %vm1308_vm11, %vm10471_vm6 }
  0xa1   : > { %v10483_v11 = vcombine.high %v7630_v8, %v7630_v8  ;;  %v10486_v12 = vrot.slane %v581_v9, %v10468_v6  ;;  %v10489_v13 = vld.sshfl [vmem:[%s10465_s19 + $0x4] sm:$0x1 pattern:$0x76325410]  ;;  %vm10509_vm14 = vmand %vm1310_vm7, %vm1311_vm8  ;;  %1339 = vst [vmem:[#allocation3 + $0x8] sm:$0x1] %v1338_v24 }
  0xa2   : > { %v740_v15 = vshrl.u32 %v10489_v13, 16  ;;  %v7639_v16 = vld.sshfl [vmem:[%s10465_s19 + $0x4] sm:$0x10 pattern:$0x76325410]  ;;  %vm1313_vm15 = vmor %vm10509_vm14, %vm10496_vm12  ;;  %vm721_vm5 = vcmask 517121  }
  0xa3   : > { %630 = vrot.lane.b32.xlu0 %v10483_v11, %s10217_s24  ;;  %v709_v18 = vrot.slane %v10483_v11, 7  ;;  %v609_v19 = vshrl.u32 %v10486_v12, 16  ;;  %v10504_v20 = vcombine.high %v7639_v16, %v7639_v16  ;;  %v7635_v21 = vld.sshfl [vmem:[%s10465_s19] sm:$0x20 pattern:$0x76325410]  ;;  %vm1316_vm7 = vmand %vm1314_vm13, %vm1315_vm9 }
  0xa4   : > { %v10513_v23 = vcombine.high %v7635_v21, %v7635_v21  ;;  %v742_v25 = vrot.slane %v740_v15, 7  ;;  %v597_v27 = vld [vmem:[#allocation2 + $0x4] sm:$0x1]  ;;  %vm10530_vm8 = vmor %vm1316_vm7, %vm1313_vm15  ;;  %v637_v35 = vshrl.u32 %v10483_v11, 16  ;;  %vm1322_vm13 = vcmask 1045509   ;;  %v8728_v56 = vld [vmem:[%s11647_s1 + $0x78] sm:$0xff]  }
  0xa5   : > { %710 = vrot.lane.b32.xlu1 %v709_v18, %s10217_s24  ;;  %v766_v26 = vshrl.u32 %v10504_v20, 16  ;;  %v598_v29 = vsel %vm10479_vm10, %v581_v9, %v597_v27  ;;  %v758_v31 = vrot.slane %v10504_v20, 7  ;;  %vm10538_vm11 = vmand %vm1318_vm0, %vm1319_vm1  ;;  %v10543_v34 = vld.sshfl [vmem:[%s10465_s19] sm:$0x2 pattern:$0x76325410]  ;;  %8451 = vmatprep.subr.bf16.mxu0 %v8728_v56 }
  0xa6   : > { %v693_v28 = vshll.u32 %v10513_v23, 16  ;;  %599 = vst [vmem:[#allocation2 + $0x4] sm:$0x1] %v598_v29  ;;  %vm10548_vm9 = vmand %vm721_vm5, %vm11668_vm4  ;;  %v734_v38 = vrot.slane %v10489_v13, 7  ;;  %v642_v39 = vld [vmem:[#allocation2 + $0x8] sm:$0x1] }
  0xa7   : > { %613 = vrot.lane.b32.xlu0 %v609_v19, %s10217_s24  ;;  %v768_v32 = vrot.slane %v766_v26, 7  ;;  %vm1321_vm14 = vmor %vm10538_vm11, %vm10530_vm8  ;;  %vm1326_vm15 = vcmask 1046534   ;;  %v7641_v40 = vld.sshfl [vmem:[%s10465_s19 + $0x4] sm:$0x20 pattern:$0x76325410]  ;;  %v643_v41 = vsel %vm10479_vm10, %v637_v35, %v642_v39 }
  0xa8   : > { %v7636_v37 = vrot.slane %v693_v28, 9  ;;  %v736_v42 = vld [vmem:[#allocation2 + $0x4] sm:$0x2]  ;;  %v770_v43 = vld [vmem:[#allocation2 + $0x8] sm:$0x2]  ;;  %v7634_v44 = vrot.slane %v10543_v34, 9  ;;  %v829_v57 = vcombine.high %v7641_v40, %v7641_v40 }
  0xa9   : > { %743 = vrot.lane.b32.xlu1 %v742_v25, %s10217_s24  ;;  %vm1323_vm0 = vsmask.f32 5376  ;;  %644 = vst [vmem:[#allocation2 + $0x8] sm:$0x1] %v643_v41  ;;  %v723_v45 = vld [vmem:[#allocation2 + $0x2] sm:$0x2]  ;;  %v737_v46 = vsel %vm10548_vm9, %v734_v38, %v736_v42  ;;  %v771_v47 = vsel %vm10548_vm9, %v768_v32, %v770_v43 }
  0xaa   : > { %vm1324_vm1 = vmand %vm1322_vm13, %vm1323_vm0  ;;  %vm1327_vm10 = vsmask.f32 6400  ;;  %772 = vst [vmem:[#allocation2 + $0x8] sm:$0x2] %v771_v47  ;;  %vm1330_vm4 = vcmask 1047559   ;;  %v8723_v52 = vpack.i.bf16 %v693_v28, %v7636_v37  ;;  %v719_v54 = vrot.slane %v637_v35, 7 }
  0xab   : > { %759 = vrot.lane.b32.xlu0 %v758_v31, %s10217_s24  ;;  %vm10575_vm7 = vmor %vm1324_vm1, %vm1321_vm14  ;;  %vm1331_vm3 = vsmask.f32 7424  ;;  %v2571_v51 = vld [vmem:[#allocation4 + $0x10] sm:$0x3]  ;;  %738 = vst [vmem:[#allocation2 + $0x4] sm:$0x2] %v737_v46 }
  0xac   : > { %vm1328_vm13 = vmand %vm1326_vm15, %vm1327_vm10  ;;  %v2572_v53 = vsel %vm10496_vm12, 0, %v2571_v51  ;;  %v724_v58 = vsel %vm10548_vm9, %v719_v54, %v723_v45  ;;  %v10595_v59 = vld.sshfl [vmem:[%s10465_s19 + $0x4] sm:$0x2 pattern:$0x76325410]  ;;  %v8729_v60 = vld [vmem:[%s11647_s1 + $0x38] sm:$0xff]  }
  0xad   : > { %645 = vrot.lane.b32.xlu1 %v10486_v12, %s10217_s24  ;;  %vm1329_vm8 = vmor %vm1328_vm13, %vm10575_vm7  ;;  %2573 = vst [vmem:[#allocation4 + $0x10] sm:$0x3] %v2572_v53  ;;  %vm648_vm15 = vsmask.f32 7938  ;;  %v7637_v61 = vrot.slane %v10513_v23, 9  ;;  %v8730_v1 = vld [vmem:[%s11647_s1 + $0xf8] sm:$0xff]   ;;  %8452 = vmatpush3.bf16.msra.mxu0 %v8729_v60 }
  0xae   : > { %vm1332_vm11 = vmand %vm1330_vm4, %vm1331_vm3  ;;  %725 = vst [vmem:[#allocation2 + $0x2] sm:$0x2] %v724_v58  ;;  %v831_v2 = vshll.u32 %v829_v57, 16  ;;  %8473 = vmatprep.subr.bf16.mxu1 %v8730_v1  ;;  %v8731_v5 = vld [vmem:[%s11647_s1 + $0x70] sm:$0xff]   ;;  %v8732_v8 = vld [vmem:[%s11647_s1 + $0xb8] sm:$0xff]   ;;  %vm713_vm9 = vcmask 1041921  }
  0xaf   : > { %673 = vrot.lane.b32.xlu0 %v7634_v44, %s10217_s24  ;;  %vm1333_vm14 = vmor %vm1332_vm11, %vm1329_vm8  ;;  %8453 = vmatprep.subr.bf16.mxu0 %v8731_v5  ;;  %vm774_vm4 = vsmask.f32 7942  ;;  %v8733_v13 = vld [vmem:[%s11647_s1 + $0x30] sm:$0xff]   ;;  %v8735_v15 = vld [vmem:[%s11647_s1 + $0x68] sm:$0xff]   ;;  %vm11716_vm0 = vsmask.f32 256 }
  0xb0   : > { %v1335_v62 = vsel %vm1333_vm14, 0, %v1334_v49  ;;  %v2566_v63 = vsel %vm1333_vm14, 0, %v2565_v50  ;;  %v2569_v0 = vsel %vm1333_vm14, 0, %v2568_v55  ;;  %vm10616_vm3 = vmand %vm594_vm2, %vm648_vm15  ;;  %v706_v10 = vld [vmem:[#allocation2 + $0x8] sm:$0x1]  ;;  %8474 = vmatpush3.bf16.msra.mxu1 %v8732_v8  ;;  %v8734_v14 = vld [vmem:[%s11647_s1 + $0xf0] sm:$0xff]  }
  0xb1   : > { %8724 = vrot.lane.b32.xlu1 %v8723_v52, %s10217_s24  ;;  %1336 = vst [vmem:[#allocation3] sm:$0xff] %v1335_v62  ;;  %2567 = vst [vmem:[#allocation4] sm:$0xff] %v2566_v63  ;;  %v707_v12 = vsel %vm10616_vm3, %v7637_v61, %v706_v10  ;;  %8454 = vmatpush3.bf16.msra.mxu0 %v8733_v13  ;;  %v8736_v16 = vld [vmem:[%s11647_s1 + $0xb0] sm:$0xff]   ;;  %v8737_v19 = vld [vmem:[%s11647_s1 + $0x28] sm:$0xff]   ;;  %v10218_v50 = vmov 0.0   ;;  %v662_v5 = vshll.u32 %v10543_v34, 16 }
  0xb2   : > { %2570 = vst [vmem:[#allocation4 + $0x8] sm:$0xff] %v2569_v0  ;;  %708 = vst [vmem:[#allocation2 + $0x8] sm:$0x1] %v707_v12  ;;  %8475 = vmatprep.subr.bf16.mxu1 %v8734_v14  ;;  %8455 = vmatprep.subr.bf16.mxu0 %v8735_v15  ;;  %v8738_v21 = vld [vmem:[%s11647_s1 + $0xe8] sm:$0xff]   ;;  %v8739_v22 = vld [vmem:[%s11647_s1 + $0x60] sm:$0xff]   ;;  %vm10219_vm11 = vmmov 0  }
  0xb3   : > { %790 = vrot.lane.b32.xlu0 %v734_v38, %s10217_s24  ;;  %v8740_v24 = vld [vmem:[%s11647_s1 + $0xa8] sm:$0xff]   ;;  %v8741_v25 = vld [vmem:[%s11647_s1 + $0x20] sm:$0xff]   ;;  %vm10652_vm2 = vmand %vm721_vm5, %vm774_vm4  ;;  %vm616_vm5 = vcmask 1040896   ;;  %vm11719_vm10 = vsmask.f32 1280  ;;  %vm1163_vm14 = vcmask 523264  }
  0xb4   : > { %8476 = vmatpush3.bf16.msra.mxu1 %v8736_v16  ;;  %v840_v28 = vld [vmem:[#allocation2 + $0x8] sm:$0x2]  ;;  %v8742_v32 = vld [vmem:[%s11647_s1 + $0xe0] sm:$0xff]   ;;  %v8743_v33 = vld [vmem:[%s11647_s1 + $0x58] sm:$0xff]   ;;  %s8447_s3 = sshll.u32 %s10318_s17, 4  ;;  %p11726_p2 = scmp.ne.s32.totalorder %s11676_s23, 0 }
  0xb5   : > { %811 = vrot.lane.b32.xlu1 %v10595_v59, %s10217_s24  ;;  %8456 = vmatpush3.bf16.msra.mxu0 %v8737_v19  ;;  %v787_v27 = vld [vmem:[#allocation2 + $0x2] sm:$0x2]  ;;  %v841_v30 = vsel %vm10652_vm2, %v829_v57, %v840_v28  ;;  %v8746_v36 = vld [vmem:[%s11647_s1 + $0xd8] sm:$0xff]   ;;  %v8747_v37 = vld [vmem:[%s11647_s1 + $0x50] sm:$0xff]   ;;  %v7633_v19 = vrot.slane %v662_v5, 9  ;;  %s11605_s19 = scalar_lea.hbm %s11660_s14, %s8447_s3  ;;  %s10221_s18 = smov [#allocation20]  }
  0xb6   : > { %8477 = vmatprep.subr.bf16.mxu1 %v8738_v21  ;;  %8457 = vmatprep.subr.bf16.mxu0 %v8739_v22  ;;  %v788_v29 = vsel %vm10652_vm2, %v10513_v23, %v787_v27  ;;  %842 = vst [vmem:[#allocation2 + $0x8] sm:$0x2] %v841_v30  ;;  %v8744_v35 = vld [vmem:[%s11647_s1 + $0xa0] sm:$0xff]   ;;  %v8745_v23 = vld [vmem:[%s11647_s1 + $0x18] sm:$0xff]   ;;  %v8749_v39 = vld [vmem:[%s11647_s1 + $0x10] sm:$0xff]   ;;  %s10126_s28 = sshll.u32 %s10221_s18, 4  ;;  %s10127_s28 = int_to_ptr.vmem [resolvable:$false] %s10126_s28 }
  0xb7   : > { %833 = vrot.lane.b32.xlu0 %v831_v2, %s10217_s24  ;;  %789 = vst [vmem:[#allocation2 + $0x2] sm:$0x2] %v788_v29  ;;  %v8748_v38 = vld [vmem:[%s11647_s1 + $0x98] sm:$0xff]   ;;  %v8750_v40 = vld [vmem:[%s11647_s1 + $0xd0] sm:$0xff]   ;;  %v8751_v41 = vld [vmem:[%s11647_s1 + $0x48] sm:$0xff]   ;;  %s573_s24 = sand.u32 1, %s10194_s30  }
  0xb8   : > { %8478 = vmatpush3.bf16.msra.mxu1 %v8740_v24  ;;  %v8752_v42 = vld [vmem:[%s11647_s1 + $0x90] sm:$0xff]   ;;  %v8753_v43 = vld [vmem:[%s11647_s1 + $0x8] sm:$0xff]   ;;  %v8755_v45 = vld [vmem:[%s11647_s1 + $0x40] sm:$0xff]   ;;  %s574_s15 = scalar_lea.vmem [#allocation20], %s573_s24  ;;  %s7450_s27 = scalar_lea.sflag [#allocation7], %s573_s24 }
  0xb9   : > { %8458 = vmatpush3.bf16.msra.mxu0 %v8741_v25  ;;  %8479 = vmatprep.subr.bf16.mxu1 %v8742_v32  ;;  %v8754_v44 = vld [vmem:[%s11647_s1 + $0xc8] sm:$0xff]   ;;  %v8757_v47 = vld [vmem:[%s11647_s1] sm:$0xff]   ;;  %v8767_v51 = vld [vmem:[%s11650_s4 + $0x74] ss:$8 sps:$4 sm:$0xff]   ;;  %v805_v25 = vshll.u32 %v10595_v59, 16  ;;  %s7462_s25 = sshll.u32 %s574_s15, 4  ;;  %s11607_s25 = int_to_ptr.vmem [resolvable:$true] %s7462_s25 }
  0xba   : > { %8459 = vmatprep.subr.bf16.mxu0 %v8743_v33  ;;  %v8756_v46 = vld [vmem:[%s11647_s1 + $0x88] sm:$0xff]   ;;  %v8758_v48 = vld [vmem:[%s11647_s1 + $0xc0] sm:$0xff]   ;;  %vm10720_vm1 = vmand %vm616_vm5, %vm11716_vm0  ;;  %s10122_s17 = scalar_lea.vmem %s11607_s25, 16  ;;  %s10128_s26 = scalar_lea.vmem %s10127_s28, 32 }
  0xbb   : > { %v8759_v49 = vld [vmem:[%s11647_s1 + $0x80] sm:$0xff]   ;;  %vm10726_vm7 = vmand %vm713_vm9, %vm11719_vm10  ;;  %v8779_v58 = vld [vmem:[%s11650_s4 + $0x54] ss:$8 sps:$4 sm:$0xff]   ;;  %p10123_p1 = scmp.ne.s32.totalorder %s11607_s25, %s10122_s17  ;;  %p10129_p13 = scmp.lt.s32.totalorder %s11607_s25, %s10127_s28 }
  0xbc   : > { %8480 = vmatpush3.bf16.msra.mxu1 %v8744_v35  ;;  %v633_v54 = vld [vmem:[#allocation2 + $0x6] sm:$0x1]  ;;  %v716_v55 = vld [vmem:[#allocation2] sm:$0x2]  ;;  %v618_v57 = vld [vmem:[#allocation2 + $0x4] sm:$0x1]  ;;  %p10130_p4 = scmp.lt.s32.totalorder %s10128_s26, %s10122_s17 }
  0xbd   : > { %8460 = vmatpush3.bf16.msra.mxu0 %v8745_v23  ;;  %8481 = vmatprep.subr.bf16.mxu1 %v8746_v36  ;;  %vm10731_vm13 = vmand %vm616_vm5, %vm648_vm15  ;;  %v746_v62 = vld [vmem:[#allocation2 + $0x4] sm:$0x2]  ;;  %v762_v1 = vld [vmem:[#allocation2 + $0x6] sm:$0x2]  ;;  %p10124_p3 = pnand %p10123_p1, %p11726_p2 }
  0xbe   : > { %8461 = vmatprep.subr.bf16.mxu0 %v8747_v37  ;;  %v650_v10 = vld [vmem:[#allocation2 + $0x2] sm:$0x1]  ;;  %vm10744_vm8 = vmand %vm713_vm9, %vm774_vm4  ;;  %v793_v29 = vld [vmem:[#allocation2 + $0x2] sm:$0x2]  ;;  %p10131_p7 = por %p10130_p4, %p10129_p13 }
  0xbf   : > { %v7642_v5 = vld.sshfl [vmem:[#allocation2 + $0x8] sm:$0x3 pattern:$0x76325410]  ;;  %v8789_v12 = vld [vmem:[%s11650_s4 + $0x30] ss:$8 sps:$4 sm:$0xff]   ;;  %p10125_p9 = pneg %p10124_p3 }
  0xc0   : > { %8482 = vmatpush3.bf16.msra.mxu1 %v8748_v38 }
  0xc1   : > { %8462 = vmatpush3.bf16.msra.mxu0 %v8749_v39  ;;  %8483 = vmatprep.subr.bf16.mxu1 %v8750_v40  ;;  %p10132_p5 = pnand %p10131_p7, %p10125_p9 }
  0xc2   : > { %8463 = vmatprep.subr.bf16.mxu0 %v8751_v41 }
  0xc4   : > { %8484 = vmatpush3.bf16.msra.mxu1 %v8752_v42 }
  0xc5   : > { %8464 = vmatpush3.bf16.msra.mxu0 %v8753_v43  ;;  %8485 = vmatprep.subr.bf16.mxu1 %v8754_v44 }
  0xc6   : > { %8465 = vmatprep.subr.bf16.mxu0 %v8755_v45 }
  0xc8   : > { %8486 = vmatpush3.bf16.msra.mxu1 %v8756_v46 }
  0xc9   : > { %8466 = vmatpush3.bf16.msra.mxu0 %v8757_v47  ;;  %8487 = vmatprep.subr.bf16.mxu1 %v8758_v48 }
  0xca   : > { %8553 = vmatprep.subr.bf16.mxu0 %v10218_v50 }
  0xcc   : > { %8488 = vmatpush3.bf16.msra.mxu1 %v8759_v49  ;;  %v8760_v49 = vld [vmem:[%s11647_s1 + $0x118] sm:$0xff]  }
  0xcd   : > { %2328 = vmatprep.subr.bf16.mxu1 %v8767_v51 }
 0x115   : > { %v631_v56 = vpop.permute.xlu0 %630 }
 0x116   : > { %v634_v60 = vsel %vm10720_vm1, %v631_v56, %v633_v54  ;;  %v8765_v54 = vld [vmem:[%s11650_s4 + $0x70] ss:$8 sps:$4 sm:$0xff]  }
 0x117   : > { %635 = vst [vmem:[#allocation2 + $0x6] sm:$0x1] %v634_v60  ;;  %v711_v61 = vpop.permute.xlu1 %710  ;;  %v8763_v60 = vld [vmem:[%s11647_s1 + $0x108] sm:$0xff]  }
 0x118   : > { %v717_v63 = vsel %vm10726_vm7, %v711_v61, %v716_v55  ;;  %v8773_v55 = vld [vmem:[%s11650_s4 + $0x64] ss:$8 sps:$4 sm:$0xff]   ;;  %v8777_v61 = vld [vmem:[%s11650_s4 + $0x50] ss:$8 sps:$4 sm:$0xff]  }
 0x119   : > { %718 = vst [vmem:[#allocation2] sm:$0x2] %v717_v63  ;;  %v614_v0 = vpop.permute.xlu0 %613  ;;  %v8764_v63 = vld [vmem:[%s11647_s1 + $0x100] sm:$0xff]  }
 0x11a   : > { %v619_v2 = vsel %vm10720_vm1, %v614_v0, %v618_v57  ;;  %v8762_v57 = vld [vmem:[%s11647_s1 + $0x110] sm:$0xff]  }
 0x11b   : > { %620 = vst [vmem:[#allocation2 + $0x4] sm:$0x1] %v619_v2  ;;  %v744_v8 = vpop.permute.xlu1 %743  ;;  %v8770_v0 = vld [vmem:[%s11650_s4 + $0x174] ss:$8 sps:$4 sm:$0xff]  }
 0x11c   : > { %v747_v13 = vsel %vm10726_vm7, %v744_v8, %v746_v62  ;;  %v8785_v62 = vld [vmem:[%s11650_s4 + $0x44] ss:$8 sps:$4 sm:$0xff]   ;;  %v8791_v2 = vld [vmem:[%s11650_s4 + $0x34] ss:$8 sps:$4 sm:$0xff]   ;;  %v8768_v8 = vld [vmem:[%s11650_s4 + $0x170] ss:$8 sps:$4 sm:$0xff]  }
 0x11d   : > { %748 = vst [vmem:[#allocation2 + $0x4] sm:$0x2] %v747_v13  ;;  %v760_v14 = vpop.permute.xlu0 %759  ;;  %v8774_v13 = vld [vmem:[%s11650_s4 + $0x160] ss:$8 sps:$4 sm:$0xff]  }
 0x11e   : > { %v763_v15 = vsel %vm10726_vm7, %v760_v14, %v762_v1  ;;  %v680_v16 = vld [vmem:[#allocation2 + $0x6] sm:$0x1]  ;;  %v8783_v1 = vld [vmem:[%s11650_s4 + $0x40] ss:$8 sps:$4 sm:$0xff]   ;;  %v8782_v14 = vld [vmem:[%s11650_s4 + $0x154] ss:$8 sps:$4 sm:$0xff]  }
 0x11f   : > { %764 = vst [vmem:[#allocation2 + $0x6] sm:$0x2] %v763_v15  ;;  %v681_v34 = vsel %vm10616_vm3, %v10483_v11, %v680_v16  ;;  %v646_v21 = vpop.permute.xlu1 %645  ;;  %v8780_v15 = vld [vmem:[%s11650_s4 + $0x150] ss:$8 sps:$4 sm:$0xff]   ;;  %v8788_v16 = vld [vmem:[%s11650_s4 + $0x144] ss:$8 sps:$4 sm:$0xff]  }
 0x120   : > { %682 = vst [vmem:[#allocation2 + $0x6] sm:$0x1] %v681_v34  ;;  %v651_v22 = vsel %vm10731_vm13, %v646_v21, %v650_v10  ;;  %v776_v24 = vld [vmem:[#allocation2] sm:$0x2]  ;;  %v8776_v10 = vld [vmem:[%s11650_s4 + $0x164] ss:$8 sps:$4 sm:$0xff]  }
 0x121   : > { %652 = vst [vmem:[#allocation2 + $0x2] sm:$0x1] %v651_v22  ;;  %v674_v27 = vpop.permute.xlu0 %673  ;;  %v777_v28 = vsel %vm10652_vm2, %v709_v18, %v776_v24  ;;  %v8792_v34 = vld [vmem:[%s11650_s4 + $0x130] ss:$8 sps:$4 sm:$0xff]   ;;  %v8794_v21 = vld [vmem:[%s11650_s4 + $0x134] ss:$8 sps:$4 sm:$0xff]  }
 0x122   : > { %v668_v30 = vld [vmem:[#allocation2 + $0x4] sm:$0x1]  ;;  %778 = vst [vmem:[#allocation2] sm:$0x2] %v777_v28  ;;  %v8795_v24 = vld [vmem:[%s11650_s4 + $0x20] ss:$8 sps:$4 sm:$0xff]  }
 0x123   : > { %v669_v32 = vsel %vm10616_vm3, %v7633_v19, %v668_v30  ;;  %v8725_v33 = vpop.permute.xlu1 %8724  ;;  %v8786_v19 = vld [vmem:[%s11650_s4 + $0x140] ss:$8 sps:$4 sm:$0xff]   ;;  %v8797_v22 = vld [vmem:[%s11650_s4 + $0x24] ss:$8 sps:$4 sm:$0xff]   ;;  %v8801_v28 = vld [vmem:[%s11650_s4 + $0x10] ss:$8 sps:$4 sm:$0xff]  }
 0x124   : > { %670 = vst [vmem:[#allocation2 + $0x4] sm:$0x1] %v669_v32  ;;  %v8726_v35 = vunpack.i.l.bf16 %v8725_v33  ;;  %v808_v23 = vld [vmem:[#allocation2 + $0x4] sm:$0x2]  ;;  %v8727_v37 = vunpack.i.h.bf16 %v8725_v33  ;;  %v8804_v30 = vld [vmem:[%s11650_s4 + $0x110] ss:$8 sps:$4 sm:$0xff]  }
 0x125   : > { %v809_v59 = vsel %vm10652_vm2, %v805_v25, %v808_v23  ;;  %v791_v36 = vpop.permute.xlu0 %790  ;;  %v8800_v25 = vld [vmem:[%s11650_s4 + $0x124] ss:$8 sps:$4 sm:$0xff]   ;;  %v8806_v32 = vld [vmem:[%s11650_s4 + $0x114] ss:$8 sps:$4 sm:$0xff]   ;;  %v8807_v33 = vld [vmem:[%s11650_s4] ss:$8 sps:$4 sm:$0xff]  }
 0x126   : > { %810 = vst [vmem:[#allocation2 + $0x4] sm:$0x2] %v809_v59  ;;  %v818_v11 = vld [vmem:[#allocation2 + $0x6] sm:$0x2]  ;;  %v794_v18 = vsel %vm10744_vm8, %v791_v36, %v793_v29  ;;  %v8803_v29 = vld [vmem:[%s11650_s4 + $0x14] ss:$8 sps:$4 sm:$0xff]  }
 0x127   : > { %v700_v38 = vld [vmem:[#allocation2 + $0x6] sm:$0x1]  ;;  %v819_v9 = vsel %vm10652_vm2, %v758_v31, %v818_v11  ;;  %795 = vst [vmem:[#allocation2 + $0x2] sm:$0x2] %v794_v18  ;;  %v812_v43 = vpop.permute.xlu1 %811  ;;  %v8810_v59 = vld [vmem:[%s11650_s4 + $0x100] ss:$8 sps:$4 sm:$0xff]  }
 0x128   : > { %v701_v39 = vsel %vm10731_vm13, %v8726_v35, %v700_v38  ;;  %820 = vst [vmem:[#allocation2 + $0x6] sm:$0x2] %v819_v9  ;;  %v8809_v35 = vld [vmem:[%s11650_s4 + $0x4] ss:$8 sps:$4 sm:$0xff]   ;;  %v8815_v36 = vld [vmem:[%s11650_s4 + $0xf4] ss:$8 sps:$4 sm:$0xff]  }
 0x129   : > { %702 = vst [vmem:[#allocation2 + $0x6] sm:$0x1] %v701_v39  ;;  %v783_v40 = vld [vmem:[#allocation2] sm:$0x2]  ;;  %v834_v26 = vpop.permute.xlu0 %833  ;;  %v8812_v23 = vld [vmem:[%s11650_s4 + $0x104] ss:$8 sps:$4 sm:$0xff]  }
 0x12a   : > { %v784_v41 = vsel %vm10744_vm8, %v8727_v37, %v783_v40  ;;  %v8813_v37 = vld [vmem:[%s11650_s4 + $0xf0] ss:$8 sps:$4 sm:$0xff]   ;;  %v8818_v11 = vld [vmem:[%s11650_s4 + $0x1f4] ss:$8 sps:$4 sm:$0xff]   ;;  %v8821_v38 = vld [vmem:[%s11650_s4 + $0xe4] ss:$8 sps:$4 sm:$0xff]  }
 0x12b   : > { %v676_v42 = vld [vmem:[#allocation2 + $0x4] sm:$0x1]  ;;  %785 = vst [vmem:[#allocation2] sm:$0x2] %v784_v41  ;;  %v8816_v18 = vld [vmem:[%s11650_s4 + $0x1f0] ss:$8 sps:$4 sm:$0xff]  }
 0x12c   : > { %v677_v44 = vsel %vm10731_vm13, %v674_v27, %v676_v42  ;;  %v8798_v27 = vld [vmem:[%s11650_s4 + $0x120] ss:$8 sps:$4 sm:$0xff]   ;;  %v8824_v39 = vld [vmem:[%s11650_s4 + $0x1e4] ss:$8 sps:$4 sm:$0xff]   ;;  %v8827_v41 = vld [vmem:[%s11650_s4 + $0xd4] ss:$8 sps:$4 sm:$0xff]  }
 0x12d   : > { %678 = vst [vmem:[#allocation2 + $0x4] sm:$0x1] %v677_v44  ;;  %v814_v20 = vld [vmem:[#allocation2 + $0x4] sm:$0x2]  ;;  %v8819_v9 = vld [vmem:[%s11650_s4 + $0xe0] ss:$8 sps:$4 sm:$0xff]  }
 0x12e   : > { %v815_v31 = vsel %vm10744_vm8, %v812_v43, %v814_v20  ;;  %v8822_v40 = vld [vmem:[%s11650_s4 + $0x1e0] ss:$8 sps:$4 sm:$0xff]   ;;  %v8825_v42 = vld [vmem:[%s11650_s4 + $0xd0] ss:$8 sps:$4 sm:$0xff]   ;;  %v8830_v43 = vld [vmem:[%s11650_s4 + $0x1d4] ss:$8 sps:$4 sm:$0xff]  }
 0x12f   : > { %816 = vst [vmem:[#allocation2 + $0x4] sm:$0x2] %v815_v31  ;;  %v836_v45 = vld [vmem:[#allocation2 + $0x6] sm:$0x2]  ;;  %v8828_v44 = vld [vmem:[%s11650_s4 + $0x1d0] ss:$8 sps:$4 sm:$0xff]  }
 0x130   : > { %v837_v46 = vsel %vm10744_vm8, %v834_v26, %v836_v45  ;;  %v8833_v20 = vld [vmem:[%s11650_s4 + $0xc4] ss:$8 sps:$4 sm:$0xff]   ;;  %v8831_v26 = vld [vmem:[%s11650_s4 + $0xc0] ss:$8 sps:$4 sm:$0xff]  }
 0x131   : > { %838 = vst [vmem:[#allocation2 + $0x6] sm:$0x2] %v837_v46  ;;  %v8836_v31 = vld [vmem:[%s11650_s4 + $0x1c4] ss:$8 sps:$4 sm:$0xff]   ;;  %v8834_v45 = vld [vmem:[%s11650_s4 + $0x1c0] ss:$8 sps:$4 sm:$0xff]  }
 0x132   : > { %v8839_v46 = vld [vmem:[%s11650_s4 + $0xb4] ss:$8 sps:$4 sm:$0xff]  }
 0x138   : > { %v843_v47 = vld [vmem:[#allocation2] sm:$0xff] }
 0x139   : > { %v926_v48 = vrot.slane %v843_v47, %v10468_v6  ;;  %v919_v51 = vcombine.high %v843_v47, %v843_v47  ;;  %v8837_v47 = vld [vmem:[%s11650_s4 + $0xb0] ss:$8 sps:$4 sm:$0xff]  }
 0x13b   : > { %v934_v52 = vcombine.high %v926_v48, %v926_v48  ;;  %v933_v53 = vrot.slane %v919_v51, %v10468_v6  ;;  %v8771_v6 = vld [vmem:[%s11650_s4 + $0x60] ss:$8 sps:$4 sm:$0xff]   ;;  %v8845_v51 = vld [vmem:[%s11650_s4 + $0xa4] ss:$8 sps:$4 sm:$0xff]  }
 0x13d   : > { %1199 = vmatprep.mubr.bf16.mxu0 %v934_v52  ;;  %v935_v56 = vcombine.high %v933_v53, %v933_v53  ;;  %v8843_v52 = vld [vmem:[%s11650_s4 + $0xa0] ss:$8 sps:$4 sm:$0xff]  }
 0x13e   : > { %1200 = vmatmul.mubr.bf16.vlgmr.msra.gmra.mxu0 %v926_v48  ;;  %v8842_v48 = vld [vmem:[%s11650_s4 + $0x1b4] ss:$8 sps:$4 sm:$0xff]  }
 0x13f   : > { %8554 = vmatpush3.bf16.msra.mxu0 %v8760_v49  ;;  %1239 = vmatprep.mubr.bf16.mxu1 %v935_v56  ;;  %v8840_v49 = vld [vmem:[%s11650_s4 + $0x1b0] ss:$8 sps:$4 sm:$0xff]   ;;  %v8851_v56 = vld [vmem:[%s11650_s4 + $0x94] ss:$8 sps:$4 sm:$0xff]  }
 0x140   : > { %1240 = vmatmul.mubr.bf16.vlgmr.msra.gmra.mxu1 %v933_v53  ;;  %8555 = vmatprep.subr.bf16.mxu0 %v10218_v50  ;;  %v8846_v53 = vld [vmem:[%s11650_s4 + $0x1a0] ss:$8 sps:$4 sm:$0xff]  }
 0x141   : > { %8561 = vmatprep.mubr.msk.bf16.mxu0 %vm10219_vm11, %v10218_v50  ;;  %2329 = vmatpush1.bf16.msra.mxu1 %v8765_v54  ;;  %v8848_v54 = vld [vmem:[%s11650_s4 + $0x1a4] ss:$8 sps:$4 sm:$0xff]  }
 0x142   : > { %2330 = vmatprep.subr.bf16.mxu1 %v8773_v55  ;;  %v8849_v55 = vld [vmem:[%s11650_s4 + $0x90] ss:$8 sps:$4 sm:$0xff]  }
 0x143   : > { %8556 = vmatpush3.bf16.msra.mxu0 %v8762_v57  ;;  %v8854_v57 = vld [vmem:[%s11650_s4 + $0x194] ss:$8 sps:$4 sm:$0xff]  }
 0x144   : > { %8557 = vmatprep.subr.bf16.mxu0 %v10218_v50 }
 0x145   : > { %2331 = vmatpush1.bf16.msra.mxu1 %v8771_v6  ;;  %v8852_v6 = vld [vmem:[%s11650_s4 + $0x190] ss:$8 sps:$4 sm:$0xff]  }
 0x146   : > { %2332 = vmatprep.subr.bf16.mxu1 %v8779_v58  ;;  %v8857_v58 = vld [vmem:[%s11650_s4 + $0x84] ss:$8 sps:$4 sm:$0xff]  }
 0x147   : > { %8558 = vmatpush3.bf16.msra.mxu0 %v8763_v60  ;;  %v8855_v60 = vld [vmem:[%s11650_s4 + $0x80] ss:$8 sps:$4 sm:$0xff]  }
 0x148   : > { %8559 = vmatprep.subr.bf16.mxu0 %v10218_v50 }
 0x149   : > { %2333 = vmatpush1.bf16.msra.mxu1 %v8777_v61  ;;  %v8860_v61 = vld [vmem:[%s11650_s4 + $0x184] ss:$8 sps:$4 sm:$0xff]  }
 0x14a   : > { %2334 = vmatprep.subr.bf16.mxu1 %v8785_v62  ;;  %v8858_v62 = vld [vmem:[%s11650_s4 + $0x180] ss:$8 sps:$4 sm:$0xff]  }
 0x14b   : > { %8560 = vmatpush3.bf16.msra.mxu0 %v8764_v63  ;;  %v8863_v63 = vld [vmem:[%s11650_s4 + $0x274] ss:$8 sps:$4 sm:$0xff]  }
 0x14c   : > { %2369 = vmatprep.subr.bf16.mxu0 %v8770_v0  ;;  %v8867_v0 = vld [vmem:[%s11650_s4 + $0x374] ss:$8 sps:$4 sm:$0xff]  }
 0x14d   : > { %2335 = vmatpush1.bf16.msra.mxu1 %v8783_v1 }
 0x14e   : > { %8562 = vmatmul.mubr.msk.bf16.vlgmr.msra.gmra.mxu0 %vm1163_vm14, %v7642_v5  ;;  %2336 = vmatprep.subr.bf16.mxu1 %v8791_v2 }
 0x14f   : > { %2370 = vmatpush1.bf16.msra.mxu0 %v8768_v8 }
 0x150   : > { %2371 = vmatprep.subr.bf16.mxu0 %v8776_v10 }
 0x151   : > { %2337 = vmatpush1.bf16.msra.mxu1 %v8789_v12 }
 0x152   : > { %2338 = vmatprep.subr.bf16.mxu1 %v8797_v22  ;;  %v7680_v22 = vld [vmem:[#allocation5] ss:$0 sm:$0xff] }
 0x153   : > { %2372 = vmatpush1.bf16.msra.mxu0 %v8774_v13 }
 0x154   : > { %2373 = vmatprep.subr.bf16.mxu0 %v8782_v14 }
 0x155   : > { %2339 = vmatpush1.bf16.msra.mxu1 %v8795_v24 }
 0x156   : > { %2340 = vmatprep.subr.bf16.mxu1 %v8803_v29 }
 0x157   : > { %2374 = vmatpush1.bf16.msra.mxu0 %v8780_v15 }
 0x158   : > { %2375 = vmatprep.subr.bf16.mxu0 %v8788_v16 }
 0x159   : > { %2341 = vmatpush1.bf16.msra.mxu1 %v8801_v28 }
 0x15a   : > { %2342 = vmatprep.subr.bf16.mxu1 %v8809_v35 }
 0x15b   : > { %2376 = vmatpush1.bf16.msra.mxu0 %v8786_v19  ;;  %v10220_v19 = vmov 1966171168  }
 0x15c   : > { %2377 = vmatprep.subr.bf16.mxu0 %v8794_v21 }
 0x15d   : > { %2343 = vmatpush1.bf16.msra.mxu1 %v8807_v33 }
 0x15e   : > { %2344 = vmatprep.subr.bf16.mxu1 %v8815_v36  ;;  %v1340_v36 = vld [vmem:[#allocation3 + $0x4] sm:$0x1] }
 0x15f   : > { %2378 = vmatpush1.bf16.msra.mxu0 %v8792_v34  ;;  %v1345_v34 = vunpack.c.l.s4 %v10220_v19  ;;  %v8889_v19 = vld [vmem:[%s11650_s4 + $0x330] ss:$8 sps:$4 sm:$0xff]  }
 0x160   : > { %2379 = vmatprep.subr.bf16.mxu0 %v8800_v25 }
 0x161   : > { %2345 = vmatpush2.bf16.msra.mxu1 %v8813_v37  ;;  %v1346_v29 = vunpack.c.0.s8 %v1345_v34  ;;  %v8897_v34 = vld [vmem:[%s11650_s4 + $0x324] ss:$8 sps:$4 sm:$0xff]  }
 0x162   : > { %2346 = vmatprep.subr.bf16.mxu1 %v8821_v38 }
 0x163   : > { %2380 = vmatpush1.bf16.msra.mxu0 %v8798_v27  ;;  %v7681_v27 = vld [vmem:[#allocation8] ss:$0 sm:$0xff] }
 0x164   : > { %2381 = vmatprep.subr.bf16.mxu0 %v8806_v32 }
 0x165   : > { %2347 = vmatpush2.bf16.msra.mxu1 %v8819_v9  ;;  %v1364_v9 = vld [vmem:[#allocation3 + $0x5] sm:$0x1] }
 0x166   : > { %2348 = vmatprep.subr.bf16.mxu1 %v8827_v41 }
 0x167   : > { %2382 = vmatpush1.bf16.msra.mxu0 %v8804_v30 }
 0x168   : > { %2383 = vmatprep.subr.bf16.mxu0 %v8812_v23  ;;  %v10997_v23 = vsub.s32 %v1346_v29, %v10458_v3  ;;  %v8901_v29 = vld [vmem:[%s11650_s4 + $0x310] ss:$8 sps:$4 sm:$0xff]  }
 0x169   : > { %2349 = vmatpush2.bf16.msra.mxu1 %v8825_v42 }
 0x16a   : > { %2350 = vmatprep.subr.bf16.mxu1 %v8833_v20 }
 0x16b   : > { %2384 = vmatpush1.bf16.msra.mxu0 %v8810_v59 }
 0x16c   : > { %2385 = vmatprep.subr.bf16.mxu0 %v8818_v11 }
 0x16d   : > { %2351 = vmatpush2.bf16.msra.mxu1 %v8831_v26 }
 0x16e   : > { %2352 = vmatprep.subr.bf16.mxu1 %v8839_v46 }
 0x16f   : > { %2386 = vmatpush2.bf16.msra.mxu0 %v8816_v18 }
 0x170   : > { %2387 = vmatprep.subr.bf16.mxu0 %v8824_v39 }
 0x171   : > { %2353 = vmatpush2.bf16.msra.mxu1 %v8837_v47 }
 0x172   : > { %2354 = vmatprep.subr.bf16.mxu1 %v8845_v51 }
 0x173   : > { %2388 = vmatpush2.bf16.msra.mxu0 %v8822_v40  ;;  %v1376_v40 = vld [vmem:[#allocation3 + $0x7] sm:$0x1] }
 0x174   : > { %2389 = vmatprep.subr.bf16.mxu0 %v8830_v43  ;;  %v1385_v43 = vld [vmem:[#allocation3 + $0x8] sm:$0x1] }
 0x175   : > { %2355 = vmatpush2.bf16.msra.mxu1 %v8843_v52 }
 0x176   : > { %2356 = vmatprep.subr.bf16.mxu1 %v8851_v56  ;;  %v8865_v56 = vld [vmem:[%s11650_s4 + $0x370] ss:$8 sps:$4 sm:$0xff]  }
 0x177   : > { %2390 = vmatpush2.bf16.msra.mxu0 %v8828_v44 }
 0x178   : > { %2391 = vmatprep.subr.bf16.mxu0 %v8836_v31 }
 0x179   : > { %2357 = vmatpush2.bf16.msra.mxu1 %v8849_v55 }
 0x17a   : > { %2358 = vmatprep.subr.bf16.mxu1 %v8857_v58  ;;  %v8873_v58 = vld [vmem:[%s11650_s4 + $0x364] ss:$8 sps:$4 sm:$0xff]  }
 0x17b   : > { %2392 = vmatpush2.bf16.msra.mxu0 %v8834_v45 }
 0x17c   : > { %2393 = vmatprep.subr.bf16.mxu0 %v8842_v48 }
 0x17d   : > { %2359 = vmatpush2.bf16.msra.mxu1 %v8855_v60  ;;  %v8868_v60 = vld [vmem:[%s11650_s4 + $0x260] ss:$8 sps:$4 sm:$0xff]  }
 0x17e   : > { %2410 = vmatprep.subr.bf16.mxu1 %v8863_v63  ;;  %v8871_v63 = vld [vmem:[%s11650_s4 + $0x360] ss:$8 sps:$4 sm:$0xff]  }
 0x17f   : > { %2394 = vmatpush2.bf16.msra.mxu0 %v8840_v49 }
 0x180   : > { %2395 = vmatprep.subr.bf16.mxu0 %v8848_v54 }
 0x183   : > { %2396 = vmatpush2.bf16.msra.mxu0 %v8846_v53  ;;  %v8861_v53 = vld [vmem:[%s11650_s4 + $0x270] ss:$8 sps:$4 sm:$0xff]  }
 0x184   : > { %2397 = vmatprep.subr.bf16.mxu0 %v8854_v57  ;;  %v8870_v57 = vld [vmem:[%s11650_s4 + $0x264] ss:$8 sps:$4 sm:$0xff]  }
 0x187   : > { %2398 = vmatpush2.bf16.msra.mxu0 %v8852_v6 }
 0x188   : > { %2399 = vmatprep.subr.bf16.mxu0 %v8860_v61 }
 0x18b   : > { %2400 = vmatpush2.bf16.msra.mxu0 %v8858_v62  ;;  %v8876_v62 = vld [vmem:[%s11650_s4 + $0x254] ss:$8 sps:$4 sm:$0xff]  }
 0x18c   : > { %2451 = vmatprep.subr.bf16.mxu0 %v8867_v0  ;;  %v8879_v0 = vld [vmem:[%s11650_s4 + $0x354] ss:$8 sps:$4 sm:$0xff]  }
 0x1fe   : > { %v8467_v1 = vpop.f32.mrf.mxu0 }
 0x200   : > { %v8468_v2 = vpop.f32.mrf.mxu0  ;;  %v8489_v5 = vpop.f32.mrf.mxu1 }
 0x201   : > { %v8469_v16 = vadd.f32 %v8468_v2, %v8467_v1  ;;  %v8874_v1 = vld [vmem:[%s11650_s4 + $0x250] ss:$8 sps:$4 sm:$0xff]   ;;  %v8882_v2 = vld [vmem:[%s11650_s4 + $0x244] ss:$8 sps:$4 sm:$0xff]  }
 0x202   : > { %v8470_v8 = vpop.f32.mrf.mxu0  ;;  %v8490_v10 = vpop.f32.mrf.mxu1 }
 0x203   : > { %v8491_v15 = vadd.f32 %v8490_v10, %v8489_v5  ;;  %v8877_v5 = vld [vmem:[%s11650_s4 + $0x350] ss:$8 sps:$4 sm:$0xff]   ;;  %v8885_v8 = vld [vmem:[%s11650_s4 + $0x344] ss:$8 sps:$4 sm:$0xff]   ;;  %v8880_v10 = vld [vmem:[%s11650_s4 + $0x240] ss:$8 sps:$4 sm:$0xff]  }
 0x204   : > { %v8471_v12 = vpop.f32.mrf.mxu0  ;;  %v8492_v13 = vpop.f32.mrf.mxu1 }
 0x205   : > { %v1242_v21 = vadd.f32 %v8491_v15, %v8469_v16  ;;  %v8888_v12 = vld [vmem:[%s11650_s4 + $0x234] ss:$8 sps:$4 sm:$0xff]   ;;  %v8883_v13 = vld [vmem:[%s11650_s4 + $0x340] ss:$8 sps:$4 sm:$0xff]   ;;  %v8886_v15 = vld [vmem:[%s11650_s4 + $0x230] ss:$8 sps:$4 sm:$0xff]  }
 0x206   : > { %v8493_v14 = vpop.f32.mrf.mxu1  ;;  %v8894_v16 = vld [vmem:[%s11650_s4 + $0x224] ss:$8 sps:$4 sm:$0xff]  }
 0x207   : > { %v8891_v14 = vld [vmem:[%s11650_s4 + $0x334] ss:$8 sps:$4 sm:$0xff]  }
 0x20e   : > { %v1281_v24 = vpop.f32.mrf.mxu0 }
 0x20f   : > { %v1282_v25 = vadd.f32 %v1281_v24, %v1242_v21  ;;  %v8892_v21 = vld [vmem:[%s11650_s4 + $0x220] ss:$8 sps:$4 sm:$0xff]  }
 0x210   : > { %v8563_v28 = vpop.f32.mrf.mxu0  ;;  %v8895_v24 = vld [vmem:[%s11650_s4 + $0x320] ss:$8 sps:$4 sm:$0xff]  }
 0x211   : > { %v1293_v30 = vmul.f32 %v7680_v22, %v1282_v25  ;;  %v8900_v22 = vld [vmem:[%s11650_s4 + $0x214] ss:$8 sps:$4 sm:$0xff]   ;;  %v8906_v28 = vld [vmem:[%s11650_s4 + $0x204] ss:$8 sps:$4 sm:$0xff]  }
 0x212   : > { %v1284_v32 = vpop.f32.mrf.mxu0  ;;  %v8903_v25 = vld [vmem:[%s11650_s4 + $0x314] ss:$8 sps:$4 sm:$0xff]  }
 0x213   : > { %v1300_v33 = vadd.f32 %v7681_v27, %v1293_v30  ;;  %v8898_v27 = vld [vmem:[%s11650_s4 + $0x210] ss:$8 sps:$4 sm:$0xff]   ;;  %v8909_v30 = vld [vmem:[%s11650_s4 + $0x304] ss:$8 sps:$4 sm:$0xff]   ;;  %v8904_v32 = vld [vmem:[%s11650_s4 + $0x200] ss:$8 sps:$4 sm:$0xff]  }
 0x214   : > { %v8564_v35 = vpop.f32.mrf.mxu0 }
 0x215   : > { %v1301_v59 = vmax.f32 %v1300_v33, 0.0  ;;  %v8912_v33 = vld [vmem:[%s11650_s4 + $0x2f4] ss:$8 sps:$4 sm:$0xff]   ;;  %v8907_v35 = vld [vmem:[%s11650_s4 + $0x300] ss:$8 sps:$4 sm:$0xff]  }
 0x217   : > { %v1302_v37 = vpack.c.bf16 %v1301_v59, %v1301_v59  ;;  %v8915_v59 = vld [vmem:[%s11650_s4 + $0x3f4] ss:$8 sps:$4 sm:$0xff]  }
 0x219   : > { %v1341_v11 = vsel %vm10471_vm6, %v1302_v37, %v1340_v36  ;;  %v1350_v18 = vrot.slane %v1302_v37, %v10997_v23  ;;  %v8910_v36 = vld [vmem:[%s11650_s4 + $0x2f0] ss:$8 sps:$4 sm:$0xff]   ;;  %v8918_v37 = vld [vmem:[%s11650_s4 + $0x2e4] ss:$8 sps:$4 sm:$0xff]  }
 0x21a   : > { %1342 = vst [vmem:[#allocation3 + $0x4] sm:$0x1] %v1341_v11  ;;  %v8913_v11 = vld [vmem:[%s11650_s4 + $0x3f0] ss:$8 sps:$4 sm:$0xff]  }
 0x21b   : > { %v1357_v38 = vrot.slane %v1350_v18, %v10997_v23  ;;  %v1367_v39 = vcombine.high %v1350_v18, %v1350_v18  ;;  %v8921_v18 = vld [vmem:[%s11650_s4 + $0x3e4] ss:$8 sps:$4 sm:$0xff]  }
 0x21d   : > { %v1359_v41 = vshrl.u32 %v1357_v38, 16  ;;  %v1374_v42 = vrot.slane %v1367_v39, %v10997_v23  ;;  %v8916_v38 = vld [vmem:[%s11650_s4 + $0x2e0] ss:$8 sps:$4 sm:$0xff]  }
 0x21e   : > { %v8919_v39 = vld [vmem:[%s11650_s4 + $0x3e0] ss:$8 sps:$4 sm:$0xff]  }
 0x21f   : > { %v1365_v44 = vsel %vm10471_vm6, %v1359_v41, %v1364_v9  ;;  %v1377_v20 = vsel %vm10471_vm6, %v1374_v42, %v1376_v40  ;;  %v1380_v26 = vshrl.u32 %v1374_v42, 16  ;;  %v8924_v9 = vld [vmem:[%s11650_s4 + $0x2d4] ss:$8 sps:$4 sm:$0xff]   ;;  %v8922_v41 = vld [vmem:[%s11650_s4 + $0x2d0] ss:$8 sps:$4 sm:$0xff]  }
 0x220   : > { %1366 = vst [vmem:[#allocation3 + $0x5] sm:$0x1] %v1365_v44  ;;  %1378 = vst [vmem:[#allocation3 + $0x7] sm:$0x1] %v1377_v20  ;;  %v8927_v40 = vld [vmem:[%s11650_s4 + $0x3d4] ss:$8 sps:$4 sm:$0xff]  }
 0x221   : > { %v1386_v31 = vsel %vm10471_vm6, %v1380_v26, %v1385_v43  ;;  %v8930_v42 = vld [vmem:[%s11650_s4 + $0x2c4] ss:$8 sps:$4 sm:$0xff]   ;;  %v8925_v43 = vld [vmem:[%s11650_s4 + $0x3d0] ss:$8 sps:$4 sm:$0xff]   ;;  %v8928_v20 = vld [vmem:[%s11650_s4 + $0x2c0] ss:$8 sps:$4 sm:$0xff]  }
 0x222   : > { %1387 = vst [vmem:[#allocation3 + $0x8] sm:$0x1] %v1386_v31  ;;  %v8933_v44 = vld [vmem:[%s11650_s4 + $0x3c4] ss:$8 sps:$4 sm:$0xff]   ;;  %v8936_v26 = vld [vmem:[%s11650_s4 + $0x2b4] ss:$8 sps:$4 sm:$0xff]  }
 0x223   : > { %v8931_v31 = vld [vmem:[%s11650_s4 + $0x3c0] ss:$8 sps:$4 sm:$0xff]   ;;  %vm7447_vm6 = vcmask 24576  }
 0x227   : > { %v1388_v45 = vld [vmem:[#allocation3] sm:$0xff] }
 0x228   : > { %v1543_v46 = vrot.slane %v1388_v45, %v10997_v23  ;;  %v1536_v47 = vcombine.high %v1388_v45, %v1388_v45  ;;  %v8939_v45 = vld [vmem:[%s11650_s4 + $0x3b4] ss:$8 sps:$4 sm:$0xff]  }
 0x22a   : > { %v1551_v48 = vcombine.high %v1543_v46, %v1543_v46  ;;  %v11012_v49 = vrot.slane %v1536_v47, %v10997_v23  ;;  %v1559_v51 = vrot.slane %v1543_v46, %v10997_v23  ;;  %v8934_v46 = vld [vmem:[%s11650_s4 + $0x2b0] ss:$8 sps:$4 sm:$0xff]   ;;  %v8942_v47 = vld [vmem:[%s11650_s4 + $0x2a4] ss:$8 sps:$4 sm:$0xff]  }
 0x22c   : > { %v1573_v52 = vrot.slane %v1551_v48, %v10997_v23  ;;  %v1552_v7 = vcombine.high %v11012_v49, %v11012_v49  ;;  %v1581_v6 = vcombine.high %v1559_v51, %v1559_v51  ;;  %v8937_v48 = vld [vmem:[%s11650_s4 + $0x3b0] ss:$8 sps:$4 sm:$0xff]  }
 0x22e   : > { %2360 = vmatprep.mubr.bf16.mxu1 %v1573_v52  ;;  %v1583_v54 = vcombine.high %v1573_v52, %v1573_v52  ;;  %v1580_v55 = vrot.slane %v1552_v7, %v10997_v23  ;;  %v8940_v52 = vld [vmem:[%s11650_s4 + $0x2a0] ss:$8 sps:$4 sm:$0xff]  }
 0x22f   : > { %2361 = vmatmul.mubr.bf16.vlgmr.msra.gmra.mxu1 %v1559_v51  ;;  %v8945_v51 = vld [vmem:[%s11650_s4 + $0x3a4] ss:$8 sps:$4 sm:$0xff]   ;;  %v8943_v7 = vld [vmem:[%s11650_s4 + $0x3a0] ss:$8 sps:$4 sm:$0xff]  }
 0x230   : > { %2411 = vmatpush1.bf16.msra.mxu1 %v8861_v53  ;;  %2401 = vmatprep.mubr.bf16.mxu0 %v1583_v54  ;;  %v1584_v61 = vcombine.high %v1580_v55, %v1580_v55  ;;  %v8948_v53 = vld [vmem:[%s11650_s4 + $0x294] ss:$8 sps:$4 sm:$0xff]  }
 0x231   : > { %2442 = vmatprep.mubr.bf16.mxu1 %v1580_v55  ;;  %2402 = vmatmul.mubr.bf16.vlgmr.msra.gmra.mxu0 %v1581_v6  ;;  %v8951_v54 = vld [vmem:[%s11650_s4 + $0x394] ss:$8 sps:$4 sm:$0xff]   ;;  %v8949_v6 = vld [vmem:[%s11650_s4 + $0x390] ss:$8 sps:$4 sm:$0xff]  }
 0x232   : > { %2452 = vmatpush1.bf16.msra.mxu0 %v8865_v56  ;;  %2412 = vmatprep.subr.bf16.mxu1 %v8870_v57  ;;  %v11187_v55 = vld [vmem:[#allocation4] sm:$0xff]  ;;  %v8954_v57 = vld [vmem:[%s11650_s4 + $0x284] ss:$8 sps:$4 sm:$0xff]  }
 0x233   : > { %2483 = vmatprep.mubr.bf16.mxu0 %v1584_v61  ;;  %2453 = vmatprep.subr.bf16.mxu0 %v8873_v58  ;;  %v8946_v56 = vld [vmem:[%s11650_s4 + $0x290] ss:$8 sps:$4 sm:$0xff]   ;;  %v11200_v58 = vrot.slane %v11187_v55, %v10997_v23  ;;  %v8952_v61 = vld [vmem:[%s11650_s4 + $0x280] ss:$8 sps:$4 sm:$0xff]  }
 0x234   : > { %2413 = vmatpush1.bf16.msra.mxu1 %v8868_v60  ;;  %v8957_v60 = vld [vmem:[%s11650_s4 + $0x384] ss:$8 sps:$4 sm:$0xff]  }
 0x235   : > { %2414 = vmatprep.subr.bf16.mxu1 %v8876_v62  ;;  %v8960_v62 = vld [vmem:[%s11650_s4 + $0x474] ss:$8 sps:$4 sm:$0xff]  }
 0x236   : > { %2454 = vmatpush1.bf16.msra.mxu0 %v8871_v63  ;;  %v8955_v63 = vld [vmem:[%s11650_s4 + $0x380] ss:$8 sps:$4 sm:$0xff]  }
 0x237   : > { %2455 = vmatprep.subr.bf16.mxu0 %v8879_v0  ;;  %v3192_v0 = vcombine.high %v11200_v58, %v11200_v58 }
 0x238   : > { %2415 = vmatpush1.bf16.msra.mxu1 %v8874_v1  ;;  %v1566_v1 = vrot.slane %v11012_v49, %v10997_v23  ;;  %v8969_v49 = vld [vmem:[#allocation13 + $0xc4] ss:$16 sps:$4 sm:$0xff]  }
 0x239   : > { %2416 = vmatprep.subr.bf16.mxu1 %v8882_v2  ;;  %v8963_v2 = vld [vmem:[#allocation13 + $0xe4] ss:$16 sps:$4 sm:$0xff]  }
 0x23a   : > { %2456 = vmatpush1.bf16.msra.mxu0 %v8877_v5  ;;  %v8958_v5 = vld [vmem:[%s11650_s4 + $0x470] ss:$8 sps:$4 sm:$0xff]  }
 0x23b   : > { %2457 = vmatprep.subr.bf16.mxu0 %v8885_v8  ;;  %v8966_v8 = vld [vmem:[%s11650_s4 + $0x464] ss:$8 sps:$4 sm:$0xff]  }
 0x23c   : > { %2417 = vmatpush1.bf16.msra.mxu1 %v8880_v10  ;;  %v8961_v10 = vld [vmem:[#allocation13 + $0xe0] ss:$16 sps:$4 sm:$0xff]  }
 0x23d   : > { %2418 = vmatprep.subr.bf16.mxu1 %v8888_v12  ;;  %v11225_v12 = vrot.slane %v3192_v0, %v10997_v23  ;;  %v9033_v0 = vld [vmem:[#allocation13 + $0x160] ss:$16 sps:$4 sm:$0xff]  }
 0x23e   : > { %2458 = vmatpush1.bf16.msra.mxu0 %v8883_v13  ;;  %v1582_v13 = vcombine.high %v1566_v1, %v1566_v1 }
 0x23f   : > { %2459 = vmatprep.subr.bf16.mxu0 %v8891_v14  ;;  %v8964_v14 = vld [vmem:[%s11650_s4 + $0x460] ss:$8 sps:$4 sm:$0xff]  }
 0x240   : > { %2419 = vmatpush1.bf16.msra.mxu1 %v8886_v15  ;;  %v8972_v15 = vld [vmem:[%s11650_s4 + $0x454] ss:$8 sps:$4 sm:$0xff]  }
 0x241   : > { %2420 = vmatprep.subr.bf16.mxu1 %v8894_v16  ;;  %v8967_v16 = vld [vmem:[#allocation13 + $0xc0] ss:$16 sps:$4 sm:$0xff]  }
 0x242   : > { %2460 = vmatpush1.bf16.msra.mxu0 %v8889_v19  ;;  %v8975_v19 = vld [vmem:[#allocation13 + $0xa4] ss:$16 sps:$4 sm:$0xff]  }
 0x243   : > { %2461 = vmatprep.subr.bf16.mxu0 %v8897_v34  ;;  %v8970_v34 = vld [vmem:[%s11650_s4 + $0x450] ss:$8 sps:$4 sm:$0xff]  }
 0x244   : > { %2421 = vmatpush1.bf16.msra.mxu1 %v8892_v21  ;;  %v8973_v21 = vld [vmem:[#allocation13 + $0xa0] ss:$16 sps:$4 sm:$0xff]  }
 0x245   : > { %2422 = vmatprep.subr.bf16.mxu1 %v8900_v22  ;;  %v8981_v22 = vld [vmem:[#allocation13 + $0x84] ss:$16 sps:$4 sm:$0xff]  }
 0x246   : > { %2462 = vmatpush1.bf16.msra.mxu0 %v8895_v24  ;;  %v8976_v24 = vld [vmem:[%s11650_s4 + $0x440] ss:$8 sps:$4 sm:$0xff]  }
 0x247   : > { %2463 = vmatprep.subr.bf16.mxu0 %v8903_v25  ;;  %v8984_v25 = vld [vmem:[%s11650_s4 + $0x434] ss:$8 sps:$4 sm:$0xff]  }
 0x248   : > { %2423 = vmatpush1.bf16.msra.mxu1 %v8898_v27  ;;  %v8979_v27 = vld [vmem:[#allocation13 + $0x80] ss:$16 sps:$4 sm:$0xff]  }
 0x249   : > { %2424 = vmatprep.subr.bf16.mxu1 %v8906_v28  ;;  %v8987_v28 = vld [vmem:[#allocation13 + $0x64] ss:$16 sps:$4 sm:$0xff]  }
 0x24a   : > { %2464 = vmatpush1.bf16.msra.mxu0 %v8901_v29  ;;  %v8982_v29 = vld [vmem:[%s11650_s4 + $0x430] ss:$8 sps:$4 sm:$0xff]  }
 0x24b   : > { %2465 = vmatprep.subr.bf16.mxu0 %v8909_v30  ;;  %v8990_v30 = vld [vmem:[%s11650_s4 + $0x424] ss:$8 sps:$4 sm:$0xff]  }
 0x24c   : > { %2425 = vmatpush1.bf16.msra.mxu1 %v8904_v32  ;;  %v8985_v32 = vld [vmem:[#allocation13 + $0x60] ss:$16 sps:$4 sm:$0xff]  }
 0x24d   : > { %2426 = vmatprep.subr.bf16.mxu1 %v8912_v33  ;;  %v8993_v33 = vld [vmem:[#allocation13 + $0x44] ss:$16 sps:$4 sm:$0xff]  }
 0x24e   : > { %2466 = vmatpush1.bf16.msra.mxu0 %v8907_v35  ;;  %v8988_v35 = vld [vmem:[%s11650_s4 + $0x420] ss:$8 sps:$4 sm:$0xff]  }
 0x24f   : > { %2467 = vmatprep.subr.bf16.mxu0 %v8915_v59  ;;  %v8996_v59 = vld [vmem:[%s11650_s4 + $0x414] ss:$8 sps:$4 sm:$0xff]  }
 0x250   : > { %2427 = vmatpush2.bf16.msra.mxu1 %v8910_v36  ;;  %v8991_v36 = vld [vmem:[#allocation13 + $0x40] ss:$16 sps:$4 sm:$0xff]  }
 0x251   : > { %2428 = vmatprep.subr.bf16.mxu1 %v8918_v37  ;;  %v8999_v37 = vld [vmem:[#allocation13 + $0x24] ss:$16 sps:$4 sm:$0xff]  }
 0x252   : > { %2468 = vmatpush2.bf16.msra.mxu0 %v8913_v11  ;;  %v8994_v11 = vld [vmem:[%s11650_s4 + $0x410] ss:$8 sps:$4 sm:$0xff]  }
 0x253   : > { %2469 = vmatprep.subr.bf16.mxu0 %v8921_v18  ;;  %v9002_v18 = vld [vmem:[%s11650_s4 + $0x404] ss:$8 sps:$4 sm:$0xff]  }
 0x254   : > { %2429 = vmatpush2.bf16.msra.mxu1 %v8916_v38  ;;  %v8997_v38 = vld [vmem:[#allocation13 + $0x20] ss:$16 sps:$4 sm:$0xff]  }
 0x255   : > { %2430 = vmatprep.subr.bf16.mxu1 %v8924_v9  ;;  %v9005_v9 = vld [vmem:[#allocation13 + $0x4] ss:$16 sps:$4 sm:$0xff]  }
 0x256   : > { %2470 = vmatpush2.bf16.msra.mxu0 %v8919_v39  ;;  %v9000_v39 = vld [vmem:[%s11650_s4 + $0x400] ss:$8 sps:$4 sm:$0xff]  }
 0x257   : > { %2471 = vmatprep.subr.bf16.mxu0 %v8927_v40  ;;  %v9008_v40 = vld [vmem:[#allocation13 + $0x2e4] ss:$16 sps:$4 sm:$0xff]  }
 0x258   : > { %2431 = vmatpush2.bf16.msra.mxu1 %v8922_v41  ;;  %v9003_v41 = vld [vmem:[#allocation13] ss:$16 sps:$4 sm:$0xff]  }
 0x259   : > { %2432 = vmatprep.subr.bf16.mxu1 %v8930_v42  ;;  %v7684_v42 = vld.sshfl [vmem:[#allocation3 + $0x8] sm:$0x1 pattern:$0x75316420] }
 0x25a   : > { %2472 = vmatpush2.bf16.msra.mxu0 %v8925_v43  ;;  %v9011_v43 = vld [vmem:[#allocation13 + $0x1e4] ss:$16 sps:$4 sm:$0xff]  }
 0x25b   : > { %2473 = vmatprep.subr.bf16.mxu0 %v8933_v44  ;;  %v9006_v44 = vld [vmem:[#allocation13 + $0x2e0] ss:$16 sps:$4 sm:$0xff]  }
 0x25c   : > { %2433 = vmatpush2.bf16.msra.mxu1 %v8928_v20  ;;  %v11270_v20 = vcombine.high %v11225_v12, %v11225_v12 }
 0x25d   : > { %2434 = vmatprep.subr.bf16.mxu1 %v8936_v26  ;;  %v1598_v26 = vrot.slane %v7684_v42, %v10997_v23  ;;  %v9081_v42 = vld [vmem:[#allocation13 + $0x460] ss:$16 sps:$4 sm:$0xff]  }
 0x25e   : > { %2474 = vmatpush2.bf16.msra.mxu0 %v8931_v31  ;;  %v9014_v31 = vld [vmem:[#allocation13 + $0x2c4] ss:$16 sps:$4 sm:$0xff]  }
 0x25f   : > { %2475 = vmatprep.subr.bf16.mxu0 %v8939_v45  ;;  %v9009_v45 = vld [vmem:[#allocation13 + $0x1e0] ss:$16 sps:$4 sm:$0xff]  }
 0x260   : > { %2435 = vmatpush2.bf16.msra.mxu1 %v8934_v46  ;;  %v9017_v46 = vld [vmem:[#allocation13 + $0x1c4] ss:$16 sps:$4 sm:$0xff]  }
 0x261   : > { %2436 = vmatprep.subr.bf16.mxu1 %v8942_v47  ;;  %v9012_v47 = vld [vmem:[#allocation13 + $0x2c0] ss:$16 sps:$4 sm:$0xff]  }
 0x262   : > { %2476 = vmatpush2.bf16.msra.mxu0 %v8937_v48  ;;  %v9020_v48 = vld [vmem:[#allocation13 + $0x2a4] ss:$16 sps:$4 sm:$0xff]  }
 0x263   : > { %2477 = vmatprep.subr.bf16.mxu0 %v8945_v51  ;;  %v9015_v51 = vld [vmem:[#allocation13 + $0x1c0] ss:$16 sps:$4 sm:$0xff]  }
 0x264   : > { %2437 = vmatpush2.bf16.msra.mxu1 %v8940_v52  ;;  %v9023_v52 = vld [vmem:[#allocation13 + $0x1a4] ss:$16 sps:$4 sm:$0xff]  }
 0x265   : > { %2438 = vmatprep.subr.bf16.mxu1 %v8948_v53  ;;  %v9018_v53 = vld [vmem:[#allocation13 + $0x2a0] ss:$16 sps:$4 sm:$0xff]  }
 0x266   : > { %2478 = vmatpush2.bf16.msra.mxu0 %v8943_v7  ;;  %v9026_v7 = vld [vmem:[#allocation13 + $0x284] ss:$16 sps:$4 sm:$0xff]  }
 0x267   : > { %2479 = vmatprep.subr.bf16.mxu0 %v8951_v54  ;;  %v9021_v54 = vld [vmem:[#allocation13 + $0x1a0] ss:$16 sps:$4 sm:$0xff]  }
 0x268   : > { %2439 = vmatpush2.bf16.msra.mxu1 %v8946_v56  ;;  %v9029_v56 = vld [vmem:[#allocation13 + $0x184] ss:$16 sps:$4 sm:$0xff]  }
 0x269   : > { %2440 = vmatprep.subr.bf16.mxu1 %v8954_v57  ;;  %v9024_v57 = vld [vmem:[#allocation13 + $0x280] ss:$16 sps:$4 sm:$0xff]  }
 0x26a   : > { %2480 = vmatpush2.bf16.msra.mxu0 %v8949_v6  ;;  %v9032_v6 = vld [vmem:[#allocation13 + $0x264] ss:$16 sps:$4 sm:$0xff]  }
 0x26b   : > { %2481 = vmatprep.subr.bf16.mxu0 %v8957_v60  ;;  %v9027_v60 = vld [vmem:[#allocation13 + $0x180] ss:$16 sps:$4 sm:$0xff]  }
 0x26c   : > { %2441 = vmatpush2.bf16.msra.mxu1 %v8952_v61  ;;  %v9035_v61 = vld [vmem:[#allocation13 + $0x164] ss:$16 sps:$4 sm:$0xff]  }
 0x26d   : > { %2492 = vmatprep.subr.bf16.mxu1 %v8960_v62  ;;  %v9030_v62 = vld [vmem:[#allocation13 + $0x260] ss:$16 sps:$4 sm:$0xff]  }
 0x26e   : > { %2482 = vmatpush2.bf16.msra.mxu0 %v8955_v63  ;;  %v9038_v63 = vld [vmem:[#allocation13 + $0x244] ss:$16 sps:$4 sm:$0xff]  }
 0x26f   : > { %2443 = vmatmul.mubr.bf16.vlgmr.msra.gmra.mxu1 %v1566_v1  ;;  %6195 = vmatprep.subr.bf16.mxu0 %v8963_v2  ;;  %v9041_v1 = vld [vmem:[#allocation13 + $0x144] ss:$16 sps:$4 sm:$0xff]   ;;  %v9036_v2 = vld [vmem:[#allocation13 + $0x240] ss:$16 sps:$4 sm:$0xff]  }
 0x270   : > { %2493 = vmatpush1.bf16.msra.mxu1 %v8958_v5  ;;  %2524 = vmatprep.mubr.bf16.mxu1 %v10216_v4  ;;  %v8978_v4 = vld [vmem:[%s11650_s4 + $0x444] ss:$8 sps:$4 sm:$0xff]  }
 0x271   : > { %2484 = vmatmul.mubr.bf16.vlgmr.msra.gmra.mxu0 %v1582_v13  ;;  %2494 = vmatprep.subr.bf16.mxu1 %v8966_v8  ;;  %v9044_v5 = vld [vmem:[#allocation13 + $0x224] ss:$16 sps:$4 sm:$0xff]   ;;  %v9039_v8 = vld [vmem:[#allocation13 + $0x140] ss:$16 sps:$4 sm:$0xff]  }
 0x272   : > { %6196 = vmatpush1.bf16.msra.mxu0 %v8961_v10  ;;  %6227 = vmatprep.mubr.bf16.mxu0 %v11225_v12  ;;  %v3177_v10 = vcombine.high %v11187_v55, %v11187_v55  ;;  %v9047_v13 = vld [vmem:[#allocation13 + $0x124] ss:$16 sps:$4 sm:$0xff]  }
 0x273   : > { %6197 = vmatprep.subr.bf16.mxu0 %v8969_v49  ;;  %v9042_v49 = vld [vmem:[#allocation13 + $0x220] ss:$16 sps:$4 sm:$0xff]  }
 0x274   : > { %2495 = vmatpush1.bf16.msra.mxu1 %v8964_v14  ;;  %v9050_v14 = vld [vmem:[#allocation13 + $0x204] ss:$16 sps:$4 sm:$0xff]  }
 0x275   : > { %2496 = vmatprep.subr.bf16.mxu1 %v8972_v15  ;;  %v9045_v15 = vld [vmem:[#allocation13 + $0x120] ss:$16 sps:$4 sm:$0xff]  }
 0x276   : > { %6198 = vmatpush1.bf16.msra.mxu0 %v8967_v16  ;;  %v11277_v16 = vrot.slane %v3177_v10, %v10997_v23  ;;  %v9117_v10 = vld [vmem:[#allocation13 + $0x5a0] ss:$16 sps:$4 sm:$0xff]  }
 0x277   : > { %6199 = vmatprep.subr.bf16.mxu0 %v8975_v19  ;;  %v9053_v19 = vld [vmem:[#allocation13 + $0x104] ss:$16 sps:$4 sm:$0xff]  }
 0x278   : > { %2497 = vmatpush1.bf16.msra.mxu1 %v8970_v34  ;;  %v9048_v34 = vld [vmem:[#allocation13 + $0x200] ss:$16 sps:$4 sm:$0xff]   ;;  %v3193_v55 = vcombine.high %v11277_v16, %v11277_v16 }
 0x279   : > { %2498 = vmatprep.subr.bf16.mxu1 %v8978_v4  ;;  %v9056_v4 = vld [vmem:[#allocation13 + $0x3e4] ss:$16 sps:$4 sm:$0xff]  }
 0x27a   : > { %6200 = vmatpush1.bf16.msra.mxu0 %v8973_v21  ;;  %v9051_v21 = vld [vmem:[#allocation13 + $0x100] ss:$16 sps:$4 sm:$0xff]  }
 0x27b   : > { %6201 = vmatprep.subr.bf16.mxu0 %v8981_v22  ;;  %v9059_v22 = vld [vmem:[#allocation13 + $0x4e4] ss:$16 sps:$4 sm:$0xff]  }
 0x27c   : > { %2499 = vmatpush1.bf16.msra.mxu1 %v8976_v24  ;;  %v9054_v24 = vld [vmem:[#allocation13 + $0x3e0] ss:$16 sps:$4 sm:$0xff]  }
 0x27d   : > { %2500 = vmatprep.subr.bf16.mxu1 %v8984_v25  ;;  %v11283_v25 = vrot.slane %v11200_v58, %v10997_v23  ;;  %v9071_v58 = vld [vmem:[#allocation13 + $0x4a4] ss:$16 sps:$4 sm:$0xff]  }
 0x27e   : > { %6202 = vmatpush1.bf16.msra.mxu0 %v8979_v27  ;;  %v9062_v27 = vld [vmem:[#allocation13 + $0x3c4] ss:$16 sps:$4 sm:$0xff]  }
 0x27f   : > { %6203 = vmatprep.subr.bf16.mxu0 %v8987_v28  ;;  %v9057_v28 = vld [vmem:[#allocation13 + $0x4e0] ss:$16 sps:$4 sm:$0xff]  }
 0x280   : > { %2501 = vmatpush1.bf16.msra.mxu1 %v8982_v29  ;;  %v11286_v29 = vrot.slane %v3193_v55, %v10997_v23  ;;  %v9137_v55 = vld [vmem:[#allocation13 + $0x544] ss:$16 sps:$4 sm:$0xff]  }
 0x281   : > { %2502 = vmatprep.subr.bf16.mxu1 %v8990_v30  ;;  %v9065_v30 = vld [vmem:[#allocation13 + $0x4c4] ss:$16 sps:$4 sm:$0xff]  }
 0x282   : > { %6204 = vmatpush1.bf16.msra.mxu0 %v8985_v32  ;;  %v9060_v32 = vld [vmem:[#allocation13 + $0x3c0] ss:$16 sps:$4 sm:$0xff]  }
 0x283   : > { %6205 = vmatprep.subr.bf16.mxu0 %v8993_v33  ;;  %v9068_v33 = vld [vmem:[#allocation13 + $0x3a4] ss:$16 sps:$4 sm:$0xff]  }
 0x284   : > { %2503 = vmatpush1.bf16.msra.mxu1 %v8988_v35  ;;  %v9063_v35 = vld [vmem:[#allocation13 + $0x4c0] ss:$16 sps:$4 sm:$0xff]  }
 0x285   : > { %2504 = vmatprep.subr.bf16.mxu1 %v8996_v59  ;;  %v9066_v59 = vld [vmem:[#allocation13 + $0x3a0] ss:$16 sps:$4 sm:$0xff]  }
 0x286   : > { %6206 = vmatpush1.bf16.msra.mxu0 %v8991_v36  ;;  %v9074_v36 = vld [vmem:[#allocation13 + $0x384] ss:$16 sps:$4 sm:$0xff]  }
 0x287   : > { %6207 = vmatprep.subr.bf16.mxu0 %v8999_v37  ;;  %v9069_v37 = vld [vmem:[#allocation13 + $0x4a0] ss:$16 sps:$4 sm:$0xff]  }
 0x288   : > { %2505 = vmatpush1.bf16.msra.mxu1 %v8994_v11  ;;  %v9077_v11 = vld [vmem:[#allocation13 + $0x484] ss:$16 sps:$4 sm:$0xff]  }
 0x289   : > { %2506 = vmatprep.subr.bf16.mxu1 %v9002_v18  ;;  %v9072_v18 = vld [vmem:[#allocation13 + $0x380] ss:$16 sps:$4 sm:$0xff]  }
 0x28a   : > { %6208 = vmatpush1.bf16.msra.mxu0 %v8997_v38  ;;  %v9080_v38 = vld [vmem:[#allocation13 + $0x364] ss:$16 sps:$4 sm:$0xff]  }
 0x28b   : > { %6209 = vmatprep.subr.bf16.mxu0 %v9005_v9  ;;  %v9075_v9 = vld [vmem:[#allocation13 + $0x480] ss:$16 sps:$4 sm:$0xff]  }
 0x28c   : > { %2507 = vmatpush1.bf16.msra.mxu1 %v9000_v39  ;;  %v9083_v39 = vld [vmem:[#allocation13 + $0x464] ss:$16 sps:$4 sm:$0xff]  }
 0x28d   : > { %6236 = vmatprep.subr.bf16.mxu1 %v9008_v40  ;;  %v9078_v40 = vld [vmem:[#allocation13 + $0x360] ss:$16 sps:$4 sm:$0xff]  }
 0x28e   : > { %6210 = vmatpush1.bf16.msra.mxu0 %v9003_v41  ;;  %v9086_v41 = vld [vmem:[#allocation13 + $0x344] ss:$16 sps:$4 sm:$0xff]  }
 0x28f   : > { %2525 = vmatmul.mubr.bf16.vlgmr.msra.gmra.mxu1 %v1598_v26  ;;  %6211 = vmatprep.subr.bf16.mxu0 %v9011_v43  ;;  %v9089_v43 = vld [vmem:[#allocation13 + $0x444] ss:$16 sps:$4 sm:$0xff]  }
 0x290   : > { %6237 = vmatpush1.bf16.msra.mxu1 %v9006_v44  ;;  %6268 = vmatprep.mubr.bf16.mxu1 %v11270_v20  ;;  %v9084_v44 = vld [vmem:[#allocation13 + $0x340] ss:$16 sps:$4 sm:$0xff]   ;;  %v9092_v26 = vld [vmem:[#allocation13 + $0x324] ss:$16 sps:$4 sm:$0xff]  }
 0x291   : > { %6238 = vmatprep.subr.bf16.mxu1 %v9014_v31  ;;  %v9087_v31 = vld [vmem:[#allocation13 + $0x440] ss:$16 sps:$4 sm:$0xff]  }
 0x292   : > { %6212 = vmatpush2.bf16.msra.mxu0 %v9009_v45  ;;  %v9095_v45 = vld [vmem:[#allocation13 + $0x424] ss:$16 sps:$4 sm:$0xff]  }
 0x293   : > { %6213 = vmatprep.subr.bf16.mxu0 %v9017_v46  ;;  %v9090_v46 = vld [vmem:[#allocation13 + $0x320] ss:$16 sps:$4 sm:$0xff]  }
 0x294   : > { %6239 = vmatpush1.bf16.msra.mxu1 %v9012_v47  ;;  %v9098_v47 = vld [vmem:[#allocation13 + $0x304] ss:$16 sps:$4 sm:$0xff]  }
 0x295   : > { %6240 = vmatprep.subr.bf16.mxu1 %v9020_v48  ;;  %v9093_v48 = vld [vmem:[#allocation13 + $0x420] ss:$16 sps:$4 sm:$0xff]  }
 0x296   : > { %6214 = vmatpush2.bf16.msra.mxu0 %v9015_v51  ;;  %v9101_v51 = vld [vmem:[#allocation13 + $0x404] ss:$16 sps:$4 sm:$0xff]  }
 0x297   : > { %6215 = vmatprep.subr.bf16.mxu0 %v9023_v52  ;;  %v9096_v52 = vld [vmem:[#allocation13 + $0x300] ss:$16 sps:$4 sm:$0xff]  }
 0x298   : > { %6241 = vmatpush1.bf16.msra.mxu1 %v9018_v53  ;;  %v9104_v53 = vld [vmem:[#allocation13 + $0x6e4] ss:$16 sps:$4 sm:$0xff]  }
 0x299   : > { %6242 = vmatprep.subr.bf16.mxu1 %v9026_v7  ;;  %v9099_v7 = vld [vmem:[#allocation13 + $0x400] ss:$16 sps:$4 sm:$0xff]  }
 0x29a   : > { %6216 = vmatpush2.bf16.msra.mxu0 %v9021_v54  ;;  %v11292_v54 = vcombine.high %v11283_v25, %v11283_v25 }
 0x29b   : > { %6217 = vmatprep.subr.bf16.mxu0 %v9029_v56  ;;  %v9107_v56 = vld [vmem:[#allocation13 + $0x5e4] ss:$16 sps:$4 sm:$0xff]  }
 0x29c   : > { %6243 = vmatpush1.bf16.msra.mxu1 %v9024_v57  ;;  %v9102_v57 = vld [vmem:[#allocation13 + $0x6e0] ss:$16 sps:$4 sm:$0xff]  }
 0x29d   : > { %6244 = vmatprep.subr.bf16.mxu1 %v9032_v6  ;;  %v11296_v6 = vcombine.high %v11286_v29, %v11286_v29 }
 0x29e   : > { %6218 = vmatpush2.bf16.msra.mxu0 %v9027_v60  ;;  %v9110_v60 = vld [vmem:[#allocation13 + $0x6c4] ss:$16 sps:$4 sm:$0xff]  }
 0x29f   : > { %6219 = vmatprep.subr.bf16.mxu0 %v9035_v61  ;;  %v9105_v61 = vld [vmem:[#allocation13 + $0x5e0] ss:$16 sps:$4 sm:$0xff]  }
 0x2a0   : > { %6245 = vmatpush1.bf16.msra.mxu1 %v9030_v62  ;;  %v9113_v62 = vld [vmem:[#allocation13 + $0x5c4] ss:$16 sps:$4 sm:$0xff]  }
 0x2a1   : > { %6246 = vmatprep.subr.bf16.mxu1 %v9038_v63  ;;  %v9108_v63 = vld [vmem:[#allocation13 + $0x6c0] ss:$16 sps:$4 sm:$0xff]  }
 0x2a2   : > { %6220 = vmatpush2.bf16.msra.mxu0 %v9033_v0  ;;  %v9116_v0 = vld [vmem:[#allocation13 + $0x6a4] ss:$16 sps:$4 sm:$0xff]  }
 0x2a3   : > { %6221 = vmatprep.subr.bf16.mxu0 %v9041_v1  ;;  %v9111_v1 = vld [vmem:[#allocation13 + $0x5c0] ss:$16 sps:$4 sm:$0xff]  }
 0x2a4   : > { %6247 = vmatpush1.bf16.msra.mxu1 %v9036_v2  ;;  %v9119_v2 = vld [vmem:[#allocation13 + $0x5a4] ss:$16 sps:$4 sm:$0xff]  }
 0x2a5   : > { %6248 = vmatprep.subr.bf16.mxu1 %v9044_v5  ;;  %v9114_v5 = vld [vmem:[#allocation13 + $0x6a0] ss:$16 sps:$4 sm:$0xff]  }
 0x2a6   : > { %6222 = vmatpush2.bf16.msra.mxu0 %v9039_v8  ;;  %v9122_v8 = vld [vmem:[#allocation13 + $0x684] ss:$16 sps:$4 sm:$0xff]  }
 0x2a7   : > { %6223 = vmatprep.subr.bf16.mxu0 %v9047_v13  ;;  %v9125_v13 = vld [vmem:[#allocation13 + $0x584] ss:$16 sps:$4 sm:$0xff]  }
 0x2a8   : > { %6249 = vmatpush1.bf16.msra.mxu1 %v9042_v49  ;;  %v9120_v49 = vld [vmem:[#allocation13 + $0x680] ss:$16 sps:$4 sm:$0xff]  }
 0x2a9   : > { %6250 = vmatprep.subr.bf16.mxu1 %v9050_v14  ;;  %v9128_v14 = vld [vmem:[#allocation13 + $0x664] ss:$16 sps:$4 sm:$0xff]  }
 0x2aa   : > { %6224 = vmatpush2.bf16.msra.mxu0 %v9045_v15  ;;  %v9123_v15 = vld [vmem:[#allocation13 + $0x580] ss:$16 sps:$4 sm:$0xff]  }
 0x2ab   : > { %6225 = vmatprep.subr.bf16.mxu0 %v9053_v19  ;;  %v9131_v19 = vld [vmem:[#allocation13 + $0x564] ss:$16 sps:$4 sm:$0xff]  }
 0x2ac   : > { %6251 = vmatpush1.bf16.msra.mxu1 %v9048_v34  ;;  %v9126_v34 = vld [vmem:[#allocation13 + $0x660] ss:$16 sps:$4 sm:$0xff]  }
 0x2ad   : > { %6252 = vmatprep.subr.bf16.mxu1 %v9056_v4  ;;  %v9134_v4 = vld [vmem:[#allocation13 + $0x644] ss:$16 sps:$4 sm:$0xff]  }
 0x2ae   : > { %6226 = vmatpush2.bf16.msra.mxu0 %v9051_v21  ;;  %v9129_v21 = vld [vmem:[#allocation13 + $0x560] ss:$16 sps:$4 sm:$0xff]  }
 0x2af   : > { %6277 = vmatprep.subr.bf16.mxu0 %v9059_v22  ;;  %v9132_v22 = vld [vmem:[#allocation13 + $0x640] ss:$16 sps:$4 sm:$0xff]  }
 0x2b0   : > { %6253 = vmatpush2.bf16.msra.mxu1 %v9054_v24  ;;  %v9140_v24 = vld [vmem:[#allocation13 + $0x624] ss:$16 sps:$4 sm:$0xff]  }
 0x2b1   : > { %6228 = vmatmul.mubr.bf16.vlgmr.msra.gmra.mxu0 %v11283_v25  ;;  %6254 = vmatprep.subr.bf16.mxu1 %v9062_v27  ;;  %v9135_v27 = vld [vmem:[#allocation13 + $0x540] ss:$16 sps:$4 sm:$0xff]  }
 0x2b2   : > { %6278 = vmatpush1.bf16.msra.mxu0 %v9057_v28  ;;  %6309 = vmatprep.mubr.bf16.mxu0 %v11286_v29  ;;  %v9143_v28 = vld [vmem:[#allocation13 + $0x524] ss:$16 sps:$4 sm:$0xff]  }
 0x2b3   : > { %6279 = vmatprep.subr.bf16.mxu0 %v9065_v30  ;;  %v9138_v30 = vld [vmem:[#allocation13 + $0x620] ss:$16 sps:$4 sm:$0xff]  }
 0x2b4   : > { %6255 = vmatpush2.bf16.msra.mxu1 %v9060_v32  ;;  %v9146_v32 = vld [vmem:[#allocation13 + $0x604] ss:$16 sps:$4 sm:$0xff]  }
 0x2b5   : > { %6256 = vmatprep.subr.bf16.mxu1 %v9068_v33  ;;  %v9141_v33 = vld [vmem:[#allocation13 + $0x520] ss:$16 sps:$4 sm:$0xff]  }
 0x2b6   : > { %6280 = vmatpush1.bf16.msra.mxu0 %v9063_v35  ;;  %v9149_v35 = vld [vmem:[#allocation13 + $0x504] ss:$16 sps:$4 sm:$0xff]  }
 0x2b7   : > { %6281 = vmatprep.subr.bf16.mxu0 %v9071_v58  ;;  %v9144_v58 = vld [vmem:[#allocation13 + $0x600] ss:$16 sps:$4 sm:$0xff]  }
 0x2b8   : > { %6257 = vmatpush2.bf16.msra.mxu1 %v9066_v59  ;;  %v9152_v59 = vld [vmem:[#allocation13 + $0x7e4] ss:$16 sps:$4 sm:$0xff]  }
 0x2b9   : > { %6258 = vmatprep.subr.bf16.mxu1 %v9074_v36  ;;  %v9147_v36 = vld [vmem:[#allocation13 + $0x500] ss:$16 sps:$4 sm:$0xff]  }
 0x2ba   : > { %6282 = vmatpush1.bf16.msra.mxu0 %v9069_v37  ;;  %v9177_v37 = vld [vmem:[#allocation13 + $0x8e4] ss:$16 sps:$4 sm:$0xff]  }
 0x2bb   : > { %6283 = vmatprep.subr.bf16.mxu0 %v9077_v11  ;;  %v9150_v11 = vld [vmem:[#allocation13 + $0x7e0] ss:$16 sps:$4 sm:$0xff]  }
 0x2bc   : > { %6259 = vmatpush2.bf16.msra.mxu1 %v9072_v18  ;;  %v11302_v18 = vrot.slane %v11277_v16, %v10997_v23 }
 0x2bd   : > { %6260 = vmatprep.subr.bf16.mxu1 %v9080_v38  ;;  %v9156_v38 = vld [vmem:[#allocation13 + $0x7c4] ss:$16 sps:$4 sm:$0xff]  }
 0x2be   : > { %6284 = vmatpush1.bf16.msra.mxu0 %v9075_v9  ;;  %v9175_v9 = vld [vmem:[#allocation13 + $0x8e0] ss:$16 sps:$4 sm:$0xff]  }
 0x2bf   : > { %6285 = vmatprep.subr.bf16.mxu0 %v9083_v39 }
 0x2c0   : > { %6261 = vmatpush2.bf16.msra.mxu1 %v9078_v40  ;;  %v9183_v40 = vld [vmem:[#allocation13 + $0x8c4] ss:$16 sps:$4 sm:$0xff]  }
 0x2c1   : > { %6262 = vmatprep.subr.bf16.mxu1 %v9086_v41  ;;  %v9154_v41 = vld [vmem:[#allocation13 + $0x7c0] ss:$16 sps:$4 sm:$0xff]  }
 0x2c2   : > { %6286 = vmatpush1.bf16.msra.mxu0 %v9081_v42 }
 0x2c3   : > { %6287 = vmatprep.subr.bf16.mxu0 %v9089_v43 }
 0x2c4   : > { %6263 = vmatpush2.bf16.msra.mxu1 %v9084_v44  ;;  %v9159_v44 = vld [vmem:[#allocation13 + $0x7a4] ss:$16 sps:$4 sm:$0xff]  }
 0x2c5   : > { %6264 = vmatprep.subr.bf16.mxu1 %v9092_v26 }
 0x2c6   : > { %6288 = vmatpush1.bf16.msra.mxu0 %v9087_v31  ;;  %v9181_v31 = vld [vmem:[#allocation13 + $0x8c0] ss:$16 sps:$4 sm:$0xff]  }
 0x2c7   : > { %6289 = vmatprep.subr.bf16.mxu0 %v9095_v45 }
 0x2c8   : > { %6265 = vmatpush2.bf16.msra.mxu1 %v9090_v46  ;;  %v9189_v46 = vld [vmem:[#allocation13 + $0x8a4] ss:$16 sps:$4 sm:$0xff]  }
 0x2c9   : > { %6266 = vmatprep.subr.bf16.mxu1 %v9098_v47 }
 0x2ca   : > { %6290 = vmatpush1.bf16.msra.mxu0 %v9093_v48  ;;  %v9157_v48 = vld [vmem:[#allocation13 + $0x7a0] ss:$16 sps:$4 sm:$0xff]  }
 0x2cb   : > { %6291 = vmatprep.subr.bf16.mxu0 %v9101_v51 }
 0x2cc   : > { %6267 = vmatpush2.bf16.msra.mxu1 %v9096_v52 }
 0x2cd   : > { %6318 = vmatprep.subr.bf16.mxu1 %v9104_v53  ;;  %v9162_v53 = vld [vmem:[#allocation13 + $0x784] ss:$16 sps:$4 sm:$0xff]  }
 0x2ce   : > { %6292 = vmatpush1.bf16.msra.mxu0 %v9099_v7  ;;  %v9187_v7 = vld [vmem:[#allocation13 + $0x8a0] ss:$16 sps:$4 sm:$0xff]  }
 0x2cf   : > { %6269 = vmatmul.mubr.bf16.vlgmr.msra.gmra.mxu1 %v11292_v54  ;;  %6293 = vmatprep.subr.bf16.mxu0 %v9107_v56 }
 0x2d0   : > { %6319 = vmatpush1.bf16.msra.mxu1 %v9102_v57  ;;  %6350 = vmatprep.mubr.bf16.mxu1 %v11296_v6  ;;  %v9195_v57 = vld [vmem:[#allocation13 + $0x884] ss:$16 sps:$4 sm:$0xff]  }
 0x2d1   : > { %6320 = vmatprep.subr.bf16.mxu1 %v9110_v60  ;;  %v9160_v60 = vld [vmem:[#allocation13 + $0x780] ss:$16 sps:$4 sm:$0xff]  }
 0x2d2   : > { %6294 = vmatpush2.bf16.msra.mxu0 %v9105_v61  ;;  %v9165_v61 = vld [vmem:[#allocation13 + $0x764] ss:$16 sps:$4 sm:$0xff]  }
 0x2d3   : > { %6295 = vmatprep.subr.bf16.mxu0 %v9113_v62  ;;  %v9193_v62 = vld [vmem:[#allocation13 + $0x880] ss:$16 sps:$4 sm:$0xff]  }
 0x2d4   : > { %6321 = vmatpush1.bf16.msra.mxu1 %v9108_v63  ;;  %v9201_v63 = vld [vmem:[#allocation13 + $0x864] ss:$16 sps:$4 sm:$0xff]  }
 0x2d5   : > { %6322 = vmatprep.subr.bf16.mxu1 %v9116_v0  ;;  %v9163_v0 = vld [vmem:[#allocation13 + $0x760] ss:$16 sps:$4 sm:$0xff]  }
 0x2d6   : > { %6296 = vmatpush2.bf16.msra.mxu0 %v9111_v1  ;;  %v9168_v1 = vld [vmem:[#allocation13 + $0x744] ss:$16 sps:$4 sm:$0xff]  }
 0x2d7   : > { %6297 = vmatprep.subr.bf16.mxu0 %v9119_v2  ;;  %v9199_v2 = vld [vmem:[#allocation13 + $0x860] ss:$16 sps:$4 sm:$0xff]  }
 0x2d8   : > { %6323 = vmatpush1.bf16.msra.mxu1 %v9114_v5  ;;  %v9207_v5 = vld [vmem:[#allocation13 + $0x844] ss:$16 sps:$4 sm:$0xff]  }
 0x2d9   : > { %6324 = vmatprep.subr.bf16.mxu1 %v9122_v8  ;;  %v9166_v8 = vld [vmem:[#allocation13 + $0x740] ss:$16 sps:$4 sm:$0xff]  }
 0x2da   : > { %6298 = vmatpush2.bf16.msra.mxu0 %v9117_v10  ;;  %v9171_v10 = vld [vmem:[#allocation13 + $0x724] ss:$16 sps:$4 sm:$0xff]  }
 0x2db   : > { %6299 = vmatprep.subr.bf16.mxu0 %v9125_v13  ;;  %v9205_v13 = vld [vmem:[#allocation13 + $0x840] ss:$16 sps:$4 sm:$0xff]  }
 0x2dc   : > { %6325 = vmatpush1.bf16.msra.mxu1 %v9120_v49  ;;  %v9213_v49 = vld [vmem:[#allocation13 + $0x824] ss:$16 sps:$4 sm:$0xff]  }
 0x2dd   : > { %6326 = vmatprep.subr.bf16.mxu1 %v9128_v14  ;;  %v9169_v14 = vld [vmem:[#allocation13 + $0x720] ss:$16 sps:$4 sm:$0xff]  }
 0x2de   : > { %6300 = vmatpush2.bf16.msra.mxu0 %v9123_v15  ;;  %v9174_v15 = vld [vmem:[#allocation13 + $0x704] ss:$16 sps:$4 sm:$0xff]  }
 0x2df   : > { %6301 = vmatprep.subr.bf16.mxu0 %v9131_v19  ;;  %v9211_v19 = vld [vmem:[#allocation13 + $0x820] ss:$16 sps:$4 sm:$0xff]  }
 0x2e0   : > { %6327 = vmatpush1.bf16.msra.mxu1 %v9126_v34  ;;  %v9219_v34 = vld [vmem:[#allocation13 + $0x804] ss:$16 sps:$4 sm:$0xff]  }
 0x2e1   : > { %6328 = vmatprep.subr.bf16.mxu1 %v9134_v4  ;;  %v9172_v4 = vld [vmem:[#allocation13 + $0x700] ss:$16 sps:$4 sm:$0xff]  }
 0x2e2   : > { %6302 = vmatpush2.bf16.msra.mxu0 %v9129_v21  ;;  %v9180_v21 = vld [vmem:[#allocation13 + $0xae4] ss:$16 sps:$4 sm:$0xff]  }
 0x2e3   : > { %6303 = vmatprep.subr.bf16.mxu0 %v9137_v55  ;;  %v9217_v55 = vld [vmem:[#allocation13 + $0x800] ss:$16 sps:$4 sm:$0xff]  }
 0x2e4   : > { %6329 = vmatpush1.bf16.msra.mxu1 %v9132_v22  ;;  %v11311_v22 = vcombine.high %v11302_v18, %v11302_v18 }
 0x2e5   : > { %6330 = vmatprep.subr.bf16.mxu1 %v9140_v24  ;;  %v9225_v24 = vld [vmem:[#allocation13 + $0x9e4] ss:$16 sps:$4 sm:$0xff]  }
 0x2e6   : > { %6304 = vmatpush2.bf16.msra.mxu0 %v9135_v27  ;;  %v9178_v27 = vld [vmem:[#allocation13 + $0xae0] ss:$16 sps:$4 sm:$0xff]  }
 0x2e7   : > { %6305 = vmatprep.subr.bf16.mxu0 %v9143_v28  ;;  %v9186_v28 = vld [vmem:[#allocation13 + $0xac4] ss:$16 sps:$4 sm:$0xff]  }
 0x2e8   : > { %6331 = vmatpush1.bf16.msra.mxu1 %v9138_v30  ;;  %v9223_v30 = vld [vmem:[#allocation13 + $0x9e0] ss:$16 sps:$4 sm:$0xff]  }
 0x2e9   : > { %6332 = vmatprep.subr.bf16.mxu1 %v9146_v32  ;;  %v9231_v32 = vld [vmem:[#allocation13 + $0x9c4] ss:$16 sps:$4 sm:$0xff]  }
 0x2ea   : > { %6306 = vmatpush2.bf16.msra.mxu0 %v9141_v33  ;;  %v9184_v33 = vld [vmem:[#allocation13 + $0xac0] ss:$16 sps:$4 sm:$0xff]  }
 0x2eb   : > { %6307 = vmatprep.subr.bf16.mxu0 %v9149_v35  ;;  %v9192_v35 = vld [vmem:[#allocation13 + $0xaa4] ss:$16 sps:$4 sm:$0xff]  }
 0x2ec   : > { %6333 = vmatpush1.bf16.msra.mxu1 %v9144_v58  ;;  %v9229_v58 = vld [vmem:[#allocation13 + $0x9c0] ss:$16 sps:$4 sm:$0xff]  }
 0x2ed   : > { %6334 = vmatprep.subr.bf16.mxu1 %v9152_v59  ;;  %v9237_v59 = vld [vmem:[#allocation13 + $0x9a4] ss:$16 sps:$4 sm:$0xff]  }
 0x2ee   : > { %6308 = vmatpush2.bf16.msra.mxu0 %v9147_v36  ;;  %v9190_v36 = vld [vmem:[#allocation13 + $0xaa0] ss:$16 sps:$4 sm:$0xff]  }
 0x2ef   : > { %v2362_v39 = vpop.f32.mrf.mxu1  ;;  %6359 = vmatprep.subr.bf16.mxu0 %v9177_v37  ;;  %v9198_v37 = vld [vmem:[#allocation13 + $0xa84] ss:$16 sps:$4 sm:$0xff]  }
 0x2f0   : > { %6335 = vmatpush2.bf16.msra.mxu1 %v9150_v11  ;;  %v9235_v11 = vld [vmem:[#allocation13 + $0x9a0] ss:$16 sps:$4 sm:$0xff]  }
 0x2f1   : > { %6310 = vmatmul.mubr.bf16.vlgmr.msra.gmra.mxu0 %v11302_v18  ;;  %v2364_v42 = vpop.f32.mrf.mxu1  ;;  %v2403_v43 = vpop.f32.mrf.mxu0  ;;  %6336 = vmatprep.subr.bf16.mxu1 %v9156_v38  ;;  %v9243_v38 = vld [vmem:[#allocation13 + $0x984] ss:$16 sps:$4 sm:$0xff]  }
 0x2f2   : > { %v11305_v26 = vadd.f32 %v2403_v43, %v2362_v39  ;;  %6360 = vmatpush1.bf16.msra.mxu0 %v9175_v9  ;;  %v9196_v9 = vld [vmem:[#allocation13 + $0xa80] ss:$16 sps:$4 sm:$0xff]   ;;  %v9204_v39 = vld [vmem:[#allocation13 + $0xa64] ss:$16 sps:$4 sm:$0xff]  }
 0x2f3   : > { %v2366_v16 = vpop.f32.mrf.mxu1  ;;  %v2405_v45 = vpop.f32.mrf.mxu0  ;;  %6361 = vmatprep.subr.bf16.mxu0 %v9183_v40  ;;  %v9241_v40 = vld [vmem:[#allocation13 + $0x980] ss:$16 sps:$4 sm:$0xff]   ;;  %v9210_v43 = vld [vmem:[#allocation13 + $0xa44] ss:$16 sps:$4 sm:$0xff]  }
 0x2f4   : > { %v11307_v47 = vadd.f32 %v2405_v45, %v2364_v42  ;;  %6337 = vmatpush2.bf16.msra.mxu1 %v9154_v41  ;;  %v9249_v41 = vld [vmem:[#allocation13 + $0x964] ss:$16 sps:$4 sm:$0xff]   ;;  %v9202_v42 = vld [vmem:[#allocation13 + $0xa60] ss:$16 sps:$4 sm:$0xff]  }
 0x2f5   : > { %v2367_v51 = vpop.f32.mrf.mxu1  ;;  %v2407_v52 = vpop.f32.mrf.mxu0  ;;  %6338 = vmatprep.subr.bf16.mxu1 %v9159_v44  ;;  %v9247_v44 = vld [vmem:[#allocation13 + $0x960] ss:$16 sps:$4 sm:$0xff]   ;;  %v9216_v45 = vld [vmem:[#allocation13 + $0xa24] ss:$16 sps:$4 sm:$0xff]  }
 0x2f6   : > { %6362 = vmatpush1.bf16.msra.mxu0 %v9181_v31  ;;  %v9255_v31 = vld [vmem:[#allocation13 + $0x944] ss:$16 sps:$4 sm:$0xff]   ;;  %v9208_v16 = vld [vmem:[#allocation13 + $0xa40] ss:$16 sps:$4 sm:$0xff]  }
 0x2f7   : > { %v2408_v56 = vpop.f32.mrf.mxu0  ;;  %6363 = vmatprep.subr.bf16.mxu0 %v9189_v46  ;;  %v9253_v46 = vld [vmem:[#allocation13 + $0x940] ss:$16 sps:$4 sm:$0xff]   ;;  %v9222_v52 = vld [vmem:[#allocation13 + $0xa04] ss:$16 sps:$4 sm:$0xff]  }
 0x2f8   : > { %6339 = vmatpush2.bf16.msra.mxu1 %v9157_v48  ;;  %v9261_v48 = vld [vmem:[#allocation13 + $0x924] ss:$16 sps:$4 sm:$0xff]   ;;  %v9214_v51 = vld [vmem:[#allocation13 + $0xa20] ss:$16 sps:$4 sm:$0xff]  }
 0x2f9   : > { %6340 = vmatprep.subr.bf16.mxu1 %v9162_v53  ;;  %v9259_v53 = vld [vmem:[#allocation13 + $0x920] ss:$16 sps:$4 sm:$0xff]  }
 0x2fa   : > { %6364 = vmatpush1.bf16.msra.mxu0 %v9187_v7  ;;  %v9267_v7 = vld [vmem:[#allocation13 + $0x904] ss:$16 sps:$4 sm:$0xff]   ;;  %v9220_v56 = vld [vmem:[#allocation13 + $0xa00] ss:$16 sps:$4 sm:$0xff]  }
 0x2fb   : > { %6365 = vmatprep.subr.bf16.mxu0 %v9195_v57  ;;  %v9228_v57 = vld [vmem:[#allocation13 + $0xbe4] ss:$16 sps:$4 sm:$0xff]  }
 0x2fc   : > { %6341 = vmatpush2.bf16.msra.mxu1 %v9160_v60  ;;  %v9265_v60 = vld [vmem:[#allocation13 + $0x900] ss:$16 sps:$4 sm:$0xff]  }
 0x2fd   : > { %6342 = vmatprep.subr.bf16.mxu1 %v9165_v61  ;;  %v9273_v61 = vld [vmem:[#allocation13 + $0xce4] ss:$16 sps:$4 sm:$0xff]  }
 0x2fe   : > { %6366 = vmatpush1.bf16.msra.mxu0 %v9193_v62  ;;  %v9226_v62 = vld [vmem:[#allocation13 + $0xbe0] ss:$16 sps:$4 sm:$0xff]  }
 0x2ff   : > { %6367 = vmatprep.subr.bf16.mxu0 %v9201_v63  ;;  %v9234_v63 = vld [vmem:[#allocation13 + $0xbc4] ss:$16 sps:$4 sm:$0xff]  }
 0x300   : > { %6343 = vmatpush2.bf16.msra.mxu1 %v9163_v0 }
 0x301   : > { %6344 = vmatprep.subr.bf16.mxu1 %v9168_v1  ;;  %v9232_v1 = vld [vmem:[#allocation13 + $0xbc0] ss:$16 sps:$4 sm:$0xff]  }
 0x302   : > { %6368 = vmatpush1.bf16.msra.mxu0 %v9199_v2 }
 0x303   : > { %6369 = vmatprep.subr.bf16.mxu0 %v9207_v5 }
 0x304   : > { %6345 = vmatpush2.bf16.msra.mxu1 %v9166_v8  ;;  %v9240_v8 = vld [vmem:[#allocation13 + $0xba4] ss:$16 sps:$4 sm:$0xff]  }
 0x305   : > { %6346 = vmatprep.subr.bf16.mxu1 %v9171_v10 }
 0x306   : > { %6370 = vmatpush1.bf16.msra.mxu0 %v9205_v13 }
 0x307   : > { %6371 = vmatprep.subr.bf16.mxu0 %v9213_v49  ;;  %v9238_v49 = vld [vmem:[#allocation13 + $0xba0] ss:$16 sps:$4 sm:$0xff]  }
 0x308   : > { %6347 = vmatpush2.bf16.msra.mxu1 %v9169_v14 }
 0x309   : > { %6348 = vmatprep.subr.bf16.mxu1 %v9174_v15 }
 0x30a   : > { %6372 = vmatpush1.bf16.msra.mxu0 %v9211_v19  ;;  %v9246_v19 = vld [vmem:[#allocation13 + $0xb84] ss:$16 sps:$4 sm:$0xff]  }
 0x30b   : > { %6373 = vmatprep.subr.bf16.mxu0 %v9219_v34 }
 0x30c   : > { %6349 = vmatpush2.bf16.msra.mxu1 %v9172_v4  ;;  %v9244_v4 = vld [vmem:[#allocation13 + $0xb80] ss:$16 sps:$4 sm:$0xff]  }
 0x30d   : > { %6400 = vmatprep.subr.bf16.mxu1 %v9180_v21  ;;  %v9252_v21 = vld [vmem:[#allocation13 + $0xb64] ss:$16 sps:$4 sm:$0xff]  }
 0x30e   : > { %6374 = vmatpush1.bf16.msra.mxu0 %v9217_v55  ;;  %v9250_v55 = vld [vmem:[#allocation13 + $0xb60] ss:$16 sps:$4 sm:$0xff]  }
 0x30f   : > { %6351 = vmatmul.mubr.bf16.vlgmr.msra.gmra.mxu1 %v11311_v22  ;;  %6375 = vmatprep.subr.bf16.mxu0 %v9225_v24  ;;  %v9258_v24 = vld [vmem:[#allocation13 + $0xb44] ss:$16 sps:$4 sm:$0xff]  }
 0x310   : > { %6401 = vmatpush1.bf16.msra.mxu1 %v9178_v27  ;;  %v9256_v27 = vld [vmem:[#allocation13 + $0xb40] ss:$16 sps:$4 sm:$0xff]  }
 0x311   : > { %6402 = vmatprep.subr.bf16.mxu1 %v9186_v28  ;;  %v9264_v28 = vld [vmem:[#allocation13 + $0xb24] ss:$16 sps:$4 sm:$0xff]  }
 0x312   : > { %6376 = vmatpush2.bf16.msra.mxu0 %v9223_v30  ;;  %v9262_v30 = vld [vmem:[#allocation13 + $0xb20] ss:$16 sps:$4 sm:$0xff]  }
 0x313   : > { %6377 = vmatprep.subr.bf16.mxu0 %v9231_v32  ;;  %v9270_v32 = vld [vmem:[#allocation13 + $0xb04] ss:$16 sps:$4 sm:$0xff]  }
 0x314   : > { %6403 = vmatpush1.bf16.msra.mxu1 %v9184_v33  ;;  %v9268_v33 = vld [vmem:[#allocation13 + $0xb00] ss:$16 sps:$4 sm:$0xff]  }
 0x315   : > { %6404 = vmatprep.subr.bf16.mxu1 %v9192_v35  ;;  %v9277_v35 = vld [vmem:[#allocation13 + $0xee4] ss:$16 sps:$4 sm:$0xff]  }
 0x316   : > { %6378 = vmatpush2.bf16.msra.mxu0 %v9229_v58 }
 0x317   : > { %6379 = vmatprep.subr.bf16.mxu0 %v9237_v59  ;;  %v11316_v59 = vsub.s32 0, %v10458_v3 }
 0x318   : > { %6405 = vmatpush1.bf16.msra.mxu1 %v9190_v36  ;;  %v1303_v36 = vld [vmem:[#allocation10] sm:$0x3] }
 0x319   : > { %6406 = vmatprep.subr.bf16.mxu1 %v9198_v37 }
 0x31a   : > { %6380 = vmatpush2.bf16.msra.mxu0 %v9235_v11  ;;  %v11320_v11 = vsub.s32 1, %v10458_v3 }
 0x31b   : > { %6381 = vmatprep.subr.bf16.mxu0 %v9243_v38  ;;  %v1304_v38 = vld [vmem:[#allocation11] sm:$0x3] }
 0x31c   : > { %6407 = vmatpush1.bf16.msra.mxu1 %v9196_v9 }
 0x31d   : > { %6408 = vmatprep.subr.bf16.mxu1 %v9204_v39  ;;  %v2537_v39 = vrot.slane %v1303_v36, %v11316_v59 }
 0x31e   : > { %6382 = vmatpush2.bf16.msra.mxu0 %v9241_v40 }
 0x31f   : > { %6383 = vmatprep.subr.bf16.mxu0 %v9249_v41 }
 0x320   : > { %6409 = vmatpush1.bf16.msra.mxu1 %v9202_v42 }
 0x321   : > { %6410 = vmatprep.subr.bf16.mxu1 %v9210_v43  ;;  %v2541_v43 = vrot.slane %v1303_v36, %v11320_v11  ;;  %v9287_v36 = vld [vmem:[#allocation13 + $0xea0] ss:$16 sps:$4 sm:$0xff]  }
 0x322   : > { %6384 = vmatpush2.bf16.msra.mxu0 %v9247_v44 }
 0x323   : > { %6385 = vmatprep.subr.bf16.mxu0 %v9255_v31 }
 0x324   : > { %6411 = vmatpush1.bf16.msra.mxu1 %v9208_v16 }
 0x325   : > { %6412 = vmatprep.subr.bf16.mxu1 %v9216_v45 }
 0x326   : > { %6386 = vmatpush2.bf16.msra.mxu0 %v9253_v46 }
 0x327   : > { %6387 = vmatprep.subr.bf16.mxu0 %v9261_v48 }
 0x328   : > { %6413 = vmatpush1.bf16.msra.mxu1 %v9214_v51 }
 0x329   : > { %6414 = vmatprep.subr.bf16.mxu1 %v9222_v52 }
 0x32a   : > { %6388 = vmatpush2.bf16.msra.mxu0 %v9259_v53 }
 0x32b   : > { %6389 = vmatprep.subr.bf16.mxu0 %v9267_v7 }
 0x32c   : > { %6415 = vmatpush1.bf16.msra.mxu1 %v9220_v56 }
 0x32d   : > { %6416 = vmatprep.subr.bf16.mxu1 %v9228_v57 }
 0x32e   : > { %6390 = vmatpush2.bf16.msra.mxu0 %v9265_v60  ;;  %v2592_v60 = vld [vmem:[#allocation4 + $0x8] sm:$0x3] }
 0x32f   : > { %v2444_v0 = vpop.f32.mrf.mxu1  ;;  %6441 = vmatprep.subr.bf16.mxu0 %v9273_v61 }
 0x330   : > { %6417 = vmatpush2.bf16.msra.mxu1 %v9226_v62  ;;  %v2445_v58 = vadd.f32 %v2444_v0, %v11305_v26  ;;  %v2550_v26 = vrot.slane %v1304_v38, %v11316_v59 }
 0x331   : > { %v2446_v2 = vpop.f32.mrf.mxu1  ;;  %v2485_v5 = vpop.f32.mrf.mxu0  ;;  %6418 = vmatprep.subr.bf16.mxu1 %v9234_v63 }
 0x332   : > { %v2447_v37 = vadd.f32 %v2446_v2, %v11307_v47  ;;  %v2486_v9 = vadd.f32 %v2485_v5, %v2445_v58  ;;  %v2554_v47 = vrot.slane %v1304_v38, %v11320_v11  ;;  %v9292_v58 = vld [vmem:[#allocation13 + $0xc84] ss:$16 sps:$4 sm:$0xff]  }
 0x333   : > { %v2448_v10 = vpop.f32.mrf.mxu1  ;;  %v2487_v13 = vpop.f32.mrf.mxu0  ;;  %v9295_v38 = vld [vmem:[#allocation13 + $0xe84] ss:$16 sps:$4 sm:$0xff]  }
 0x334   : > { %6419 = vmatpush2.bf16.msra.mxu1 %v9232_v1  ;;  %v2488_v41 = vadd.f32 %v2487_v13, %v2447_v37  ;;  %v9271_v13 = vld [vmem:[#allocation13 + $0xce0] ss:$16 sps:$4 sm:$0xff]  }
 0x335   : > { %v2449_v14 = vpop.f32.mrf.mxu1  ;;  %v2489_v15 = vpop.f32.mrf.mxu0  ;;  %6420 = vmatprep.subr.bf16.mxu1 %v9240_v8 }
 0x336   : > { %v9275_v15 = vld [vmem:[#allocation13 + $0xee0] ss:$16 sps:$4 sm:$0xff]  }
 0x337   : > { %v2490_v34 = vpop.f32.mrf.mxu0 }
 0x338   : > { %6421 = vmatpush2.bf16.msra.mxu1 %v9238_v49 }
 0x339   : > { %6422 = vmatprep.subr.bf16.mxu1 %v9246_v19  ;;  %v9280_v19 = vld [vmem:[#allocation13 + $0xcc4] ss:$16 sps:$4 sm:$0xff]  }
 0x33c   : > { %6423 = vmatpush2.bf16.msra.mxu1 %v9244_v4  ;;  %v9283_v4 = vld [vmem:[#allocation13 + $0xec4] ss:$16 sps:$4 sm:$0xff]  }
 0x33d   : > { %6424 = vmatprep.subr.bf16.mxu1 %v9252_v21  ;;  %v9278_v21 = vld [vmem:[#allocation13 + $0xcc0] ss:$16 sps:$4 sm:$0xff]  }
 0x340   : > { %6425 = vmatpush2.bf16.msra.mxu1 %v9250_v55 }
 0x341   : > { %6426 = vmatprep.subr.bf16.mxu1 %v9258_v24 }
 0x344   : > { %6427 = vmatpush2.bf16.msra.mxu1 %v9256_v27  ;;  %v9286_v27 = vld [vmem:[#allocation13 + $0xca4] ss:$16 sps:$4 sm:$0xff]  }
 0x345   : > { %6428 = vmatprep.subr.bf16.mxu1 %v9264_v28  ;;  %v9281_v28 = vld [vmem:[#allocation13 + $0xec0] ss:$16 sps:$4 sm:$0xff]  }
 0x348   : > { %6429 = vmatpush2.bf16.msra.mxu1 %v9262_v30 }
 0x349   : > { %6430 = vmatprep.subr.bf16.mxu1 %v9270_v32  ;;  %v9289_v32 = vld [vmem:[#allocation13 + $0xea4] ss:$16 sps:$4 sm:$0xff]  }
 0x34c   : > { %6431 = vmatpush2.bf16.msra.mxu1 %v9268_v33  ;;  %v9284_v33 = vld [vmem:[#allocation13 + $0xca0] ss:$16 sps:$4 sm:$0xff]  }
 0x34d   : > { %6482 = vmatprep.subr.bf16.mxu1 %v9277_v35 }
 0x34f   : > { %v2526_v40 = vpop.f32.mrf.mxu1 }
 0x350   : > { %v2527_v42 = vadd.f32 %v2526_v40, %v2486_v9  ;;  %v9290_v9 = vld [vmem:[#allocation13 + $0xc80] ss:$16 sps:$4 sm:$0xff]  }
 0x351   : > { %v2528_v44 = vpop.f32.mrf.mxu1  ;;  %v9293_v40 = vld [vmem:[#allocation13 + $0xe80] ss:$16 sps:$4 sm:$0xff]  }
 0x352   : > { %v2544_v31 = vmul.f32 %v2537_v39, %v2527_v42  ;;  %v2529_v16 = vadd.f32 %v2528_v44, %v2488_v41  ;;  %v9298_v39 = vld [vmem:[#allocation13 + $0xc64] ss:$16 sps:$4 sm:$0xff]   ;;  %v9296_v42 = vld [vmem:[#allocation13 + $0xc60] ss:$16 sps:$4 sm:$0xff]  }
 0x353   : > { %v2530_v45 = vpop.f32.mrf.mxu1  ;;  %v9301_v41 = vld [vmem:[#allocation13 + $0xe64] ss:$16 sps:$4 sm:$0xff]  }
 0x354   : > { %v2557_v46 = vadd.f32 %v2550_v26, %v2544_v31  ;;  %v2545_v48 = vmul.f32 %v2541_v43, %v2529_v16  ;;  %v9304_v26 = vld [vmem:[#allocation13 + $0xc44] ss:$16 sps:$4 sm:$0xff]   ;;  %v9299_v43 = vld [vmem:[#allocation13 + $0xe60] ss:$16 sps:$4 sm:$0xff]  }
 0x355   : > { %v2531_v51 = vpop.f32.mrf.mxu1  ;;  %v9307_v44 = vld [vmem:[#allocation13 + $0xe44] ss:$16 sps:$4 sm:$0xff]   ;;  %v9302_v31 = vld [vmem:[#allocation13 + $0xc40] ss:$16 sps:$4 sm:$0xff]  }
 0x356   : > { %v2558_v52 = vadd.f32 %v2554_v47, %v2545_v48  ;;  %v2559_v53 = vmax.f32 %v2557_v46, 0.0  ;;  %v9310_v16 = vld [vmem:[#allocation13 + $0xc24] ss:$16 sps:$4 sm:$0xff]   ;;  %v9305_v47 = vld [vmem:[#allocation13 + $0xe40] ss:$16 sps:$4 sm:$0xff]  }
 0x357   : > { %v9313_v45 = vld [vmem:[#allocation13 + $0xe24] ss:$16 sps:$4 sm:$0xff]   ;;  %v9308_v46 = vld [vmem:[#allocation13 + $0xc20] ss:$16 sps:$4 sm:$0xff]  }
 0x358   : > { %v2560_v7 = vmax.f32 %v2558_v52, 0.0  ;;  %v9316_v48 = vld [vmem:[#allocation13 + $0xc04] ss:$16 sps:$4 sm:$0xff]   ;;  %v9311_v51 = vld [vmem:[#allocation13 + $0xe20] ss:$16 sps:$4 sm:$0xff]  }
 0x359   : > { %v9319_v52 = vld [vmem:[#allocation13 + $0xe04] ss:$16 sps:$4 sm:$0xff]  }
 0x35a   : > { %v7829_v56 = vpack.c.bf16 %v2560_v7, %v2559_v53  ;;  %v9314_v53 = vld [vmem:[#allocation13 + $0xc00] ss:$16 sps:$4 sm:$0xff]   ;;  %v9322_v7 = vld [vmem:[#allocation13 + $0xde4] ss:$16 sps:$4 sm:$0xff]  }
 0x35c   : > { %v2583_v57 = vrot.slane %v7829_v56, %v10997_v23  ;;  %v9317_v56 = vld [vmem:[#allocation13 + $0xe00] ss:$16 sps:$4 sm:$0xff]  }
 0x35e   : > { %v2590_v61 = vrot.slane %v2583_v57, %v10997_v23  ;;  %v9325_v57 = vld [vmem:[#allocation13 + $0xfe4] ss:$16 sps:$4 sm:$0xff]  }
 0x360   : > { %v2593_v62 = vsel %vm10496_vm12, %v2590_v61, %v2592_v60  ;;  %v9320_v60 = vld [vmem:[#allocation13 + $0xde0] ss:$16 sps:$4 sm:$0xff]   ;;  %v9328_v61 = vld [vmem:[#allocation13 + $0xdc4] ss:$16 sps:$4 sm:$0xff]  }
 0x361   : > { %2594 = vst [vmem:[#allocation4 + $0x8] sm:$0x3] %v2593_v62  ;;  %v9323_v62 = vld [vmem:[#allocation13 + $0xfe0] ss:$16 sps:$4 sm:$0xff]  }
 0x368   : > { %v2596_v63 = vld [vmem:[#allocation4 + $0x8] sm:$0xff] }
 0x369   : > { %v3233_v0 = vrot.slane %v2596_v63, %v10997_v23  ;;  %v3226_v1 = vcombine.high %v2596_v63, %v2596_v63 }
 0x36b   : > { %v3241_v2 = vcombine.high %v3233_v0, %v3233_v0  ;;  %v11332_v5 = vrot.slane %v3226_v1, %v10997_v23  ;;  %v11335_v8 = vrot.slane %v3233_v0, %v10997_v23  ;;  %v9331_v0 = vld [vmem:[#allocation13 + $0xfc4] ss:$16 sps:$4 sm:$0xff]  }
 0x36d   : > { %v11338_v10 = vrot.slane %v3241_v2, %v10997_v23  ;;  %v3242_v17 = vcombine.high %v11332_v5, %v11332_v5  ;;  %v11353_v34 = vcombine.high %v11335_v8, %v11335_v8  ;;  %v9326_v2 = vld [vmem:[#allocation13 + $0xdc0] ss:$16 sps:$4 sm:$0xff]  }
 0x36f   : > { %6391 = vmatprep.mubr.bf16.mxu0 %v11338_v10  ;;  %v11345_v49 = vcombine.high %v11338_v10, %v11338_v10  ;;  %v11348_v14 = vrot.slane %v3242_v17, %v10997_v23  ;;  %v9334_v17 = vld [vmem:[#allocation13 + $0xda4] ss:$16 sps:$4 sm:$0xff]  }
 0x370   : > { %6392 = vmatmul.mubr.bf16.vlgmr.msra.gmra.mxu0 %v11335_v8 }
 0x371   : > { %6442 = vmatpush1.bf16.msra.mxu0 %v9271_v13  ;;  %6432 = vmatprep.mubr.bf16.mxu1 %v11345_v49  ;;  %v11358_v55 = vcombine.high %v11348_v14, %v11348_v14  ;;  %v11360_v24 = vpop.f32.mrf.mxu0 }
 0x372   : > { %6473 = vmatprep.mubr.bf16.mxu0 %v11348_v14  ;;  %6433 = vmatmul.mubr.bf16.vlgmr.msra.gmra.mxu1 %v11353_v34 }
 0x373   : > { %6483 = vmatpush1.bf16.msra.mxu1 %v9275_v15  ;;  %6443 = vmatprep.subr.bf16.mxu0 %v9280_v19  ;;  %v11364_v30 = vpop.f32.mrf.mxu0  ;;  %v9329_v19 = vld [vmem:[#allocation13 + $0xfc0] ss:$16 sps:$4 sm:$0xff]  }
 0x374   : > { %6514 = vmatprep.mubr.bf16.mxu1 %v11358_v55  ;;  %6484 = vmatprep.subr.bf16.mxu1 %v9283_v4 }
 0x375   : > { %6444 = vmatpush1.bf16.msra.mxu0 %v9278_v21  ;;  %v6233_v35 = vpop.f32.mrf.mxu0  ;;  %v9337_v21 = vld [vmem:[#allocation13 + $0xfa4] ss:$16 sps:$4 sm:$0xff]  }
 0x376   : > { %6445 = vmatprep.subr.bf16.mxu0 %v9286_v27  ;;  %v9332_v27 = vld [vmem:[#allocation13 + $0xda0] ss:$16 sps:$4 sm:$0xff]  }
 0x377   : > { %6485 = vmatpush1.bf16.msra.mxu1 %v9281_v28  ;;  %v6234_v37 = vpop.f32.mrf.mxu0  ;;  %v9338_v35 = vld [vmem:[#allocation13 + $0xd80] ss:$16 sps:$4 sm:$0xff]  }
 0x378   : > { %6486 = vmatprep.subr.bf16.mxu1 %v9289_v32  ;;  %v9340_v32 = vld [vmem:[#allocation13 + $0xd84] ss:$16 sps:$4 sm:$0xff]   ;;  %v9344_v37 = vld [vmem:[#allocation13 + $0xd60] ss:$16 sps:$4 sm:$0xff]  }
 0x379   : > { %6446 = vmatpush1.bf16.msra.mxu0 %v9284_v33  ;;  %v9343_v33 = vld [vmem:[#allocation13 + $0xf84] ss:$16 sps:$4 sm:$0xff]  }
 0x37a   : > { %6447 = vmatprep.subr.bf16.mxu0 %v9292_v58  ;;  %v9346_v58 = vld [vmem:[#allocation13 + $0xd64] ss:$16 sps:$4 sm:$0xff]  }
 0x37b   : > { %6487 = vmatpush1.bf16.msra.mxu1 %v9287_v36  ;;  %v9349_v36 = vld [vmem:[#allocation13 + $0xf64] ss:$16 sps:$4 sm:$0xff]  }
 0x37c   : > { %6488 = vmatprep.subr.bf16.mxu1 %v9295_v38  ;;  %v9352_v38 = vld [vmem:[#allocation13 + $0xd44] ss:$16 sps:$4 sm:$0xff]  }
 0x37d   : > { %6448 = vmatpush1.bf16.msra.mxu0 %v9290_v9  ;;  %v9347_v9 = vld [vmem:[#allocation13 + $0xf60] ss:$16 sps:$4 sm:$0xff]  }
 0x37e   : > { %6449 = vmatprep.subr.bf16.mxu0 %v9298_v39  ;;  %v9355_v39 = vld [vmem:[#allocation13 + $0xf44] ss:$16 sps:$4 sm:$0xff]  }
 0x37f   : > { %6489 = vmatpush1.bf16.msra.mxu1 %v9293_v40  ;;  %v9350_v40 = vld [vmem:[#allocation13 + $0xd40] ss:$16 sps:$4 sm:$0xff]  }
 0x380   : > { %6490 = vmatprep.subr.bf16.mxu1 %v9301_v41  ;;  %v9358_v41 = vld [vmem:[#allocation13 + $0xd24] ss:$16 sps:$4 sm:$0xff]  }
 0x381   : > { %6450 = vmatpush1.bf16.msra.mxu0 %v9296_v42  ;;  %v9353_v42 = vld [vmem:[#allocation13 + $0xf40] ss:$16 sps:$4 sm:$0xff]  }
 0x382   : > { %6451 = vmatprep.subr.bf16.mxu0 %v9304_v26  ;;  %v9361_v26 = vld [vmem:[#allocation13 + $0xf24] ss:$16 sps:$4 sm:$0xff]  }
 0x383   : > { %6491 = vmatpush1.bf16.msra.mxu1 %v9299_v43  ;;  %v9356_v43 = vld [vmem:[#allocation13 + $0xd20] ss:$16 sps:$4 sm:$0xff]  }
 0x384   : > { %6492 = vmatprep.subr.bf16.mxu1 %v9307_v44  ;;  %v9364_v44 = vld [vmem:[#allocation13 + $0xd04] ss:$16 sps:$4 sm:$0xff]  }
 0x385   : > { %6452 = vmatpush1.bf16.msra.mxu0 %v9302_v31  ;;  %v11373_v31 = vld.sshfl [vmem:[#allocation4 + $0x10] sm:$0x11 pattern:$0x75316420] }
 0x386   : > { %6453 = vmatprep.subr.bf16.mxu0 %v9310_v16  ;;  %v9359_v16 = vld [vmem:[#allocation13 + $0xf20] ss:$16 sps:$4 sm:$0xff]  }
 0x387   : > { %6493 = vmatpush1.bf16.msra.mxu1 %v9305_v47  ;;  %v9367_v47 = vld [vmem:[#allocation13 + $0xf04] ss:$16 sps:$4 sm:$0xff]  }
 0x388   : > { %6494 = vmatprep.subr.bf16.mxu1 %v9313_v45  ;;  %v9362_v45 = vld [vmem:[#allocation13 + $0xd00] ss:$16 sps:$4 sm:$0xff]  }
 0x389   : > { %6454 = vmatpush1.bf16.msra.mxu0 %v9308_v46  ;;  %v3282_v46 = vcombine.high %v11373_v31, %v11373_v31 }
 0x38a   : > { %6455 = vmatprep.subr.bf16.mxu0 %v9316_v48  ;;  %v9370_v48 = vld [vmem:[#allocation13 + $0x10e4] ss:$16 sps:$4 sm:$0xff]  }
 0x38b   : > { %6495 = vmatpush1.bf16.msra.mxu1 %v9311_v51  ;;  %v9365_v51 = vld [vmem:[#allocation13 + $0xf00] ss:$16 sps:$4 sm:$0xff]  }
 0x38c   : > { %6496 = vmatprep.subr.bf16.mxu1 %v9319_v52  ;;  %v11379_v52 = vrot.slane %v11332_v5, %v10997_v23 }
 0x38d   : > { %6456 = vmatpush1.bf16.msra.mxu0 %v9314_v53  ;;  %v9373_v53 = vld [vmem:[#allocation13 + $0xec] ss:$16 sps:$4 sm:$0xff]  }
 0x38e   : > { %6457 = vmatprep.subr.bf16.mxu0 %v9322_v7  ;;  %v9368_v7 = vld [vmem:[#allocation13 + $0x10e0] ss:$16 sps:$4 sm:$0xff]  }
 0x38f   : > { %6497 = vmatpush1.bf16.msra.mxu1 %v9317_v56  ;;  %v6270_v63 = vpop.f32.mrf.mxu1  ;;  %v11382_v56 = vrot.slane %v3282_v46, %v10997_v23  ;;  %v9416_v46 = vld [vmem:[#allocation13 + $0x11e0] ss:$16 sps:$4 sm:$0xff]  }
 0x390   : > { %6498 = vmatprep.subr.bf16.mxu1 %v9325_v57  ;;  %v11368_v1 = vadd.f32 %v6270_v63, %v11360_v24  ;;  %v9335_v24 = vld [vmem:[#allocation13 + $0xfa0] ss:$16 sps:$4 sm:$0xff]   ;;  %v9376_v57 = vld [vmem:[#allocation13 + $0x10c4] ss:$16 sps:$4 sm:$0xff]  }
 0x391   : > { %6458 = vmatpush2.bf16.msra.mxu0 %v9320_v60  ;;  %v6272_v13 = vpop.f32.mrf.mxu1  ;;  %v9371_v60 = vld [vmem:[#allocation13 + $0xe8] ss:$16 sps:$4 sm:$0xff]   ;;  %v9374_v63 = vld [vmem:[#allocation13 + $0x10c0] ss:$16 sps:$4 sm:$0xff]  }
 0x392   : > { %6459 = vmatprep.subr.bf16.mxu0 %v9328_v61  ;;  %v11371_v15 = vadd.f32 %v6272_v13, %v11364_v30  ;;  %v9341_v30 = vld [vmem:[#allocation13 + $0xf80] ss:$16 sps:$4 sm:$0xff]   ;;  %v11387_v61 = vcombine.high %v11379_v52, %v11379_v52 }
 0x393   : > { %6499 = vmatpush2.bf16.msra.mxu1 %v9323_v62  ;;  %v6274_v4 = vpop.f32.mrf.mxu1  ;;  %v9379_v62 = vld [vmem:[#allocation13 + $0xcc] ss:$16 sps:$4 sm:$0xff]  }
 0x394   : > { %6500 = vmatprep.subr.bf16.mxu1 %v9331_v0  ;;  %v9385_v4 = vld [vmem:[#allocation13 + $0xac] ss:$16 sps:$4 sm:$0xff]  }
 0x395   : > { %6460 = vmatpush2.bf16.msra.mxu0 %v9326_v2  ;;  %v6275_v28 = vpop.f32.mrf.mxu1  ;;  %v9382_v2 = vld [vmem:[#allocation13 + $0x10a4] ss:$16 sps:$4 sm:$0xff]  }
 0x396   : > { %6461 = vmatprep.subr.bf16.mxu0 %v9334_v17  ;;  %v9377_v17 = vld [vmem:[#allocation13 + $0xc8] ss:$16 sps:$4 sm:$0xff]  }
 0x397   : > { %6501 = vmatpush2.bf16.msra.mxu1 %v9329_v19  ;;  %v9383_v28 = vld [vmem:[#allocation13 + $0xa8] ss:$16 sps:$4 sm:$0xff]  }
 0x398   : > { %6502 = vmatprep.subr.bf16.mxu1 %v9337_v21  ;;  %v9380_v21 = vld [vmem:[#allocation13 + $0x10a0] ss:$16 sps:$4 sm:$0xff]  }
 0x399   : > { %6462 = vmatpush2.bf16.msra.mxu0 %v9332_v27 }
 0x39a   : > { %6463 = vmatprep.subr.bf16.mxu0 %v9340_v32 }
 0x39b   : > { %6503 = vmatpush2.bf16.msra.mxu1 %v9335_v24  ;;  %v9391_v24 = vld [vmem:[#allocation13 + $0x8c] ss:$16 sps:$4 sm:$0xff]  }
 0x39c   : > { %6504 = vmatprep.subr.bf16.mxu1 %v9343_v33  ;;  %v9386_v33 = vld [vmem:[#allocation13 + $0x1080] ss:$16 sps:$4 sm:$0xff]  }
 0x39d   : > { %6464 = vmatpush2.bf16.msra.mxu0 %v9338_v35  ;;  %v9394_v35 = vld [vmem:[#allocation13 + $0x1064] ss:$16 sps:$4 sm:$0xff]  }
 0x39e   : > { %6465 = vmatprep.subr.bf16.mxu0 %v9346_v58  ;;  %v9392_v58 = vld [vmem:[#allocation13 + $0x1060] ss:$16 sps:$4 sm:$0xff]  }
 0x39f   : > { %6505 = vmatpush2.bf16.msra.mxu1 %v9341_v30  ;;  %v9400_v30 = vld [vmem:[#allocation13 + $0x1044] ss:$16 sps:$4 sm:$0xff]  }
 0x3a0   : > { %6506 = vmatprep.subr.bf16.mxu1 %v9349_v36  ;;  %v9395_v36 = vld [vmem:[#allocation13 + $0x68] ss:$16 sps:$4 sm:$0xff]  }
 0x3a1   : > { %6466 = vmatpush2.bf16.msra.mxu0 %v9344_v37  ;;  %v9403_v37 = vld [vmem:[#allocation13 + $0x4c] ss:$16 sps:$4 sm:$0xff]  }
 0x3a2   : > { %6467 = vmatprep.subr.bf16.mxu0 %v9352_v38  ;;  %v9398_v38 = vld [vmem:[#allocation13 + $0x1040] ss:$16 sps:$4 sm:$0xff]  }
 0x3a3   : > { %6507 = vmatpush2.bf16.msra.mxu1 %v9347_v9  ;;  %v9406_v9 = vld [vmem:[#allocation13 + $0x1024] ss:$16 sps:$4 sm:$0xff]  }
 0x3a4   : > { %6508 = vmatprep.subr.bf16.mxu1 %v9355_v39  ;;  %v9401_v39 = vld [vmem:[#allocation13 + $0x48] ss:$16 sps:$4 sm:$0xff]  }
 0x3a5   : > { %6468 = vmatpush2.bf16.msra.mxu0 %v9350_v40  ;;  %v9409_v40 = vld [vmem:[#allocation13 + $0x2c] ss:$16 sps:$4 sm:$0xff]  }
 0x3a6   : > { %6469 = vmatprep.subr.bf16.mxu0 %v9358_v41  ;;  %v9404_v41 = vld [vmem:[#allocation13 + $0x1020] ss:$16 sps:$4 sm:$0xff]  }
 0x3a7   : > { %6509 = vmatpush2.bf16.msra.mxu1 %v9353_v42  ;;  %v9412_v42 = vld [vmem:[#allocation13 + $0x1004] ss:$16 sps:$4 sm:$0xff]  }
 0x3a8   : > { %6510 = vmatprep.subr.bf16.mxu1 %v9361_v26  ;;  %v9407_v26 = vld [vmem:[#allocation13 + $0x28] ss:$16 sps:$4 sm:$0xff]  }
 0x3a9   : > { %6470 = vmatpush2.bf16.msra.mxu0 %v9356_v43  ;;  %v9415_v43 = vld [vmem:[#allocation13 + $0xc] ss:$16 sps:$4 sm:$0xff]  }
 0x3aa   : > { %6471 = vmatprep.subr.bf16.mxu0 %v9364_v44  ;;  %v9410_v44 = vld [vmem:[#allocation13 + $0x1000] ss:$16 sps:$4 sm:$0xff]  }
 0x3ab   : > { %6511 = vmatpush2.bf16.msra.mxu1 %v9359_v16  ;;  %v9418_v16 = vld [vmem:[#allocation13 + $0x11e4] ss:$16 sps:$4 sm:$0xff]  }
 0x3ac   : > { %6512 = vmatprep.subr.bf16.mxu1 %v9367_v47  ;;  %v9413_v47 = vld [vmem:[#allocation13 + $0x8] ss:$16 sps:$4 sm:$0xff]  }
 0x3ad   : > { %6472 = vmatpush2.bf16.msra.mxu0 %v9362_v45  ;;  %v9421_v45 = vld [vmem:[#allocation13 + $0x1ec] ss:$16 sps:$4 sm:$0xff]  }
 0x3ae   : > { %6523 = vmatprep.subr.bf16.mxu0 %v9370_v48  ;;  %v9424_v48 = vld [vmem:[#allocation13 + $0x11c4] ss:$16 sps:$4 sm:$0xff]  }
 0x3af   : > { %6513 = vmatpush2.bf16.msra.mxu1 %v9365_v51 }
 0x3b0   : > { %6474 = vmatmul.mubr.bf16.vlgmr.msra.gmra.mxu0 %v11379_v52  ;;  %6564 = vmatprep.subr.bf16.mxu1 %v9373_v53  ;;  %v9419_v53 = vld [vmem:[#allocation13 + $0x1e8] ss:$16 sps:$4 sm:$0xff]  }
 0x3b1   : > { %6524 = vmatpush1.bf16.msra.mxu0 %v9368_v7  ;;  %v6311_v5 = vpop.f32.mrf.mxu0  ;;  %6555 = vmatprep.mubr.bf16.mxu0 %v11382_v56 }
 0x3b2   : > { %v11391_v0 = vadd.f32 %v6311_v5, %v11368_v1  ;;  %6515 = vmatmul.mubr.bf16.vlgmr.msra.gmra.mxu1 %v11387_v61  ;;  %6525 = vmatprep.subr.bf16.mxu0 %v9376_v57  ;;  %v9388_v1 = vld [vmem:[#allocation13 + $0x1084] ss:$16 sps:$4 sm:$0xff]   ;;  %v9427_v57 = vld [vmem:[#allocation13 + $0x1cc] ss:$16 sps:$4 sm:$0xff]  }
 0x3b3   : > { %6565 = vmatpush1.bf16.msra.mxu1 %v9371_v60  ;;  %v6313_v13 = vpop.f32.mrf.mxu0  ;;  %6596 = vmatprep.mubr.bf16.mxu1 %v11225_v12  ;;  %v9389_v12 = vld [vmem:[#allocation13 + $0x88] ss:$16 sps:$4 sm:$0xff]  }
 0x3b4   : > { %v11396_v19 = vadd.f32 %v6313_v13, %v11371_v15  ;;  %6566 = vmatprep.subr.bf16.mxu1 %v9379_v62  ;;  %v9397_v15 = vld [vmem:[#allocation13 + $0x6c] ss:$16 sps:$4 sm:$0xff]   ;;  %v9422_v62 = vld [vmem:[#allocation13 + $0x11c0] ss:$16 sps:$4 sm:$0xff]  }
 0x3b5   : > { %6526 = vmatpush1.bf16.msra.mxu0 %v9374_v63  ;;  %v6315_v27 = vpop.f32.mrf.mxu0  ;;  %v9430_v63 = vld [vmem:[#allocation13 + $0x11a4] ss:$16 sps:$4 sm:$0xff]  }
 0x3b6   : > { %6527 = vmatprep.subr.bf16.mxu0 %v9382_v2  ;;  %v9425_v2 = vld [vmem:[#allocation13 + $0x1c8] ss:$16 sps:$4 sm:$0xff]  }
 0x3b7   : > { %6567 = vmatpush1.bf16.msra.mxu1 %v9377_v17  ;;  %v6316_v32 = vpop.f32.mrf.mxu0  ;;  %v9433_v17 = vld [vmem:[#allocation13 + $0x1ac] ss:$16 sps:$4 sm:$0xff]   ;;  %v9431_v27 = vld [vmem:[#allocation13 + $0x1a8] ss:$16 sps:$4 sm:$0xff]  }
 0x3b8   : > { %6568 = vmatprep.subr.bf16.mxu1 %v9385_v4  ;;  %v9428_v4 = vld [vmem:[#allocation13 + $0x11a0] ss:$16 sps:$4 sm:$0xff]   ;;  %v9437_v32 = vld [vmem:[#allocation13 + $0x188] ss:$16 sps:$4 sm:$0xff]  }
 0x3b9   : > { %6528 = vmatpush1.bf16.msra.mxu0 %v9380_v21 }
 0x3ba   : > { %6529 = vmatprep.subr.bf16.mxu0 %v9388_v1  ;;  %v9439_v1 = vld [vmem:[#allocation13 + $0x18c] ss:$16 sps:$4 sm:$0xff]  }
 0x3bb   : > { %6569 = vmatpush1.bf16.msra.mxu1 %v9383_v28  ;;  %v9434_v28 = vld [vmem:[#allocation13 + $0x1180] ss:$16 sps:$4 sm:$0xff]  }
 0x3bc   : > { %6570 = vmatprep.subr.bf16.mxu1 %v9391_v24  ;;  %v9445_v24 = vld [vmem:[#allocation13 + $0x16c] ss:$16 sps:$4 sm:$0xff]  }
 0x3bd   : > { %6530 = vmatpush1.bf16.msra.mxu0 %v9386_v33  ;;  %v9440_v33 = vld [vmem:[#allocation13 + $0x1160] ss:$16 sps:$4 sm:$0xff]  }
 0x3be   : > { %6531 = vmatprep.subr.bf16.mxu0 %v9394_v35  ;;  %v9448_v35 = vld [vmem:[#allocation13 + $0x1144] ss:$16 sps:$4 sm:$0xff]  }
 0x3bf   : > { %6571 = vmatpush1.bf16.msra.mxu1 %v9389_v12  ;;  %v9443_v12 = vld [vmem:[#allocation13 + $0x168] ss:$16 sps:$4 sm:$0xff]  }
 0x3c0   : > { %6572 = vmatprep.subr.bf16.mxu1 %v9397_v15  ;;  %v9451_v15 = vld [vmem:[#allocation13 + $0x14c] ss:$16 sps:$4 sm:$0xff]  }
 0x3c1   : > { %6532 = vmatpush1.bf16.msra.mxu0 %v9392_v58  ;;  %v9446_v58 = vld [vmem:[#allocation13 + $0x1140] ss:$16 sps:$4 sm:$0xff]  }
 0x3c2   : > { %6533 = vmatprep.subr.bf16.mxu0 %v9400_v30  ;;  %v9454_v30 = vld [vmem:[#allocation13 + $0x1124] ss:$16 sps:$4 sm:$0xff]  }
 0x3c3   : > { %6573 = vmatpush1.bf16.msra.mxu1 %v9395_v36  ;;  %v9449_v36 = vld [vmem:[#allocation13 + $0x148] ss:$16 sps:$4 sm:$0xff]  }
 0x3c4   : > { %6574 = vmatprep.subr.bf16.mxu1 %v9403_v37  ;;  %v9457_v37 = vld [vmem:[#allocation13 + $0x12c] ss:$16 sps:$4 sm:$0xff]  }
 0x3c5   : > { %6534 = vmatpush1.bf16.msra.mxu0 %v9398_v38  ;;  %v9452_v38 = vld [vmem:[#allocation13 + $0x1120] ss:$16 sps:$4 sm:$0xff]  }
 0x3c6   : > { %6535 = vmatprep.subr.bf16.mxu0 %v9406_v9  ;;  %v9460_v9 = vld [vmem:[#allocation13 + $0x1104] ss:$16 sps:$4 sm:$0xff]  }
 0x3c7   : > { %6575 = vmatpush1.bf16.msra.mxu1 %v9401_v39  ;;  %v9455_v39 = vld [vmem:[#allocation13 + $0x128] ss:$16 sps:$4 sm:$0xff]  }
 0x3c8   : > { %6576 = vmatprep.subr.bf16.mxu1 %v9409_v40  ;;  %v9463_v40 = vld [vmem:[#allocation13 + $0x10c] ss:$16 sps:$4 sm:$0xff]  }
 0x3c9   : > { %6536 = vmatpush1.bf16.msra.mxu0 %v9404_v41  ;;  %v9458_v41 = vld [vmem:[#allocation13 + $0x1100] ss:$16 sps:$4 sm:$0xff]  }
 0x3ca   : > { %6537 = vmatprep.subr.bf16.mxu0 %v9412_v42  ;;  %v9466_v42 = vld [vmem:[#allocation13 + $0x2ec] ss:$16 sps:$4 sm:$0xff]  }
 0x3cb   : > { %6577 = vmatpush1.bf16.msra.mxu1 %v9407_v26  ;;  %v9461_v26 = vld [vmem:[#allocation13 + $0x108] ss:$16 sps:$4 sm:$0xff]  }
 0x3cc   : > { %6578 = vmatprep.subr.bf16.mxu1 %v9415_v43  ;;  %v11406_v43 = vrot.slane %v11373_v31, %v10997_v23  ;;  %v9478_v23 = vld [vmem:[#allocation13 + $0x2ac] ss:$16 sps:$4 sm:$0xff]   ;;  %v9473_v31 = vld [vmem:[#allocation13 + $0x4c8] ss:$16 sps:$4 sm:$0xff]  }
 0x3cd   : > { %6538 = vmatpush1.bf16.msra.mxu0 %v9410_v44  ;;  %v9469_v44 = vld [vmem:[#allocation13 + $0x4ec] ss:$16 sps:$4 sm:$0xff]  }
 0x3ce   : > { %6539 = vmatprep.subr.bf16.mxu0 %v9418_v16  ;;  %v9464_v16 = vld [vmem:[#allocation13 + $0x2e8] ss:$16 sps:$4 sm:$0xff]  }
 0x3cf   : > { %6579 = vmatpush1.bf16.msra.mxu1 %v9413_v47  ;;  %v6352_v51 = vpop.f32.mrf.mxu1  ;;  %v9472_v47 = vld [vmem:[#allocation13 + $0x2cc] ss:$16 sps:$4 sm:$0xff]  }
 0x3d0   : > { %v11399_v7 = vadd.f32 %v6352_v51, %v11391_v0  ;;  %6580 = vmatprep.subr.bf16.mxu1 %v9421_v45  ;;  %v9436_v0 = vld [vmem:[#allocation13 + $0x1184] ss:$16 sps:$4 sm:$0xff]   ;;  %v9467_v45 = vld [vmem:[#allocation13 + $0x4e8] ss:$16 sps:$4 sm:$0xff]   ;;  %v9481_v51 = vld [vmem:[#allocation13 + $0x4ac] ss:$16 sps:$4 sm:$0xff]  }
 0x3d1   : > { %6540 = vmatpush2.bf16.msra.mxu0 %v9416_v46  ;;  %v6354_v60 = vpop.f32.mrf.mxu1  ;;  %v9475_v46 = vld [vmem:[#allocation13 + $0x4cc] ss:$16 sps:$4 sm:$0xff]  }
 0x3d2   : > { %v11402_v5 = vadd.f32 %v6354_v60, %v11396_v19  ;;  %6541 = vmatprep.subr.bf16.mxu0 %v9424_v48  ;;  %v9442_v19 = vld [vmem:[#allocation13 + $0x1164] ss:$16 sps:$4 sm:$0xff]   ;;  %v9470_v48 = vld [vmem:[#allocation13 + $0x2c8] ss:$16 sps:$4 sm:$0xff]  }
 0x3d3   : > { %6581 = vmatpush2.bf16.msra.mxu1 %v9419_v53  ;;  %v6356_v13 = vpop.f32.mrf.mxu1  ;;  %v9476_v53 = vld [vmem:[#allocation13 + $0x2a8] ss:$16 sps:$4 sm:$0xff]  }
 0x3d4   : > { %6582 = vmatprep.subr.bf16.mxu1 %v9427_v57  ;;  %v9484_v57 = vld [vmem:[#allocation13 + $0x28c] ss:$16 sps:$4 sm:$0xff]   ;;  %v9479_v60 = vld [vmem:[#allocation13 + $0x4a8] ss:$16 sps:$4 sm:$0xff]  }
 0x3d5   : > { %6542 = vmatpush2.bf16.msra.mxu0 %v9422_v62  ;;  %v6357_v21 = vpop.f32.mrf.mxu1  ;;  %v9487_v62 = vld [vmem:[#allocation13 + $0x48c] ss:$16 sps:$4 sm:$0xff]  }
 0x3d6   : > { %6543 = vmatprep.subr.bf16.mxu0 %v9430_v63  ;;  %v9485_v63 = vld [vmem:[#allocation13 + $0x488] ss:$16 sps:$4 sm:$0xff]   ;;  %v9496_v13 = vld [vmem:[#allocation13 + $0x24c] ss:$16 sps:$4 sm:$0xff]  }
 0x3d7   : > { %6583 = vmatpush2.bf16.msra.mxu1 %v9425_v2  ;;  %v9493_v2 = vld [vmem:[#allocation13 + $0x46c] ss:$16 sps:$4 sm:$0xff]   ;;  %v9494_v21 = vld [vmem:[#allocation13 + $0x248] ss:$16 sps:$4 sm:$0xff]  }
 0x3d8   : > { %6584 = vmatprep.subr.bf16.mxu1 %v9433_v17  ;;  %v9491_v17 = vld [vmem:[#allocation13 + $0x468] ss:$16 sps:$4 sm:$0xff]  }
 0x3d9   : > { %6544 = vmatpush2.bf16.msra.mxu0 %v9428_v4  ;;  %v9499_v4 = vld [vmem:[#allocation13 + $0x44c] ss:$16 sps:$4 sm:$0xff]  }
 0x3da   : > { %6545 = vmatprep.subr.bf16.mxu0 %v9436_v0  ;;  %v9502_v0 = vld [vmem:[#allocation13 + $0x22c] ss:$16 sps:$4 sm:$0xff]  }
 0x3db   : > { %6585 = vmatpush2.bf16.msra.mxu1 %v9431_v27  ;;  %v9497_v27 = vld [vmem:[#allocation13 + $0x448] ss:$16 sps:$4 sm:$0xff]  }
 0x3dc   : > { %6586 = vmatprep.subr.bf16.mxu1 %v9439_v1  ;;  %v9505_v1 = vld [vmem:[#allocation13 + $0x42c] ss:$16 sps:$4 sm:$0xff]  }
 0x3dd   : > { %6546 = vmatpush2.bf16.msra.mxu0 %v9434_v28  ;;  %v9500_v28 = vld [vmem:[#allocation13 + $0x228] ss:$16 sps:$4 sm:$0xff]  }
 0x3de   : > { %6547 = vmatprep.subr.bf16.mxu0 %v9442_v19  ;;  %v9508_v19 = vld [vmem:[#allocation13 + $0x20c] ss:$16 sps:$4 sm:$0xff]  }
 0x3df   : > { %6587 = vmatpush2.bf16.msra.mxu1 %v9437_v32  ;;  %v9503_v32 = vld [vmem:[#allocation13 + $0x428] ss:$16 sps:$4 sm:$0xff]  }
 0x3e0   : > { %6588 = vmatprep.subr.bf16.mxu1 %v9445_v24  ;;  %v9511_v24 = vld [vmem:[#allocation13 + $0x40c] ss:$16 sps:$4 sm:$0xff]  }
 0x3e1   : > { %6548 = vmatpush2.bf16.msra.mxu0 %v9440_v33  ;;  %v9506_v33 = vld [vmem:[#allocation13 + $0x208] ss:$16 sps:$4 sm:$0xff]  }
 0x3e2   : > { %6549 = vmatprep.subr.bf16.mxu0 %v9448_v35  ;;  %v9514_v35 = vld [vmem:[#allocation13 + $0x3ec] ss:$16 sps:$4 sm:$0xff]  }
 0x3e3   : > { %6589 = vmatpush2.bf16.msra.mxu1 %v9443_v12  ;;  %v9509_v12 = vld [vmem:[#allocation13 + $0x408] ss:$16 sps:$4 sm:$0xff]  }
 0x3e4   : > { %6590 = vmatprep.subr.bf16.mxu1 %v9451_v15  ;;  %v9517_v15 = vld [vmem:[#allocation13 + $0x5ec] ss:$16 sps:$4 sm:$0xff]  }
 0x3e5   : > { %6550 = vmatpush2.bf16.msra.mxu0 %v9446_v58  ;;  %v9512_v58 = vld [vmem:[#allocation13 + $0x3e8] ss:$16 sps:$4 sm:$0xff]  }
 0x3e6   : > { %6551 = vmatprep.subr.bf16.mxu0 %v9454_v30  ;;  %v9520_v30 = vld [vmem:[#allocation13 + $0x3cc] ss:$16 sps:$4 sm:$0xff]  }
 0x3e7   : > { %6591 = vmatpush2.bf16.msra.mxu1 %v9449_v36  ;;  %v9515_v36 = vld [vmem:[#allocation13 + $0x5e8] ss:$16 sps:$4 sm:$0xff]  }
 0x3e8   : > { %6592 = vmatprep.subr.bf16.mxu1 %v9457_v37  ;;  %v9523_v37 = vld [vmem:[#allocation13 + $0x5cc] ss:$16 sps:$4 sm:$0xff]  }
 0x3e9   : > { %6552 = vmatpush2.bf16.msra.mxu0 %v9452_v38  ;;  %v9518_v38 = vld [vmem:[#allocation13 + $0x3c8] ss:$16 sps:$4 sm:$0xff]  }
 0x3ea   : > { %6553 = vmatprep.subr.bf16.mxu0 %v9460_v9  ;;  %v9526_v9 = vld [vmem:[#allocation13 + $0x3ac] ss:$16 sps:$4 sm:$0xff]  }
 0x3eb   : > { %6593 = vmatpush2.bf16.msra.mxu1 %v9455_v39  ;;  %v9521_v39 = vld [vmem:[#allocation13 + $0x5c8] ss:$16 sps:$4 sm:$0xff]  }
 0x3ec   : > { %6594 = vmatprep.subr.bf16.mxu1 %v9463_v40  ;;  %v9529_v40 = vld [vmem:[#allocation13 + $0x5ac] ss:$16 sps:$4 sm:$0xff]  }
 0x3ed   : > { %6554 = vmatpush2.bf16.msra.mxu0 %v9458_v41  ;;  %v9524_v41 = vld [vmem:[#allocation13 + $0x3a8] ss:$16 sps:$4 sm:$0xff]  }
 0x3ee   : > { %6605 = vmatprep.subr.bf16.mxu0 %v9466_v42  ;;  %v9532_v42 = vld [vmem:[#allocation13 + $0x38c] ss:$16 sps:$4 sm:$0xff]  }
 0x3ef   : > { %6595 = vmatpush2.bf16.msra.mxu1 %v9461_v26  ;;  %v9527_v26 = vld [vmem:[#allocation13 + $0x5a8] ss:$16 sps:$4 sm:$0xff]  }
 0x3f0   : > { %6556 = vmatmul.mubr.bf16.vlgmr.msra.gmra.mxu0 %v11406_v43  ;;  %6646 = vmatprep.subr.bf16.mxu1 %v9469_v44  ;;  %v9535_v44 = vld [vmem:[#allocation13 + $0x58c] ss:$16 sps:$4 sm:$0xff]  }
 0x3f1   : > { %6606 = vmatpush1.bf16.msra.mxu0 %v9464_v16  ;;  %6637 = vmatprep.mubr.bf16.mxu0 %v11270_v20  ;;  %v9482_v20 = vld [vmem:[#allocation13 + $0x288] ss:$16 sps:$4 sm:$0xff]  }
 0x3f2   : > { %6597 = vmatmul.mubr.bf16.vlgmr.msra.gmra.mxu1 %v11283_v25  ;;  %6607 = vmatprep.subr.bf16.mxu0 %v9472_v47  ;;  %v9490_v25 = vld [vmem:[#allocation13 + $0x26c] ss:$16 sps:$4 sm:$0xff]   ;;  %v9530_v16 = vld [vmem:[#allocation13 + $0x388] ss:$16 sps:$4 sm:$0xff]  }
 0x3f3   : > { %6647 = vmatpush1.bf16.msra.mxu1 %v9467_v45  ;;  %6678 = vmatprep.mubr.bf16.mxu1 %v11286_v29  ;;  %v9488_v29 = vld [vmem:[#allocation13 + $0x268] ss:$16 sps:$4 sm:$0xff]   ;;  %v9538_v47 = vld [vmem:[#allocation13 + $0x36c] ss:$16 sps:$4 sm:$0xff]  }
 0x3f4   : > { %6648 = vmatprep.subr.bf16.mxu1 %v9475_v46  ;;  %v9533_v45 = vld [vmem:[#allocation13 + $0x588] ss:$16 sps:$4 sm:$0xff]   ;;  %v9541_v46 = vld [vmem:[#allocation13 + $0x56c] ss:$16 sps:$4 sm:$0xff]  }
 0x3f5   : > { %6608 = vmatpush1.bf16.msra.mxu0 %v9470_v48  ;;  %v9536_v48 = vld [vmem:[#allocation13 + $0x368] ss:$16 sps:$4 sm:$0xff]  }
 0x3f6   : > { %6609 = vmatprep.subr.bf16.mxu0 %v9478_v23  ;;  %v9544_v23 = vld [vmem:[#allocation13 + $0x34c] ss:$16 sps:$4 sm:$0xff]  }
 0x3f7   : > { %6649 = vmatpush1.bf16.msra.mxu1 %v9473_v31  ;;  %v9539_v31 = vld [vmem:[#allocation13 + $0x568] ss:$16 sps:$4 sm:$0xff]  }
 0x3f8   : > { %6650 = vmatprep.subr.bf16.mxu1 %v9481_v51  ;;  %v9547_v51 = vld [vmem:[#allocation13 + $0x54c] ss:$16 sps:$4 sm:$0xff]  }
 0x3f9   : > { %6610 = vmatpush1.bf16.msra.mxu0 %v9476_v53  ;;  %v9542_v53 = vld [vmem:[#allocation13 + $0x348] ss:$16 sps:$4 sm:$0xff]  }
 0x3fa   : > { %6611 = vmatprep.subr.bf16.mxu0 %v9484_v57  ;;  %v9550_v57 = vld [vmem:[#allocation13 + $0x32c] ss:$16 sps:$4 sm:$0xff]  }
 0x3fb   : > { %6651 = vmatpush1.bf16.msra.mxu1 %v9479_v60  ;;  %v9545_v60 = vld [vmem:[#allocation13 + $0x548] ss:$16 sps:$4 sm:$0xff]  }
 0x3fc   : > { %6652 = vmatprep.subr.bf16.mxu1 %v9487_v62  ;;  %v9553_v62 = vld [vmem:[#allocation13 + $0x52c] ss:$16 sps:$4 sm:$0xff]  }
 0x3fd   : > { %6612 = vmatpush1.bf16.msra.mxu0 %v9482_v20  ;;  %v9548_v20 = vld [vmem:[#allocation13 + $0x328] ss:$16 sps:$4 sm:$0xff]  }
 0x3fe   : > { %6613 = vmatprep.subr.bf16.mxu0 %v9490_v25  ;;  %v9556_v25 = vld [vmem:[#allocation13 + $0x30c] ss:$16 sps:$4 sm:$0xff]  }
 0x3ff   : > { %6653 = vmatpush1.bf16.msra.mxu1 %v9485_v63  ;;  %v9551_v63 = vld [vmem:[#allocation13 + $0x528] ss:$16 sps:$4 sm:$0xff]  }
 0x400   : > { %6654 = vmatprep.subr.bf16.mxu1 %v9493_v2  ;;  %v9559_v2 = vld [vmem:[#allocation13 + $0x50c] ss:$16 sps:$4 sm:$0xff]  }
 0x401   : > { %6614 = vmatpush1.bf16.msra.mxu0 %v9488_v29  ;;  %v9554_v29 = vld [vmem:[#allocation13 + $0x308] ss:$16 sps:$4 sm:$0xff]  }
 0x402   : > { %6615 = vmatprep.subr.bf16.mxu0 %v9496_v13  ;;  %v9562_v13 = vld [vmem:[#allocation13 + $0x6ec] ss:$16 sps:$4 sm:$0xff]  }
 0x403   : > { %6655 = vmatpush1.bf16.msra.mxu1 %v9491_v17  ;;  %v9557_v17 = vld [vmem:[#allocation13 + $0x508] ss:$16 sps:$4 sm:$0xff]  }
 0x404   : > { %6656 = vmatprep.subr.bf16.mxu1 %v9499_v4  ;;  %v9565_v4 = vld [vmem:[#allocation13 + $0x8ec] ss:$16 sps:$4 sm:$0xff]  }
 0x405   : > { %6616 = vmatpush1.bf16.msra.mxu0 %v9494_v21  ;;  %v9560_v21 = vld [vmem:[#allocation13 + $0x6e8] ss:$16 sps:$4 sm:$0xff]  }
 0x406   : > { %6617 = vmatprep.subr.bf16.mxu0 %v9502_v0  ;;  %v9568_v0 = vld [vmem:[#allocation13 + $0x6cc] ss:$16 sps:$4 sm:$0xff]  }
 0x407   : > { %6657 = vmatpush1.bf16.msra.mxu1 %v9497_v27  ;;  %v9563_v27 = vld [vmem:[#allocation13 + $0x8e8] ss:$16 sps:$4 sm:$0xff]  }
 0x408   : > { %6658 = vmatprep.subr.bf16.mxu1 %v9505_v1 }
 0x409   : > { %6618 = vmatpush1.bf16.msra.mxu0 %v9500_v28  ;;  %v9571_v28 = vld [vmem:[#allocation13 + $0x8cc] ss:$16 sps:$4 sm:$0xff]  }
 0x40a   : > { %6619 = vmatprep.subr.bf16.mxu0 %v9508_v19 }
 0x40b   : > { %6659 = vmatpush1.bf16.msra.mxu1 %v9503_v32  ;;  %v9566_v32 = vld [vmem:[#allocation13 + $0x6c8] ss:$16 sps:$4 sm:$0xff]  }
 0x40c   : > { %6660 = vmatprep.subr.bf16.mxu1 %v9511_v24 }
 0x40d   : > { %6620 = vmatpush1.bf16.msra.mxu0 %v9506_v33 }
 0x40e   : > { %6621 = vmatprep.subr.bf16.mxu0 %v9514_v35  ;;  %v9574_v35 = vld [vmem:[#allocation13 + $0x6ac] ss:$16 sps:$4 sm:$0xff]  }
 0x40f   : > { %6661 = vmatpush1.bf16.msra.mxu1 %v9509_v12 }
 0x410   : > { %6662 = vmatprep.subr.bf16.mxu1 %v9517_v15 }
 0x411   : > { %6622 = vmatpush2.bf16.msra.mxu0 %v9512_v58 }
 0x412   : > { %6623 = vmatprep.subr.bf16.mxu0 %v9520_v30  ;;  %v9577_v30 = vld [vmem:[#allocation13 + $0x8ac] ss:$16 sps:$4 sm:$0xff]  }
 0x413   : > { %6663 = vmatpush2.bf16.msra.mxu1 %v9515_v36 }
 0x414   : > { %6664 = vmatprep.subr.bf16.mxu1 %v9523_v37 }
 0x415   : > { %6624 = vmatpush2.bf16.msra.mxu0 %v9518_v38  ;;  %v9580_v38 = vld [vmem:[#allocation13 + $0x68c] ss:$16 sps:$4 sm:$0xff]  }
 0x416   : > { %6625 = vmatprep.subr.bf16.mxu0 %v9526_v9 }
 0x417   : > { %6665 = vmatpush2.bf16.msra.mxu1 %v9521_v39  ;;  %v9583_v39 = vld [vmem:[#allocation13 + $0x88c] ss:$16 sps:$4 sm:$0xff]  }
 0x418   : > { %6666 = vmatprep.subr.bf16.mxu1 %v9529_v40  ;;  %v9586_v40 = vld [vmem:[#allocation13 + $0x66c] ss:$16 sps:$4 sm:$0xff]  }
 0x419   : > { %6626 = vmatpush2.bf16.msra.mxu0 %v9524_v41  ;;  %v9581_v41 = vld [vmem:[#allocation13 + $0x888] ss:$16 sps:$4 sm:$0xff]  }
 0x41a   : > { %6627 = vmatprep.subr.bf16.mxu0 %v9532_v42  ;;  %v9589_v42 = vld [vmem:[#allocation13 + $0x86c] ss:$16 sps:$4 sm:$0xff]  }
 0x41b   : > { %6667 = vmatpush2.bf16.msra.mxu1 %v9527_v26  ;;  %v9584_v26 = vld [vmem:[#allocation13 + $0x668] ss:$16 sps:$4 sm:$0xff]  }
 0x41c   : > { %6668 = vmatprep.subr.bf16.mxu1 %v9535_v44  ;;  %v9592_v44 = vld [vmem:[#allocation13 + $0x64c] ss:$16 sps:$4 sm:$0xff]  }
 0x41d   : > { %6628 = vmatpush2.bf16.msra.mxu0 %v9530_v16  ;;  %v9587_v16 = vld [vmem:[#allocation13 + $0x868] ss:$16 sps:$4 sm:$0xff]  }
 0x41e   : > { %6629 = vmatprep.subr.bf16.mxu0 %v9538_v47  ;;  %v9595_v47 = vld [vmem:[#allocation13 + $0x84c] ss:$16 sps:$4 sm:$0xff]  }
 0x41f   : > { %6669 = vmatpush2.bf16.msra.mxu1 %v9533_v45  ;;  %v9590_v45 = vld [vmem:[#allocation13 + $0x648] ss:$16 sps:$4 sm:$0xff]  }
 0x420   : > { %6670 = vmatprep.subr.bf16.mxu1 %v9541_v46  ;;  %v9598_v46 = vld [vmem:[#allocation13 + $0x62c] ss:$16 sps:$4 sm:$0xff]  }
 0x421   : > { %6630 = vmatpush2.bf16.msra.mxu0 %v9536_v48  ;;  %v9593_v48 = vld [vmem:[#allocation13 + $0x848] ss:$16 sps:$4 sm:$0xff]  }
 0x422   : > { %6631 = vmatprep.subr.bf16.mxu0 %v9544_v23  ;;  %v9601_v23 = vld [vmem:[#allocation13 + $0x82c] ss:$16 sps:$4 sm:$0xff]  }
 0x423   : > { %6671 = vmatpush2.bf16.msra.mxu1 %v9539_v31  ;;  %v9596_v31 = vld [vmem:[#allocation13 + $0x628] ss:$16 sps:$4 sm:$0xff]  }
 0x424   : > { %6672 = vmatprep.subr.bf16.mxu1 %v9547_v51  ;;  %v9604_v51 = vld [vmem:[#allocation13 + $0x60c] ss:$16 sps:$4 sm:$0xff]  }
 0x425   : > { %6632 = vmatpush2.bf16.msra.mxu0 %v9542_v53  ;;  %v9599_v53 = vld [vmem:[#allocation13 + $0x828] ss:$16 sps:$4 sm:$0xff]  }
 0x426   : > { %6633 = vmatprep.subr.bf16.mxu0 %v9550_v57  ;;  %v9607_v57 = vld [vmem:[#allocation13 + $0x80c] ss:$16 sps:$4 sm:$0xff]  }
 0x427   : > { %6673 = vmatpush2.bf16.msra.mxu1 %v9545_v60  ;;  %v9602_v60 = vld [vmem:[#allocation13 + $0x608] ss:$16 sps:$4 sm:$0xff]  }
 0x428   : > { %6674 = vmatprep.subr.bf16.mxu1 %v9553_v62  ;;  %v9610_v62 = vld [vmem:[#allocation13 + $0x7ec] ss:$16 sps:$4 sm:$0xff]  }
 0x429   : > { %6634 = vmatpush2.bf16.msra.mxu0 %v9548_v20  ;;  %v9605_v20 = vld [vmem:[#allocation13 + $0x808] ss:$16 sps:$4 sm:$0xff]  }
 0x42a   : > { %6635 = vmatprep.subr.bf16.mxu0 %v9556_v25  ;;  %v9613_v25 = vld [vmem:[#allocation13 + $0x9ec] ss:$16 sps:$4 sm:$0xff]  }
 0x42b   : > { %6675 = vmatpush2.bf16.msra.mxu1 %v9551_v63  ;;  %v9608_v63 = vld [vmem:[#allocation13 + $0x7e8] ss:$16 sps:$4 sm:$0xff]  }
 0x42c   : > { %6676 = vmatprep.subr.bf16.mxu1 %v9559_v2  ;;  %v9616_v2 = vld [vmem:[#allocation13 + $0x7cc] ss:$16 sps:$4 sm:$0xff]  }
 0x42d   : > { %6636 = vmatpush2.bf16.msra.mxu0 %v9554_v29  ;;  %v9611_v29 = vld [vmem:[#allocation13 + $0x9e8] ss:$16 sps:$4 sm:$0xff]  }
 0x42e   : > { %6687 = vmatprep.subr.bf16.mxu0 %v9562_v13  ;;  %v9619_v13 = vld [vmem:[#allocation13 + $0x9cc] ss:$16 sps:$4 sm:$0xff]  }
 0x42f   : > { %6677 = vmatpush2.bf16.msra.mxu1 %v9557_v17  ;;  %v9614_v17 = vld [vmem:[#allocation13 + $0x7c8] ss:$16 sps:$4 sm:$0xff]  }
 0x430   : > { %6638 = vmatmul.mubr.bf16.vlgmr.msra.gmra.mxu0 %v11292_v54  ;;  %v6393_v1 = vpop.f32.mrf.mxu0  ;;  %6728 = vmatprep.subr.bf16.mxu1 %v9565_v4  ;;  %v9569_v54 = vld [vmem:[#allocation13 + $0x8c8] ss:$16 sps:$4 sm:$0xff]   ;;  %v9622_v4 = vld [vmem:[#allocation13 + $0x7ac] ss:$16 sps:$4 sm:$0xff]  }
 0x431   : > { %v6394_v19 = vadd.f32 %v6393_v1, %v11399_v7  ;;  %6688 = vmatpush1.bf16.msra.mxu0 %v9560_v21  ;;  %6719 = vmatprep.mubr.bf16.mxu0 %v11296_v6  ;;  %v9572_v6 = vld [vmem:[#allocation13 + $0x6a8] ss:$16 sps:$4 sm:$0xff]   ;;  %v9628_v1 = vld [vmem:[#allocation13 + $0x78c] ss:$16 sps:$4 sm:$0xff]  }
 0x432   : > { %6679 = vmatmul.mubr.bf16.vlgmr.msra.gmra.mxu1 %v11302_v18  ;;  %v6395_v24 = vpop.f32.mrf.mxu0  ;;  %v6434_v33 = vpop.f32.mrf.mxu1  ;;  %6689 = vmatprep.subr.bf16.mxu0 %v9568_v0  ;;  %v9617_v21 = vld [vmem:[#allocation13 + $0x9c8] ss:$16 sps:$4 sm:$0xff]   ;;  %v9625_v0 = vld [vmem:[#allocation13 + $0x9ac] ss:$16 sps:$4 sm:$0xff]  }
 0x433   : > { %v6396_v12 = vadd.f32 %v6395_v24, %v11402_v5  ;;  %v11417_v15 = vadd.f32 %v6434_v33, %v6394_v19  ;;  %6729 = vmatpush1.bf16.msra.mxu1 %v9563_v27  ;;  %6760 = vmatprep.mubr.bf16.mxu1 %v11338_v10  ;;  %v9575_v5 = vld [vmem:[#allocation13 + $0x8a8] ss:$16 sps:$4 sm:$0xff]   ;;  %v9631_v19 = vld [vmem:[#allocation13 + $0x98c] ss:$16 sps:$4 sm:$0xff]  }
 0x434   : > { %v6397_v58 = vpop.f32.mrf.mxu0  ;;  %v6436_v7 = vpop.f32.mrf.mxu1  ;;  %6730 = vmatprep.subr.bf16.mxu1 %v9571_v28  ;;  %v9578_v10 = vld [vmem:[#allocation13 + $0x688] ss:$16 sps:$4 sm:$0xff]   ;;  %v9634_v24 = vld [vmem:[#allocation13 + $0x76c] ss:$16 sps:$4 sm:$0xff]  }
 0x435   : > { %v11420_v36 = vadd.f32 %v6436_v7, %v6396_v12  ;;  %6690 = vmatpush1.bf16.msra.mxu0 %v9566_v32  ;;  %v9620_v27 = vld [vmem:[#allocation13 + $0x7a8] ss:$16 sps:$4 sm:$0xff]   ;;  %v9643_v7 = vld [vmem:[#allocation13 + $0x94c] ss:$16 sps:$4 sm:$0xff]  }
 0x436   : > { %v6398_v18 = vpop.f32.mrf.mxu0  ;;  %v6438_v37 = vpop.f32.mrf.mxu1  ;;  %6691 = vmatprep.subr.bf16.mxu0 %v9574_v35  ;;  %v9623_v28 = vld [vmem:[#allocation13 + $0x9a8] ss:$16 sps:$4 sm:$0xff]   ;;  %v9637_v35 = vld [vmem:[#allocation13 + $0x96c] ss:$16 sps:$4 sm:$0xff]  }
 0x437   : > { %6731 = vmatpush1.bf16.msra.mxu1 %v9569_v54  ;;  %v9626_v32 = vld [vmem:[#allocation13 + $0x788] ss:$16 sps:$4 sm:$0xff]   ;;  %v9640_v54 = vld [vmem:[#allocation13 + $0x74c] ss:$16 sps:$4 sm:$0xff]  }
 0x438   : > { %v6439_v9 = vpop.f32.mrf.mxu1  ;;  %6732 = vmatprep.subr.bf16.mxu1 %v9577_v30  ;;  %v9629_v33 = vld [vmem:[#allocation13 + $0x988] ss:$16 sps:$4 sm:$0xff]   ;;  %v9649_v37 = vld [vmem:[#allocation13 + $0x92c] ss:$16 sps:$4 sm:$0xff]  }
 0x439   : > { %6692 = vmatpush1.bf16.msra.mxu0 %v9572_v6  ;;  %v9632_v12 = vld [vmem:[#allocation13 + $0x768] ss:$16 sps:$4 sm:$0xff]   ;;  %v9646_v6 = vld [vmem:[#allocation13 + $0x72c] ss:$16 sps:$4 sm:$0xff]  }
 0x43a   : > { %6693 = vmatprep.subr.bf16.mxu0 %v9580_v38  ;;  %v9635_v58 = vld [vmem:[#allocation13 + $0x968] ss:$16 sps:$4 sm:$0xff]  }
 0x43b   : > { %6733 = vmatpush1.bf16.msra.mxu1 %v9575_v5  ;;  %v9638_v30 = vld [vmem:[#allocation13 + $0x748] ss:$16 sps:$4 sm:$0xff]   ;;  %v9652_v5 = vld [vmem:[#allocation13 + $0x70c] ss:$16 sps:$4 sm:$0xff]  }
 0x43c   : > { %6734 = vmatprep.subr.bf16.mxu1 %v9583_v39  ;;  %v9641_v18 = vld [vmem:[#allocation13 + $0x948] ss:$16 sps:$4 sm:$0xff]   ;;  %v9655_v39 = vld [vmem:[#allocation13 + $0x90c] ss:$16 sps:$4 sm:$0xff]  }
 0x43d   : > { %6694 = vmatpush1.bf16.msra.mxu0 %v9578_v10  ;;  %v9644_v38 = vld [vmem:[#allocation13 + $0x728] ss:$16 sps:$4 sm:$0xff]  }
 0x43e   : > { %6695 = vmatprep.subr.bf16.mxu0 %v9586_v40  ;;  %v9647_v9 = vld [vmem:[#allocation13 + $0x928] ss:$16 sps:$4 sm:$0xff]   ;;  %v9658_v40 = vld [vmem:[#allocation13 + $0xaec] ss:$16 sps:$4 sm:$0xff]  }
 0x43f   : > { %6735 = vmatpush1.bf16.msra.mxu1 %v9581_v41  ;;  %v9650_v10 = vld [vmem:[#allocation13 + $0x708] ss:$16 sps:$4 sm:$0xff]  }
 0x440   : > { %6736 = vmatprep.subr.bf16.mxu1 %v9589_v42  ;;  %v9653_v41 = vld [vmem:[#allocation13 + $0x908] ss:$16 sps:$4 sm:$0xff]   ;;  %v9661_v42 = vld [vmem:[#allocation13 + $0xcec] ss:$16 sps:$4 sm:$0xff]  }
 0x441   : > { %6696 = vmatpush1.bf16.msra.mxu0 %v9584_v26  ;;  %v9656_v26 = vld [vmem:[#allocation13 + $0xae8] ss:$16 sps:$4 sm:$0xff]  }
 0x442   : > { %6697 = vmatprep.subr.bf16.mxu0 %v9592_v44  ;;  %v9664_v44 = vld [vmem:[#allocation13 + $0xacc] ss:$16 sps:$4 sm:$0xff]  }
 0x443   : > { %6737 = vmatpush1.bf16.msra.mxu1 %v9587_v16  ;;  %v9659_v16 = vld [vmem:[#allocation13 + $0xce8] ss:$16 sps:$4 sm:$0xff]  }
 0x444   : > { %6738 = vmatprep.subr.bf16.mxu1 %v9595_v47 }
 0x445   : > { %6698 = vmatpush1.bf16.msra.mxu0 %v9590_v45  ;;  %v9667_v45 = vld [vmem:[#allocation13 + $0xccc] ss:$16 sps:$4 sm:$0xff]  }
 0x446   : > { %6699 = vmatprep.subr.bf16.mxu0 %v9598_v46 }
 0x447   : > { %6739 = vmatpush1.bf16.msra.mxu1 %v9593_v48  ;;  %v9662_v48 = vld [vmem:[#allocation13 + $0xac8] ss:$16 sps:$4 sm:$0xff]  }
 0x448   : > { %6740 = vmatprep.subr.bf16.mxu1 %v9601_v23 }
 0x449   : > { %6700 = vmatpush1.bf16.msra.mxu0 %v9596_v31 }
 0x44a   : > { %6701 = vmatprep.subr.bf16.mxu0 %v9604_v51  ;;  %v9670_v51 = vld [vmem:[#allocation13 + $0xaac] ss:$16 sps:$4 sm:$0xff]  }
 0x44b   : > { %6741 = vmatpush1.bf16.msra.mxu1 %v9599_v53 }
 0x44c   : > { %6742 = vmatprep.subr.bf16.mxu1 %v9607_v57 }
 0x44d   : > { %6702 = vmatpush1.bf16.msra.mxu0 %v9602_v60 }
 0x44e   : > { %6703 = vmatprep.subr.bf16.mxu0 %v9610_v62  ;;  %v9673_v62 = vld [vmem:[#allocation13 + $0xcac] ss:$16 sps:$4 sm:$0xff]  }
 0x44f   : > { %6743 = vmatpush1.bf16.msra.mxu1 %v9605_v20  ;;  %v9668_v20 = vld [vmem:[#allocation13 + $0xaa8] ss:$16 sps:$4 sm:$0xff]  }
 0x450   : > { %6744 = vmatprep.subr.bf16.mxu1 %v9613_v25 }
 0x451   : > { %6704 = vmatpush2.bf16.msra.mxu0 %v9608_v63  ;;  %v9676_v63 = vld [vmem:[#allocation13 + $0xa8c] ss:$16 sps:$4 sm:$0xff]  }
 0x452   : > { %6705 = vmatprep.subr.bf16.mxu0 %v9616_v2 }
 0x453   : > { %6745 = vmatpush2.bf16.msra.mxu1 %v9611_v29  ;;  %v9679_v29 = vld [vmem:[#allocation13 + $0xc8c] ss:$16 sps:$4 sm:$0xff]  }
 0x454   : > { %6746 = vmatprep.subr.bf16.mxu1 %v9619_v13  ;;  %v9682_v13 = vld [vmem:[#allocation13 + $0xa6c] ss:$16 sps:$4 sm:$0xff]  }
 0x455   : > { %6706 = vmatpush2.bf16.msra.mxu0 %v9614_v17  ;;  %v9677_v17 = vld [vmem:[#allocation13 + $0xc88] ss:$16 sps:$4 sm:$0xff]  }
 0x456   : > { %6707 = vmatprep.subr.bf16.mxu0 %v9622_v4  ;;  %v9685_v4 = vld [vmem:[#allocation13 + $0xc6c] ss:$16 sps:$4 sm:$0xff]  }
 0x457   : > { %6747 = vmatpush2.bf16.msra.mxu1 %v9617_v21  ;;  %v9680_v21 = vld [vmem:[#allocation13 + $0xa68] ss:$16 sps:$4 sm:$0xff]  }
 0x458   : > { %6748 = vmatprep.subr.bf16.mxu1 %v9625_v0  ;;  %v9688_v0 = vld [vmem:[#allocation13 + $0xa4c] ss:$16 sps:$4 sm:$0xff]  }
 0x459   : > { %6708 = vmatpush2.bf16.msra.mxu0 %v9620_v27  ;;  %v9683_v27 = vld [vmem:[#allocation13 + $0xc68] ss:$16 sps:$4 sm:$0xff]  }
 0x45a   : > { %6709 = vmatprep.subr.bf16.mxu0 %v9628_v1  ;;  %v9691_v1 = vld [vmem:[#allocation13 + $0xc4c] ss:$16 sps:$4 sm:$0xff]  }
 0x45b   : > { %6749 = vmatpush2.bf16.msra.mxu1 %v9623_v28  ;;  %v9686_v28 = vld [vmem:[#allocation13 + $0xa48] ss:$16 sps:$4 sm:$0xff]  }
 0x45c   : > { %6750 = vmatprep.subr.bf16.mxu1 %v9631_v19  ;;  %v9694_v19 = vld [vmem:[#allocation13 + $0xa2c] ss:$16 sps:$4 sm:$0xff]  }
 0x45d   : > { %6710 = vmatpush2.bf16.msra.mxu0 %v9626_v32  ;;  %v9689_v32 = vld [vmem:[#allocation13 + $0xc48] ss:$16 sps:$4 sm:$0xff]  }
 0x45e   : > { %6711 = vmatprep.subr.bf16.mxu0 %v9634_v24  ;;  %v9697_v24 = vld [vmem:[#allocation13 + $0xc2c] ss:$16 sps:$4 sm:$0xff]  }
 0x45f   : > { %6751 = vmatpush2.bf16.msra.mxu1 %v9629_v33  ;;  %v9692_v33 = vld [vmem:[#allocation13 + $0xa28] ss:$16 sps:$4 sm:$0xff]  }
 0x460   : > { %6752 = vmatprep.subr.bf16.mxu1 %v9637_v35  ;;  %v9700_v35 = vld [vmem:[#allocation13 + $0xa0c] ss:$16 sps:$4 sm:$0xff]  }
 0x461   : > { %6712 = vmatpush2.bf16.msra.mxu0 %v9632_v12  ;;  %v9695_v12 = vld [vmem:[#allocation13 + $0xc28] ss:$16 sps:$4 sm:$0xff]  }
 0x462   : > { %6713 = vmatprep.subr.bf16.mxu0 %v9640_v54  ;;  %v9703_v54 = vld [vmem:[#allocation13 + $0xc0c] ss:$16 sps:$4 sm:$0xff]  }
 0x463   : > { %6753 = vmatpush2.bf16.msra.mxu1 %v9635_v58  ;;  %v9698_v58 = vld [vmem:[#allocation13 + $0xa08] ss:$16 sps:$4 sm:$0xff]  }
 0x464   : > { %6754 = vmatprep.subr.bf16.mxu1 %v9643_v7  ;;  %v9706_v7 = vld [vmem:[#allocation13 + $0xbec] ss:$16 sps:$4 sm:$0xff]  }
 0x465   : > { %6714 = vmatpush2.bf16.msra.mxu0 %v9638_v30  ;;  %v9701_v30 = vld [vmem:[#allocation13 + $0xc08] ss:$16 sps:$4 sm:$0xff]  }
 0x466   : > { %6715 = vmatprep.subr.bf16.mxu0 %v9646_v6  ;;  %v9709_v6 = vld [vmem:[#allocation13 + $0xdec] ss:$16 sps:$4 sm:$0xff]  }
 0x467   : > { %6755 = vmatpush2.bf16.msra.mxu1 %v9641_v18  ;;  %v9704_v18 = vld [vmem:[#allocation13 + $0xbe8] ss:$16 sps:$4 sm:$0xff]  }
 0x468   : > { %6756 = vmatprep.subr.bf16.mxu1 %v9649_v37  ;;  %v9712_v37 = vld [vmem:[#allocation13 + $0xbcc] ss:$16 sps:$4 sm:$0xff]  }
 0x469   : > { %6716 = vmatpush2.bf16.msra.mxu0 %v9644_v38  ;;  %v9707_v38 = vld [vmem:[#allocation13 + $0xde8] ss:$16 sps:$4 sm:$0xff]  }
 0x46a   : > { %6717 = vmatprep.subr.bf16.mxu0 %v9652_v5  ;;  %v9715_v5 = vld [vmem:[#allocation13 + $0xdcc] ss:$16 sps:$4 sm:$0xff]  }
 0x46b   : > { %6757 = vmatpush2.bf16.msra.mxu1 %v9647_v9  ;;  %v9710_v9 = vld [vmem:[#allocation13 + $0xbc8] ss:$16 sps:$4 sm:$0xff]  }
 0x46c   : > { %6758 = vmatprep.subr.bf16.mxu1 %v9655_v39  ;;  %v9718_v39 = vld [vmem:[#allocation13 + $0xbac] ss:$16 sps:$4 sm:$0xff]  }
 0x46d   : > { %6718 = vmatpush2.bf16.msra.mxu0 %v9650_v10  ;;  %v9713_v10 = vld [vmem:[#allocation13 + $0xdc8] ss:$16 sps:$4 sm:$0xff]  }
 0x46e   : > { %6769 = vmatprep.subr.bf16.mxu0 %v9658_v40  ;;  %v9721_v40 = vld [vmem:[#allocation13 + $0xdac] ss:$16 sps:$4 sm:$0xff]  }
 0x46f   : > { %6759 = vmatpush2.bf16.msra.mxu1 %v9653_v41  ;;  %v9716_v41 = vld [vmem:[#allocation13 + $0xba8] ss:$16 sps:$4 sm:$0xff]  }
 0x470   : > { %v6475_v47 = vpop.f32.mrf.mxu0  ;;  %6720 = vmatmul.mubr.bf16.vlgmr.msra.gmra.mxu0 %v11311_v22  ;;  %6810 = vmatprep.subr.bf16.mxu1 %v9661_v42  ;;  %v9665_v22 = vld [vmem:[#allocation13 + $0xcc8] ss:$16 sps:$4 sm:$0xff]   ;;  %v9724_v42 = vld [vmem:[#allocation13 + $0xb8c] ss:$16 sps:$4 sm:$0xff]  }
 0x471   : > { %v6476_v46 = vadd.f32 %v6475_v47, %v11417_v15  ;;  %6770 = vmatpush1.bf16.msra.mxu0 %v9656_v26  ;;  %6801 = vmatprep.mubr.bf16.mxu0 %v11345_v49  ;;  %v9719_v26 = vld [vmem:[#allocation13 + $0xda8] ss:$16 sps:$4 sm:$0xff]   ;;  %v9730_v47 = vld [vmem:[#allocation13 + $0xb6c] ss:$16 sps:$4 sm:$0xff]  }
 0x472   : > { %v6477_v23 = vpop.f32.mrf.mxu0  ;;  %v6516_v31 = vpop.f32.mrf.mxu1  ;;  %6761 = vmatmul.mubr.bf16.vlgmr.msra.gmra.mxu1 %v11335_v8  ;;  %6771 = vmatprep.subr.bf16.mxu0 %v9664_v44  ;;  %v9727_v44 = vld [vmem:[#allocation13 + $0xd8c] ss:$16 sps:$4 sm:$0xff]  }
 0x473   : > { %v6478_v53 = vadd.f32 %v6477_v23, %v11420_v36  ;;  %v11427_v57 = vadd.f32 %v6516_v31, %v6476_v46  ;;  %6811 = vmatpush1.bf16.msra.mxu1 %v9659_v16  ;;  %6842 = vmatprep.mubr.bf16.mxu1 %v11348_v14  ;;  %v9671_v36 = vld [vmem:[#allocation13 + $0xca8] ss:$16 sps:$4 sm:$0xff]   ;;  %v9733_v46 = vld [vmem:[#allocation13 + $0xd6c] ss:$16 sps:$4 sm:$0xff]  }
 0x474   : > { %v6479_v60 = vpop.f32.mrf.mxu0  ;;  %v6518_v15 = vpop.f32.mrf.mxu1  ;;  %6812 = vmatprep.subr.bf16.mxu1 %v9667_v45  ;;  %v9674_v14 = vld [vmem:[#allocation13 + $0xa88] ss:$16 sps:$4 sm:$0xff]   ;;  %v9736_v23 = vld [vmem:[#allocation13 + $0xb4c] ss:$16 sps:$4 sm:$0xff]  }
 0x475   : > { %v11430_v49 = vadd.f32 %v6518_v15, %v6478_v53  ;;  %6772 = vmatpush1.bf16.msra.mxu0 %v9662_v48  ;;  %v9722_v16 = vld [vmem:[#allocation13 + $0xb88] ss:$16 sps:$4 sm:$0xff]   ;;  %v9745_v15 = vld [vmem:[#allocation13 + $0xd2c] ss:$16 sps:$4 sm:$0xff]  }
 0x476   : > { %v6480_v25 = vpop.f32.mrf.mxu0  ;;  %v6520_v8 = vpop.f32.mrf.mxu1  ;;  %6773 = vmatprep.subr.bf16.mxu0 %v9670_v51  ;;  %v9725_v45 = vld [vmem:[#allocation13 + $0xd88] ss:$16 sps:$4 sm:$0xff]   ;;  %v9739_v51 = vld [vmem:[#allocation13 + $0xd4c] ss:$16 sps:$4 sm:$0xff]  }
 0x477   : > { %6813 = vmatpush1.bf16.msra.mxu1 %v9665_v22  ;;  %v9728_v48 = vld [vmem:[#allocation13 + $0xb68] ss:$16 sps:$4 sm:$0xff]   ;;  %v9742_v22 = vld [vmem:[#allocation13 + $0xb2c] ss:$16 sps:$4 sm:$0xff]  }
 0x478   : > { %v6521_v2 = vpop.f32.mrf.mxu1  ;;  %6814 = vmatprep.subr.bf16.mxu1 %v9673_v62  ;;  %v9731_v31 = vld [vmem:[#allocation13 + $0xd68] ss:$16 sps:$4 sm:$0xff]   ;;  %v9751_v8 = vld [vmem:[#allocation13 + $0xd0c] ss:$16 sps:$4 sm:$0xff]  }
 0x479   : > { %6774 = vmatpush1.bf16.msra.mxu0 %v9668_v20  ;;  %v9734_v53 = vld [vmem:[#allocation13 + $0xb48] ss:$16 sps:$4 sm:$0xff]   ;;  %v9748_v20 = vld [vmem:[#allocation13 + $0xb0c] ss:$16 sps:$4 sm:$0xff]  }
 0x47a   : > { %6775 = vmatprep.subr.bf16.mxu0 %v9676_v63  ;;  %v9737_v60 = vld [vmem:[#allocation13 + $0xd48] ss:$16 sps:$4 sm:$0xff]  }
 0x47b   : > { %6815 = vmatpush1.bf16.msra.mxu1 %v9671_v36  ;;  %v9740_v62 = vld [vmem:[#allocation13 + $0xb28] ss:$16 sps:$4 sm:$0xff]   ;;  %v9754_v36 = vld [vmem:[#allocation13 + $0xeec] ss:$16 sps:$4 sm:$0xff]  }
 0x47c   : > { %6816 = vmatprep.subr.bf16.mxu1 %v9679_v29  ;;  %v9743_v25 = vld [vmem:[#allocation13 + $0xd28] ss:$16 sps:$4 sm:$0xff]   ;;  %v9757_v29 = vld [vmem:[#allocation13 + $0x10ec] ss:$16 sps:$4 sm:$0xff]  }
 0x47d   : > { %6776 = vmatpush1.bf16.msra.mxu0 %v9674_v14  ;;  %v9746_v63 = vld [vmem:[#allocation13 + $0xb08] ss:$16 sps:$4 sm:$0xff]  }
 0x47e   : > { %6777 = vmatprep.subr.bf16.mxu0 %v9682_v13  ;;  %v9749_v2 = vld [vmem:[#allocation13 + $0xd08] ss:$16 sps:$4 sm:$0xff]   ;;  %v9760_v13 = vld [vmem:[#allocation13 + $0xecc] ss:$16 sps:$4 sm:$0xff]  }
 0x47f   : > { %6817 = vmatpush1.bf16.msra.mxu1 %v9677_v17  ;;  %v9752_v14 = vld [vmem:[#allocation13 + $0xee8] ss:$16 sps:$4 sm:$0xff]  }
 0x480   : > { %6818 = vmatprep.subr.bf16.mxu1 %v9685_v4  ;;  %v9755_v17 = vld [vmem:[#allocation13 + $0x10e8] ss:$16 sps:$4 sm:$0xff]  }
 0x481   : > { %6778 = vmatpush1.bf16.msra.mxu0 %v9680_v21  ;;  %v9763_v21 = vld [vmem:[#allocation13 + $0x10cc] ss:$16 sps:$4 sm:$0xff]  }
 0x482   : > { %6779 = vmatprep.subr.bf16.mxu0 %v9688_v0 }
 0x483   : > { %6819 = vmatpush1.bf16.msra.mxu1 %v9683_v27  ;;  %v9758_v27 = vld [vmem:[#allocation13 + $0xec8] ss:$16 sps:$4 sm:$0xff]  }
 0x484   : > { %6820 = vmatprep.subr.bf16.mxu1 %v9691_v1 }
 0x485   : > { %6780 = vmatpush1.bf16.msra.mxu0 %v9686_v28 }
 0x486   : > { %6781 = vmatprep.subr.bf16.mxu0 %v9694_v19  ;;  %v9766_v19 = vld [vmem:[#allocation13 + $0xeac] ss:$16 sps:$4 sm:$0xff]  }
 0x487   : > { %6821 = vmatpush1.bf16.msra.mxu1 %v9689_v32  ;;  %v9761_v32 = vld [vmem:[#allocation13 + $0x10c8] ss:$16 sps:$4 sm:$0xff]  }
 0x488   : > { %6822 = vmatprep.subr.bf16.mxu1 %v9697_v24 }
 0x489   : > { %6782 = vmatpush1.bf16.msra.mxu0 %v9692_v33 }
 0x48a   : > { %6783 = vmatprep.subr.bf16.mxu0 %v9700_v35 }
 0x48b   : > { %6823 = vmatpush1.bf16.msra.mxu1 %v9695_v12  ;;  %v9772_v12 = vld [vmem:[#allocation13 + $0xe8c] ss:$16 sps:$4 sm:$0xff]  }
 0x48c   : > { %6824 = vmatprep.subr.bf16.mxu1 %v9703_v54  ;;  %v9767_v54 = vld [vmem:[#allocation13 + $0x10a8] ss:$16 sps:$4 sm:$0xff]  }
 0x48d   : > { %6784 = vmatpush1.bf16.msra.mxu0 %v9698_v58  ;;  %v9775_v58 = vld [vmem:[#allocation13 + $0x108c] ss:$16 sps:$4 sm:$0xff]  }
 0x48e   : > { %6785 = vmatprep.subr.bf16.mxu0 %v9706_v7  ;;  %v9770_v7 = vld [vmem:[#allocation13 + $0xe88] ss:$16 sps:$4 sm:$0xff]  }
 0x48f   : > { %6825 = vmatpush1.bf16.msra.mxu1 %v9701_v30  ;;  %v9773_v30 = vld [vmem:[#allocation13 + $0x1088] ss:$16 sps:$4 sm:$0xff]  }
 0x490   : > { %6826 = vmatprep.subr.bf16.mxu1 %v9709_v6  ;;  %v9781_v6 = vld [vmem:[#allocation13 + $0x106c] ss:$16 sps:$4 sm:$0xff]  }
 0x491   : > { %6786 = vmatpush2.bf16.msra.mxu0 %v9704_v18  ;;  %v9776_v18 = vld [vmem:[#allocation13 + $0xe68] ss:$16 sps:$4 sm:$0xff]  }
 0x492   : > { %6787 = vmatprep.subr.bf16.mxu0 %v9712_v37  ;;  %v9784_v37 = vld [vmem:[#allocation13 + $0xe4c] ss:$16 sps:$4 sm:$0xff]  }
 0x493   : > { %6827 = vmatpush2.bf16.msra.mxu1 %v9707_v38  ;;  %v9779_v38 = vld [vmem:[#allocation13 + $0x1068] ss:$16 sps:$4 sm:$0xff]  }
 0x494   : > { %6828 = vmatprep.subr.bf16.mxu1 %v9715_v5  ;;  %v9787_v5 = vld [vmem:[#allocation13 + $0x104c] ss:$16 sps:$4 sm:$0xff]  }
 0x495   : > { %6788 = vmatpush2.bf16.msra.mxu0 %v9710_v9  ;;  %v9782_v9 = vld [vmem:[#allocation13 + $0xe48] ss:$16 sps:$4 sm:$0xff]  }
 0x496   : > { %6789 = vmatprep.subr.bf16.mxu0 %v9718_v39  ;;  %v9790_v39 = vld [vmem:[#allocation13 + $0xe2c] ss:$16 sps:$4 sm:$0xff]  }
 0x497   : > { %6829 = vmatpush2.bf16.msra.mxu1 %v9713_v10  ;;  %v9785_v10 = vld [vmem:[#allocation13 + $0x1048] ss:$16 sps:$4 sm:$0xff]  }
 0x498   : > { %6830 = vmatprep.subr.bf16.mxu1 %v9721_v40  ;;  %v9793_v40 = vld [vmem:[#allocation13 + $0x102c] ss:$16 sps:$4 sm:$0xff]  }
 0x499   : > { %6790 = vmatpush2.bf16.msra.mxu0 %v9716_v41  ;;  %v9788_v41 = vld [vmem:[#allocation13 + $0xe28] ss:$16 sps:$4 sm:$0xff]  }
 0x49a   : > { %6791 = vmatprep.subr.bf16.mxu0 %v9724_v42  ;;  %v9796_v42 = vld [vmem:[#allocation13 + $0xe0c] ss:$16 sps:$4 sm:$0xff]  }
 0x49b   : > { %6831 = vmatpush2.bf16.msra.mxu1 %v9719_v26  ;;  %v9791_v26 = vld [vmem:[#allocation13 + $0x1028] ss:$16 sps:$4 sm:$0xff]  }
 0x49c   : > { %6832 = vmatprep.subr.bf16.mxu1 %v9727_v44  ;;  %v9799_v44 = vld [vmem:[#allocation13 + $0x100c] ss:$16 sps:$4 sm:$0xff]  }
 0x49d   : > { %6792 = vmatpush2.bf16.msra.mxu0 %v9722_v16  ;;  %v9794_v16 = vld [vmem:[#allocation13 + $0xe08] ss:$16 sps:$4 sm:$0xff]  }
 0x49e   : > { %6793 = vmatprep.subr.bf16.mxu0 %v9730_v47  ;;  %v9802_v47 = vld [vmem:[#allocation13 + $0xfec] ss:$16 sps:$4 sm:$0xff]  }
 0x49f   : > { %6833 = vmatpush2.bf16.msra.mxu1 %v9725_v45  ;;  %v9797_v45 = vld [vmem:[#allocation13 + $0x1008] ss:$16 sps:$4 sm:$0xff]  }
 0x4a0   : > { %6834 = vmatprep.subr.bf16.mxu1 %v9733_v46  ;;  %v9805_v46 = vld [vmem:[#allocation13 + $0x11ec] ss:$16 sps:$4 sm:$0xff]  }
 0x4a1   : > { %6794 = vmatpush2.bf16.msra.mxu0 %v9728_v48  ;;  %v9800_v48 = vld [vmem:[#allocation13 + $0xfe8] ss:$16 sps:$4 sm:$0xff]  }
 0x4a2   : > { %6795 = vmatprep.subr.bf16.mxu0 %v9736_v23  ;;  %v9808_v23 = vld [vmem:[#allocation13 + $0xfcc] ss:$16 sps:$4 sm:$0xff]  }
 0x4a3   : > { %6835 = vmatpush2.bf16.msra.mxu1 %v9731_v31  ;;  %v9803_v31 = vld [vmem:[#allocation13 + $0x11e8] ss:$16 sps:$4 sm:$0xff]  }
 0x4a4   : > { %6836 = vmatprep.subr.bf16.mxu1 %v9739_v51  ;;  %v9811_v51 = vld [vmem:[#allocation13 + $0x11cc] ss:$16 sps:$4 sm:$0xff]  }
 0x4a5   : > { %6796 = vmatpush2.bf16.msra.mxu0 %v9734_v53  ;;  %v9806_v53 = vld [vmem:[#allocation13 + $0xfc8] ss:$16 sps:$4 sm:$0xff]  }
 0x4a6   : > { %6797 = vmatprep.subr.bf16.mxu0 %v9742_v22  ;;  %v9814_v22 = vld [vmem:[#allocation13 + $0xfac] ss:$16 sps:$4 sm:$0xff]  }
 0x4a7   : > { %6837 = vmatpush2.bf16.msra.mxu1 %v9737_v60  ;;  %v9809_v60 = vld [vmem:[#allocation13 + $0x11c8] ss:$16 sps:$4 sm:$0xff]  }
 0x4a8   : > { %6838 = vmatprep.subr.bf16.mxu1 %v9745_v15  ;;  %v9817_v15 = vld [vmem:[#allocation13 + $0x11ac] ss:$16 sps:$4 sm:$0xff]  }
 0x4a9   : > { %6798 = vmatpush2.bf16.msra.mxu0 %v9740_v62  ;;  %v9812_v62 = vld [vmem:[#allocation13 + $0xfa8] ss:$16 sps:$4 sm:$0xff]  }
 0x4aa   : > { %6799 = vmatprep.subr.bf16.mxu0 %v9748_v20  ;;  %v9820_v20 = vld [vmem:[#allocation13 + $0xf8c] ss:$16 sps:$4 sm:$0xff]  }
 0x4ab   : > { %6839 = vmatpush2.bf16.msra.mxu1 %v9743_v25  ;;  %v9815_v25 = vld [vmem:[#allocation13 + $0x11a8] ss:$16 sps:$4 sm:$0xff]  }
 0x4ac   : > { %6840 = vmatprep.subr.bf16.mxu1 %v9751_v8  ;;  %v9823_v8 = vld [vmem:[#allocation13 + $0x118c] ss:$16 sps:$4 sm:$0xff]  }
 0x4ad   : > { %6800 = vmatpush2.bf16.msra.mxu0 %v9746_v63  ;;  %v9818_v63 = vld [vmem:[#allocation13 + $0xf88] ss:$16 sps:$4 sm:$0xff]  }
 0x4ae   : > { %6851 = vmatprep.subr.bf16.mxu0 %v9754_v36  ;;  %v9826_v36 = vld [vmem:[#allocation13 + $0xf6c] ss:$16 sps:$4 sm:$0xff]  }
 0x4af   : > { %6841 = vmatpush2.bf16.msra.mxu1 %v9749_v2  ;;  %v9821_v2 = vld [vmem:[#allocation13 + $0x1188] ss:$16 sps:$4 sm:$0xff]  }
 0x4b0   : > { %v6557_v4 = vpop.f32.mrf.mxu0  ;;  %6802 = vmatmul.mubr.bf16.vlgmr.msra.gmra.mxu0 %v11353_v34  ;;  %6892 = vmatprep.subr.bf16.mxu1 %v9757_v29  ;;  %v9829_v29 = vld [vmem:[#allocation13 + $0x116c] ss:$16 sps:$4 sm:$0xff]  }
 0x4b1   : > { %v11434_v0 = vadd.f32 %v6557_v4, %v11427_v57  ;;  %6852 = vmatpush1.bf16.msra.mxu0 %v9752_v14  ;;  %6883 = vmatprep.mubr.bf16.mxu0 %v11358_v55  ;;  %v9769_v57 = vld [vmem:[#allocation13 + $0x10ac] ss:$16 sps:$4 sm:$0xff]   ;;  %v9764_v55 = vld [vmem:[#allocation13 + $0xea8] ss:$16 sps:$4 sm:$0xff]  }
 0x4b2   : > { %v11437_v1 = vpop.f32.mrf.mxu0  ;;  %v11439_v28 = vpop.f32.mrf.mxu1  ;;  %6843 = vmatmul.mubr.bf16.vlgmr.msra.gmra.mxu1 %v11379_v52  ;;  %6853 = vmatprep.subr.bf16.mxu0 %v9760_v13  ;;  %v9824_v14 = vld [vmem:[#allocation13 + $0xf68] ss:$16 sps:$4 sm:$0xff]   ;;  %v11445_v13 = vld [vmem:[#allocation14] sm:$0xf] }
 0x4b3   : > { %6893 = vmatpush1.bf16.msra.mxu1 %v9755_v17  ;;  %6924 = vmatprep.mubr.bf16.mxu1 %v11382_v56  ;;  %v9778_v56 = vld [vmem:[#allocation13 + $0xe6c] ss:$16 sps:$4 sm:$0xff]   ;;  %v6560_v4 = vadd.f32 %v11437_v1, %v11430_v49  ;;  %v9836_v1 = vld [vmem:[#allocation13 + $0xf28] ss:$16 sps:$4 sm:$0xff]  }
 0x4b4   : > { %v6561_v34 = vpop.f32.mrf.mxu0  ;;  %v11443_v24 = vpop.f32.mrf.mxu1  ;;  %6894 = vmatprep.subr.bf16.mxu1 %v9763_v21  ;;  %v9832_v17 = vld [vmem:[#allocation13 + $0xf4c] ss:$16 sps:$4 sm:$0xff]   ;;  %v6941_v21 = vrot.slane %v11445_v13, %v11320_v11 }
 0x4b5   : > { %6854 = vmatpush1.bf16.msra.mxu0 %v9758_v27  ;;  %v9827_v27 = vld [vmem:[#allocation13 + $0x1168] ss:$16 sps:$4 sm:$0xff]   ;;  %v11451_v34 = vld [vmem:[#allocation16] sm:$0xf]  ;;  %v9841_v49 = vld [vmem:[#allocation13 + $0x112c] ss:$16 sps:$4 sm:$0xff]  }
 0x4b6   : > { %v6562_v33 = vpop.f32.mrf.mxu0  ;;  %v6602_v35 = vpop.f32.mrf.mxu1  ;;  %6855 = vmatprep.subr.bf16.mxu0 %v9766_v19  ;;  %v9835_v19 = vld [vmem:[#allocation13 + $0x114c] ss:$16 sps:$4 sm:$0xff]  }
 0x4b7   : > { %6895 = vmatpush1.bf16.msra.mxu1 %v9761_v32  ;;  %v9830_v32 = vld [vmem:[#allocation13 + $0xf48] ss:$16 sps:$4 sm:$0xff]   ;;  %v6966_v33 = vrot.slane %v11451_v34, %v11320_v11 }
 0x4b8   : > { %v6603_v52 = vpop.f32.mrf.mxu1  ;;  %6896 = vmatprep.subr.bf16.mxu1 %v9769_v57  ;;  %v9838_v57 = vld [vmem:[#allocation13 + $0xf2c] ss:$16 sps:$4 sm:$0xff]   ;;  %v9833_v35 = vld [vmem:[#allocation13 + $0x1148] ss:$16 sps:$4 sm:$0xff]  }
 0x4b9   : > { %6856 = vmatpush1.bf16.msra.mxu0 %v9764_v55  ;;  %v6955_v55 = vmul.f32 %v6941_v21, %v6560_v4  ;;  %v9839_v52 = vld [vmem:[#allocation13 + $0x1128] ss:$16 sps:$4 sm:$0xff]  }
 0x4ba   : > { %6857 = vmatprep.subr.bf16.mxu0 %v9772_v12  ;;  %v9844_v12 = vld [vmem:[#allocation13 + $0xf0c] ss:$16 sps:$4 sm:$0xff]  }
 0x4bb   : > { %6897 = vmatpush1.bf16.msra.mxu1 %v9767_v54  ;;  %v6980_v54 = vadd.f32 %v6966_v33, %v6955_v55  ;;  %v9848_v11 = vld [vmem:[%s11656_s10 + $0x78] sm:$0xff]   ;;  %v9874_v33 = vld [vmem:[%s11656_s10 + $0xd0] sm:$0xff]  }
 0x4bc   : > { %6898 = vmatprep.subr.bf16.mxu1 %v9775_v58  ;;  %v9847_v58 = vld [vmem:[#allocation13 + $0x110c] ss:$16 sps:$4 sm:$0xff]  }
 0x4bd   : > { %6858 = vmatpush1.bf16.msra.mxu0 %v9770_v7  ;;  %v9842_v7 = vld [vmem:[#allocation13 + $0xf08] ss:$16 sps:$4 sm:$0xff]  }
 0x4be   : > { %6859 = vmatprep.subr.bf16.mxu0 %v9778_v56  ;;  %v9845_v56 = vld [vmem:[#allocation13 + $0x1108] ss:$16 sps:$4 sm:$0xff]  }
 0x4bf   : > { %6899 = vmatpush1.bf16.msra.mxu1 %v9773_v30  ;;  %v6984_v30 = vmax.f32 %v6980_v54, 0.0  ;;  %v9872_v21 = vld [vmem:[%s11656_s10 + $0xd8] sm:$0xff]  }
 0x4c0   : > { %6900 = vmatprep.subr.bf16.mxu1 %v9781_v6  ;;  %v9849_v6 = vld [vmem:[%s11656_s10 + $0x38] sm:$0xff]  }
 0x4c1   : > { %6860 = vmatpush1.bf16.msra.mxu0 %v9776_v18  ;;  %v9850_v18 = vld [vmem:[%s11656_s10 + $0x70] sm:$0xff]  }
 0x4c2   : > { %6861 = vmatprep.subr.bf16.mxu0 %v9784_v37  ;;  %v7000_v37 = vpack.c.bf16 %v6984_v30, %v6984_v30 }
 0x4c3   : > { %6901 = vmatpush1.bf16.msra.mxu1 %v9779_v38 }
 0x4c4   : > { %6902 = vmatprep.subr.bf16.mxu1 %v9787_v5 }
 0x4c5   : > { %6862 = vmatpush1.bf16.msra.mxu0 %v9782_v9  ;;  %v9851_v9 = vld [vmem:[%s11656_s10 + $0x30] sm:$0xff]  }
 0x4c6   : > { %6863 = vmatprep.subr.bf16.mxu0 %v9790_v39 }
 0x4c7   : > { %6903 = vmatpush1.bf16.msra.mxu1 %v9785_v10 }
 0x4c8   : > { %6904 = vmatprep.subr.bf16.mxu1 %v9793_v40  ;;  %v9852_v40 = vld [vmem:[%s11656_s10 + $0x68] sm:$0xff]  }
 0x4c9   : > { %6864 = vmatpush1.bf16.msra.mxu0 %v9788_v41 }
 0x4ca   : > { %6865 = vmatprep.subr.bf16.mxu0 %v9796_v42 }
 0x4cb   : > { %6905 = vmatpush1.bf16.msra.mxu1 %v9791_v26 }
 0x4cc   : > { %6906 = vmatprep.subr.bf16.mxu1 %v9799_v44  ;;  %v9853_v44 = vld [vmem:[%s11656_s10 + $0x28] sm:$0xff]  }
 0x4cd   : > { %6866 = vmatpush1.bf16.msra.mxu0 %v9794_v16 }
 0x4ce   : > { %6867 = vmatprep.subr.bf16.mxu0 %v9802_v47 }
 0x4cf   : > { %6907 = vmatpush1.bf16.msra.mxu1 %v9797_v45 }
 0x4d0   : > { %6908 = vmatprep.subr.bf16.mxu1 %v9805_v46  ;;  %v9865_v46 = vld [vmem:[%s11656_s10 + $0xb8] sm:$0xff]  }
 0x4d1   : > { %6868 = vmatpush2.bf16.msra.mxu0 %v9800_v48  ;;  %v9866_v48 = vld [vmem:[%s11656_s10 + $0xf0] sm:$0xff]  }
 0x4d2   : > { %6869 = vmatprep.subr.bf16.mxu0 %v9808_v23  ;;  %v9855_v23 = vld [vmem:[%s11656_s10 + $0x20] sm:$0xff]  }
 0x4d3   : > { %6909 = vmatpush2.bf16.msra.mxu1 %v9803_v31  ;;  %v9856_v31 = vld [vmem:[%s11656_s10 + $0x58] sm:$0xff]  }
 0x4d4   : > { %6910 = vmatprep.subr.bf16.mxu1 %v9811_v51  ;;  %v9867_v51 = vld [vmem:[%s11656_s10 + $0xb0] sm:$0xff]  }
 0x4d5   : > { %6870 = vmatpush2.bf16.msra.mxu0 %v9806_v53  ;;  %v9868_v53 = vld [vmem:[%s11656_s10 + $0xe8] sm:$0xff]  }
 0x4d6   : > { %6871 = vmatprep.subr.bf16.mxu0 %v9814_v22  ;;  %v9857_v22 = vld [vmem:[%s11656_s10 + $0x18] sm:$0xff]  }
 0x4d7   : > { %6911 = vmatpush2.bf16.msra.mxu1 %v9809_v60  ;;  %v6937_v60 = vrot.slane %v11445_v13, %v11316_v59 }
 0x4d8   : > { %6912 = vmatprep.subr.bf16.mxu1 %v9817_v15  ;;  %v9858_v15 = vld [vmem:[%s11656_s10 + $0x50] sm:$0xff]  }
 0x4d9   : > { %6872 = vmatpush2.bf16.msra.mxu0 %v9812_v62  ;;  %v9869_v62 = vld [vmem:[%s11656_s10 + $0xa8] sm:$0xff]  }
 0x4da   : > { %6873 = vmatprep.subr.bf16.mxu0 %v9820_v20  ;;  %v9870_v20 = vld [vmem:[%s11656_s10 + $0xe0] sm:$0xff]  }
 0x4db   : > { %6913 = vmatpush2.bf16.msra.mxu1 %v9815_v25  ;;  %v9859_v25 = vld [vmem:[%s11656_s10 + $0x10] sm:$0xff]  }
 0x4dc   : > { %6914 = vmatprep.subr.bf16.mxu1 %v9823_v8  ;;  %v6954_v8 = vmul.f32 %v6937_v60, %v11434_v0 }
 0x4dd   : > { %6874 = vmatpush2.bf16.msra.mxu0 %v9818_v63  ;;  %v6962_v63 = vrot.slane %v11451_v34, %v11316_v59  ;;  %v9862_v59 = vld [vmem:[%s11656_s10 + $0x40] sm:$0xff]  }
 0x4de   : > { %6875 = vmatprep.subr.bf16.mxu0 %v9826_v36  ;;  %v9860_v36 = vld [vmem:[%s11656_s10 + $0x48] sm:$0xff]  }
 0x4df   : > { %6915 = vmatpush2.bf16.msra.mxu1 %v9821_v2  ;;  %v9871_v2 = vld [vmem:[%s11656_s10 + $0xa0] sm:$0xff]   ;;  %v6979_v0 = vadd.f32 %v6962_v63, %v6954_v8 }
 0x4e0   : > { %6916 = vmatprep.subr.bf16.mxu1 %v9829_v29  ;;  %v9861_v29 = vld [vmem:[%s11656_s10 + $0x8] sm:$0xff]  }
 0x4e1   : > { %6876 = vmatpush2.bf16.msra.mxu0 %v9824_v14  ;;  %v9863_v14 = vld [vmem:[%s11656_s10] sm:$0xff]  }
 0x4e2   : > { %6877 = vmatprep.subr.bf16.mxu0 %v9832_v17  ;;  %v6983_v17 = vmax.f32 %v6979_v0, 0.0 }
 0x4e3   : > { %6917 = vmatpush2.bf16.msra.mxu1 %v9827_v27  ;;  %v9873_v27 = vld [vmem:[%s11656_s10 + $0x98] sm:$0xff]  }
 0x4e4   : > { %6918 = vmatprep.subr.bf16.mxu1 %v9835_v19  ;;  %v6999_v4 = vpack.c.bf16 %v6983_v17, %v6983_v17 }
 0x4e5   : > { %6878 = vmatpush2.bf16.msra.mxu0 %v9830_v32 }
 0x4e6   : > { %6879 = vmatprep.subr.bf16.mxu0 %v9838_v57 }
 0x4e7   : > { %6919 = vmatpush2.bf16.msra.mxu1 %v9833_v35 }
 0x4e8   : > { %6920 = vmatprep.subr.bf16.mxu1 %v9841_v49 }
 0x4e9   : > { %6880 = vmatpush2.bf16.msra.mxu0 %v9836_v1  ;;  %v9875_v1 = vld [vmem:[%s11656_s10 + $0x90] sm:$0xff]  }
 0x4ea   : > { %6881 = vmatprep.subr.bf16.mxu0 %v9844_v12 }
 0x4eb   : > { %6921 = vmatpush2.bf16.msra.mxu1 %v9839_v52 }
 0x4ec   : > { %6922 = vmatprep.subr.bf16.mxu1 %v9847_v58 }
 0x4ed   : > { %6882 = vmatpush2.bf16.msra.mxu0 %v9842_v7 }
 0x4ee   : > { %8500 = vmatprep.subr.bf16.mxu0 %v9848_v11  ;;  %v9876_v11 = vld [vmem:[%s11656_s10 + $0xc8] sm:$0xff]  }
 0x4ef   : > { %6923 = vmatpush2.bf16.msra.mxu1 %v9845_v56  ;;  %v9877_v56 = vld [vmem:[%s11656_s10 + $0x88] sm:$0xff]  }
 0x4f0   : > { %v6639_v38 = vpop.f32.mrf.mxu0  ;;  %6884 = vmatmul.mubr.bf16.vlgmr.msra.gmra.mxu0 %v11387_v61 }
 0x4f1   : > { %v6640_v5 = vadd.f32 %v6639_v38, %v11439_v28  ;;  %8501 = vmatpush3.bf16.msra.mxu0 %v9849_v6  ;;  %7292 = vmatprep.mubr.bf16.mxu0 %v7000_v37  ;;  %v9878_v6 = vld [vmem:[%s11656_s10 + $0xc0] sm:$0xff]   ;;  %v9880_v37 = vld [vmem:[%s11658_s12 + $0x38] sm:$0xff]   ;;  %v9881_v38 = vld [vmem:[%s11658_s12 + $0x30] sm:$0xff]  }
 0x4f2   : > { %v6641_v39 = vpop.f32.mrf.mxu0  ;;  %v6680_v10 = vpop.f32.mrf.mxu1  ;;  %6925 = vmatmul.mubr.bf16.vlgmr.msra.gmra.mxu1 %v11406_v43  ;;  %8502 = vmatprep.subr.bf16.mxu0 %v9850_v18  ;;  %v9854_v43 = vld [vmem:[%s11656_s10 + $0x60] sm:$0xff]  }
 0x4f3   : > { %v6642_v41 = vadd.f32 %v6641_v39, %v11443_v24  ;;  %v6681_v61 = vadd.f32 %v6680_v10, %v6640_v5  ;;  %v9864_v24 = vld [vmem:[%s11656_s10 + $0xf8] sm:$0xff]   ;;  %v9879_v18 = vld [vmem:[%s11656_s10 + $0x80] sm:$0xff]   ;;  %v9882_v5 = vld [vmem:[%s11658_s12 + $0x28] sm:$0xff]  }
 0x4f4   : > { %v6643_v42 = vpop.f32.mrf.mxu0  ;;  %v6682_v28 = vpop.f32.mrf.mxu1  ;;  %8522 = vmatprep.subr.bf16.mxu1 %v9864_v24  ;;  %v9884_v39 = vld [vmem:[%s11658_s12 + $0x18] sm:$0xff]   ;;  %v6948_v24 = vsub.s32 3, %v10458_v3 }
 0x4f5   : > { %v6683_v26 = vadd.f32 %v6682_v28, %v6642_v41  ;;  %8503 = vmatpush3.bf16.msra.mxu0 %v9851_v9  ;;  %8523 = vmatpush3.bf16.msra.mxu1 %v9865_v46  ;;  %v9883_v9 = vld [vmem:[%s11658_s12 + $0x20] sm:$0xff]  }
 0x4f6   : > { %v6644_v16 = vpop.f32.mrf.mxu0  ;;  %v6684_v47 = vpop.f32.mrf.mxu1  ;;  %8504 = vmatprep.subr.bf16.mxu0 %v9852_v40  ;;  %8524 = vmatprep.subr.bf16.mxu1 %v9866_v48 }
 0x4f8   : > { %v6685_v45 = vpop.f32.mrf.mxu1 }
 0x4f9   : > { %8505 = vmatpush3.bf16.msra.mxu0 %v9853_v44  ;;  %8525 = vmatpush3.bf16.msra.mxu1 %v9867_v51 }
 0x4fa   : > { %8506 = vmatprep.subr.bf16.mxu0 %v9854_v43  ;;  %8526 = vmatprep.subr.bf16.mxu1 %v9868_v53  ;;  %v6944_v43 = vsub.s32 2, %v10458_v3 }
 0x4fd   : > { %8507 = vmatpush3.bf16.msra.mxu0 %v9855_v23  ;;  %8527 = vmatpush3.bf16.msra.mxu1 %v9869_v62  ;;  %v6949_v62 = vrot.slane %v11445_v13, %v6948_v24 }
 0x4fe   : > { %8508 = vmatprep.subr.bf16.mxu0 %v9856_v31  ;;  %8528 = vmatprep.subr.bf16.mxu1 %v9870_v20  ;;  %v6945_v31 = vrot.slane %v11445_v13, %v6944_v43 }
 0x501   : > { %8509 = vmatpush3.bf16.msra.mxu0 %v9857_v22  ;;  %8529 = vmatpush3.bf16.msra.mxu1 %v9871_v2 }
 0x502   : > { %8510 = vmatprep.subr.bf16.mxu0 %v9858_v15  ;;  %8530 = vmatprep.subr.bf16.mxu1 %v9872_v21  ;;  %v6970_v15 = vrot.slane %v11451_v34, %v6944_v43 }
 0x505   : > { %8511 = vmatpush3.bf16.msra.mxu0 %v9859_v25  ;;  %8531 = vmatpush3.bf16.msra.mxu1 %v9873_v27 }
 0x506   : > { %8512 = vmatprep.subr.bf16.mxu0 %v9860_v36  ;;  %8532 = vmatprep.subr.bf16.mxu1 %v9874_v33  ;;  %v6974_v36 = vrot.slane %v11451_v34, %v6948_v24  ;;  %v9885_v34 = vld [vmem:[%s11658_s12 + $0x10] sm:$0xff]   ;;  %v9886_v33 = vld [vmem:[%s11658_s12 + $0x8] sm:$0xff]  }
 0x509   : > { %8513 = vmatpush3.bf16.msra.mxu0 %v9861_v29  ;;  %8533 = vmatpush3.bf16.msra.mxu1 %v9875_v1 }
 0x50a   : > { %8514 = vmatprep.subr.bf16.mxu0 %v9862_v59  ;;  %8534 = vmatprep.subr.bf16.mxu1 %v9876_v11 }
 0x50d   : > { %8515 = vmatpush3.bf16.msra.mxu0 %v9863_v14  ;;  %8535 = vmatpush3.bf16.msra.mxu1 %v9877_v56 }
 0x50e   : > { %8565 = vmatprep.subr.bf16.mxu0 %v10218_v50  ;;  %8536 = vmatprep.subr.bf16.mxu1 %v9878_v6 }
 0x510   : > { %7293 = vmatmul.mubr.bf16.vlgmr.msra.gmra.mxu0 %v6999_v4 }
 0x511   : > { %8581 = vmatprep.mubr.msk.bf16.mxu0 %vm10219_vm11, %v10218_v50  ;;  %8537 = vmatpush3.bf16.msra.mxu1 %v9879_v18 }
 0x512   : > { %8566 = vmatpush3.bf16.msra.mxu0 %v9880_v37 }
 0x513   : > { %8567 = vmatprep.subr.bf16.mxu0 %v10218_v50 }
 0x516   : > { %8568 = vmatpush3.bf16.msra.mxu0 %v9881_v38 }
 0x517   : > { %8569 = vmatprep.subr.bf16.mxu0 %v10218_v50 }
 0x51a   : > { %8570 = vmatpush3.bf16.msra.mxu0 %v9882_v5 }
 0x51b   : > { %8571 = vmatprep.subr.bf16.mxu0 %v10218_v50 }
 0x51e   : > { %8572 = vmatpush3.bf16.msra.mxu0 %v9883_v9 }
 0x51f   : > { %8573 = vmatprep.subr.bf16.mxu0 %v10218_v50 }
 0x522   : > { %8574 = vmatpush3.bf16.msra.mxu0 %v9884_v39 }
 0x523   : > { %8575 = vmatprep.subr.bf16.mxu0 %v10218_v50 }
 0x526   : > { %8576 = vmatpush3.bf16.msra.mxu0 %v9885_v34 }
 0x527   : > { %8577 = vmatprep.subr.bf16.mxu0 %v10218_v50 }
 0x52a   : > { %8578 = vmatpush3.bf16.msra.mxu0 %v9886_v33 }
 0x52b   : > { %8579 = vmatprep.subr.bf16.mxu0 %v10218_v50  ;;  %v7358_v50 = vld [vmem:[#allocation19] sm:$0x1] }
 0x530   : > { %v6721_v19 = vpop.f32.mrf.mxu0 }
 0x531   : > { %v6722_v32 = vadd.f32 %v6721_v19, %v6681_v61 }
 0x532   : > { %v6723_v57 = vpop.f32.mrf.mxu0  ;;  %v6762_v55 = vpop.f32.mrf.mxu1 }
 0x533   : > { %v6724_v35 = vadd.f32 %v6723_v57, %v6683_v26  ;;  %v6763_v49 = vadd.f32 %v6762_v55, %v6722_v32 }
 0x534   : > { %v6725_v12 = vpop.f32.mrf.mxu0  ;;  %v6764_v54 = vpop.f32.mrf.mxu1 }
 0x535   : > { %v6765_v52 = vadd.f32 %v6764_v54, %v6724_v35  ;;  %v9887_v35 = vld [vmem:[%s11658_s12] sm:$0xff]  }
 0x536   : > { %v6726_v58 = vpop.f32.mrf.mxu0  ;;  %v6766_v7 = vpop.f32.mrf.mxu1  ;;  %8580 = vmatpush3.bf16.msra.mxu0 %v9887_v35 }
 0x538   : > { %v6767_v30 = vpop.f32.mrf.mxu1 }
 0x570   : > { %v6803_v10 = vpop.f32.mrf.mxu0 }
 0x571   : > { %v6804_v16 = vadd.f32 %v6803_v10, %v6763_v49  ;;  %v7067_v49 = vld [vmem:[#allocation17] sm:$0x1] }
 0x572   : > { %v6805_v40 = vpop.f32.mrf.mxu0  ;;  %v6844_v41 = vpop.f32.mrf.mxu1 }
 0x573   : > { %v6806_v47 = vadd.f32 %v6805_v40, %v6765_v52  ;;  %v6845_v45 = vadd.f32 %v6844_v41, %v6804_v16 }
 0x574   : > { %v6807_v61 = vpop.f32.mrf.mxu0  ;;  %v6846_v42 = vpop.f32.mrf.mxu1 }
 0x575   : > { %v6847_v48 = vadd.f32 %v6846_v42, %v6806_v47 }
 0x576   : > { %v6808_v28 = vpop.f32.mrf.mxu0  ;;  %v6848_v26 = vpop.f32.mrf.mxu1 }
 0x578   : > { %v6849_v44 = vpop.f32.mrf.mxu1 }
 0x5b0   : > { %v6885_v46 = vpop.f32.mrf.mxu0 }
 0x5b1   : > { %v6886_v23 = vadd.f32 %v6885_v46, %v6845_v45 }
 0x5b2   : > { %v6887_v51 = vpop.f32.mrf.mxu0  ;;  %v6926_v53 = vpop.f32.mrf.mxu1 }
 0x5b3   : > { %v6888_v22 = vadd.f32 %v6887_v51, %v6847_v48  ;;  %v6927_v60 = vadd.f32 %v6926_v53, %v6886_v23 }
 0x5b4   : > { %v6889_v20 = vpop.f32.mrf.mxu0  ;;  %v6928_v25 = vpop.f32.mrf.mxu1 }
 0x5b5   : > { %v6956_v8 = vmul.f32 %v6945_v31, %v6927_v60  ;;  %v6929_v63 = vadd.f32 %v6928_v25, %v6888_v22 }
 0x5b6   : > { %v6890_v3 = vpop.f32.mrf.mxu0  ;;  %v6930_v2 = vpop.f32.mrf.mxu1 }
 0x5b7   : > { %v6981_v29 = vadd.f32 %v6970_v15, %v6956_v8  ;;  %v6957_v0 = vmul.f32 %v6949_v62, %v6929_v63 }
 0x5b8   : > { %v6931_v59 = vpop.f32.mrf.mxu1 }
 0x5b9   : > { %v6982_v14 = vadd.f32 %v6974_v36, %v6957_v0  ;;  %v6985_v17 = vmax.f32 %v6981_v29, 0.0 }
 0x5bb   : > { %v6986_v4 = vmax.f32 %v6982_v14, 0.0  ;;  %v7001_v27 = vpack.c.bf16 %v6985_v17, %v6985_v17 }
 0x5bd   : > { %v7002_v21 = vpack.c.bf16 %v6986_v4, %v6986_v4 }
 0x5bf   : > { %7332 = vmatprep.mubr.bf16.mxu1 %v7002_v21 }
 0x5c0   : > { %7333 = vmatmul.mubr.bf16.vlgmr.msra.gmra.mxu1 %v7001_v27 }
 0x5d0   : > { %v8516_v19 = vpop.f32.mrf.mxu0 }
 0x5d2   : > { %v8517_v13 = vpop.f32.mrf.mxu0 }
 0x5d3   : > { %v8518_v32 = vadd.f32 %v8517_v13, %v8516_v19 }
 0x5d4   : > { %v8519_v57 = vpop.f32.mrf.mxu0 }
 0x5d5   : > { %v7295_v54 = vadd.f32 %v8518_v32, %v7067_v49 }
 0x5d6   : > { %v8520_v55 = vpop.f32.mrf.mxu0 }
 0x680   : > { %v8538_v1 = vpop.f32.mrf.mxu1 }
 0x682   : > { %v8539_v12 = vpop.f32.mrf.mxu1 }
 0x683   : > { %v8540_v52 = vadd.f32 %v8539_v12, %v8538_v1 }
 0x684   : > { %v8541_v58 = vpop.f32.mrf.mxu1 }
 0x685   : > { %v7335_v7 = vadd.f32 %v8540_v52, %v7295_v54 }
 0x686   : > { %v8542_v11 = vpop.f32.mrf.mxu1 }
 0x687   : > { %v7340_v56 = vmax.f32 %v7335_v7, 0.0 }
 0x689   : > { %v7341_v30 = vpack.c.bf16 %v7340_v56, %v7340_v56 }
 0x68b   : > { %8582 = vmatmul.mubr.bf16.vlgmr.msra.gmra.mxu0 %v7341_v30 }
 0x74b   : > { %v7441_v6 = vpop.f32.mrf.mxu0 }
 0x74c   : > { %v7442_v18 = vadd.f32 %v7441_v6, %v7358_v50 }
 0x74d   : > { %v8583_v37 = vpop.f32.mrf.mxu0 }
 0x74e   : > { %7448 = vst.msk [vmem:[%s574_s15] sm:$0x1] %vm7447_vm6, %v7442_v18 }
 0x74f   : > { %v7444_v38 = vpop.f32.mrf.mxu0 }
 0x750   : > { %10135 = shalt.err (!%p10132_p5)
}
 0x751   : > { %s10136_s22 = scalar_lea.hbm %s11605_s19, 16  ;;  %s10140_s24 = scalar_lea.hbm %s11660_s14, 32 }
 0x752   : > { %p10137_p12 = scmp.ne.s32.totalorder %s11605_s19, %s10136_s22  ;;  %p10141_p8 = scmp.lt.s32.totalorder %s11605_s19, %s11660_s14 }
 0x753   : > { %p10142_p11 = scmp.lt.s32.totalorder %s10140_s24, %s10136_s22 }
 0x754   : > { %p10138_p6 = pnand %p10137_p12, %p11726_p2 }
 0x755   : > { %p10143_p0 = por %p10142_p11, %p10141_p8 }
 0x756   : > { %p10139_p10 = pneg %p10138_p6 }
 0x758   : > { %p10144_p1 = pnand %p10143_p0, %p10139_p10 }
 0x75a   : > { %10147 = shalt.err (!%p10144_p1)
}
 0x75b   : > { %8621 = dma.vmem_to_hbm [thread:$0]  (%p11726_p2), %s11607_s25, 16, %s11605_s19, %s7450_s27   ;;  %v8584_v5 = vpop.f32.mrf.mxu0 }
 0x75c PF: > { %s11727_s20 = sld [smem:[#allocation30_spill]]  ;;  %p8673_p3 = scmp.ge.s32.totalorder %s10202_s16, 2 }
 0x75d   : > { %s7474_s21 = sand.u32 1, %s10190_s29  }
 0x75e   : > { %s7475_s17 = scalar_lea.sflag [#allocation7], %s7474_s21 }
 0x762   : > { %p11728_p9 = scmp.ne.s32.totalorder %s11727_s20, 0 }
 0x764   : > { %p8652_p13 = pnand %p8673_p3, %p11728_p9 }
 0x766   : > { %p8653_p4 = pneg %p8652_p13 }
 0x768   : > { %10185 = dma.done.wait (%p8653_p4), %s7475_s17, 16  }
 0x769   : > { %10187 = vsyncadd (%p8653_p4), %s7475_s17, 4294967280  ;;  %s11729_s16 = sld [smem:[#allocation28_spill]]  ;;  %s11732_s29 = smov %s10194_s30 }
 0x76a   : > { %s11730_s18 = sld [smem:[#allocation27_spill]] }
 0x76b   : > { %s11731_s15 = sld [smem:[#allocation29_spill]] }
 0x76f   : > { %p29_p7 = scmp.ge.s32.totalorder %s11729_s16, 4  }
 0x770   : > { %s11733_s30 = smov %s11730_s18 }
 0x771   :  { %31 = sbr.rel (!%p29_p7) target bundleno = 12 (0xc), region = 148 }
 0x776   :  { %7479 = vsyncpa [#allocation6], 1 }
 0x777   :  { %7481 = vsyncpa [#allocation6 + $0x1], 1 }
 0x778   :  { %7482 = vsyncpa [#allocation9], 1 }
 0x779   :  { %7483 = vsyncpa [#allocation12], 1 }
 0x77a   :  { %7484 = vsyncpa [#allocation15], 1 }
 0x77b   :  { %7485 = vsyncpa [#allocation18], 1 }
 0x77c   :  { %7486 = vsyncpa [#allocation7], 1 }
 0x77d   :  { %7488 = vsyncpa [#allocation7 + $0x1], 1 }

</bundles_post_ra>
